<compile_context>
chip_gen: v7x
topology: tpu7x:2x2x1
jax: 0.10.0
libtpu: 0.0.40
codegen_flags: <defaults>
</compile_context>

<pallas_src>
import jax
import jax.numpy as jnp
from jax.experimental import pallas as pl
from jax.experimental.pallas import tpu as pltpu

# ---- problem sizes ----------------------------------------------------------
N = 8      # instances per bag (CT slices in a series)
L = 32     # per-instance feature dim
D = 16     # attention hidden dim
K = 1      # attention heads
C = 4      # output classes

LANE = 128           # TPU lane width; classifier output is padded to this
BAGS_PER_BLOCK = 64  # bags per grid step -> (512, 32) activation tile

# packed-parameter row layout (all starts 8-row aligned)
ROW_VW = 0            # rows [0, L)        : Linear(L, D).weight.T   in cols [0, D)
ROW_CW = L            # rows [L, 2L)       : Linear(L, C).weight.T   in cols [0, C)
ROW_VB = 2 * L        # row 2L             : Linear(L, D).bias       in cols [0, D)
ROW_WW = 2 * L + 8    # row 2L + 8         : Linear(D, 1).weight row in cols [0, D)
ROW_WB = 2 * L + 16   # row 2L + 16        : Linear(D, 1).bias       in col 0
ROW_CB = 2 * L + 24   # row 2L + 24        : Linear(L, C).bias       in cols [0, C)
P_ROWS = 2 * L + 32   # 96 rows total (multiple of 8)


def _mil_kernel(x_ref, p_ref, out_ref):
    """One bag-block: x_ref (BAGS_PER_BLOCK*N, L), p_ref (P_ROWS, 128),
    out_ref (BAGS_PER_BLOCK, 128)."""
    x = x_ref[...]                                           # (BN, L) f32

    # static views into the single packed parameter buffer (no extra DMAs)
    vw = p_ref[ROW_VW:ROW_VW + L, 0:D]                       # (L, D)
    cw = p_ref[ROW_CW:ROW_CW + L, :]                         # (L, 128), zero beyond C
    vb = p_ref[ROW_VB:ROW_VB + 1, 0:D]                       # (1, D)
    ww = p_ref[ROW_WW:ROW_WW + 1, 0:D]                       # (1, D)  (Linear(D,1).weight)
    wb = p_ref[ROW_WB:ROW_WB + 1, 0:1]                       # (1, 1)
    cb = p_ref[ROW_CB:ROW_CB + 1, :]                         # (1, 128), zero beyond C

    # attention hidden layer: the only "real" matmul -> MXU, (BN, L) @ (L, D)
    h = jnp.tanh(
        jnp.dot(x, vw, preferred_element_type=jnp.float32) + vb
    )                                                        # (BN, D)

    # K = 1 attention head: rank-1 contraction on the VPU + lane reduce (off the MXU)
    scores = jnp.sum(h * ww, axis=-1, keepdims=True) + wb    # (BN, 1)

    # per-bag softmax over the N instances (softmax(scores.t(), dim=1) in PyTorch)
    s = scores.reshape(BAGS_PER_BLOCK, N, 1)
    s_max = jnp.max(s, axis=1, keepdims=True)                # (bags, 1, 1)
    e = jnp.exp(s - s_max)                                   # (bags, N, 1)
    denom = jnp.sum(e, axis=1, keepdims=True)                # (bags, 1, 1)
    attn = e * pl.reciprocal(denom, approx=False)            # (bags, N, 1)

    # z = A @ x per bag: another rank-1 contraction, sublane reduce on the VPU/XLU
    xr = x.reshape(BAGS_PER_BLOCK, N, L)
    z = jnp.sum(attn * xr, axis=1)                           # (bags, L)

    # classifier, lane-padded to 128 -> unmasked, lane-dense store
    out_ref[...] = (
        jnp.dot(z, cw, preferred_element_type=jnp.float32) + cb
    )                                                        # (bags, 128)


def pack_params(vw, vb, ww, wb, cw, cb):
    """Pack all MIL parameters into one zero-padded (P_ROWS, 128) f32 buffer.

    vw: (L, D)  Linear(L, D).weight.T      vb: (D,)
    ww: (D, K)  Linear(D, K).weight.T      wb: (K,)
    cw: (L, C)  Linear(L, C).weight.T      cb: (C,)
    """
    buf = jnp.zeros((P_ROWS, LANE), jnp.float32)
    buf = buf.at[ROW_VW:ROW_VW + L, 0:D].set(vw.astype(jnp.float32))
    buf = buf.at[ROW_CW:ROW_CW + L, 0:C].set(cw.astype(jnp.float32))
    buf = buf.at[ROW_VB, 0:D].set(vb.astype(jnp.float32).reshape(D))
    buf = buf.at[ROW_WW, 0:D].set(ww.astype(jnp.float32).reshape(D))
    buf = buf.at[ROW_WB, 0].set(wb.astype(jnp.float32).reshape(())[()])
    buf = buf.at[ROW_CB, 0:C].set(cb.astype(jnp.float32).reshape(C))
    return buf


def mil_forward_batched(x, params):
    """x: (B, N, L) float32 bags, params: packed (P_ROWS, 128). Returns (B, C) logits."""
    B = x.shape[0]
    num_blocks = pl.cdiv(B, BAGS_PER_BLOCK)
    B_pad = num_blocks * BAGS_PER_BLOCK
    if B_pad != B:
        # pad with whole zero bags only (never the instance axis N), so every real
        # bag's softmax is untouched; padded bags' outputs are sliced away below.
        x = jnp.pad(x, ((0, B_pad - B), (0, 0), (0, 0)))
    x2 = x.reshape(B_pad * N, L).astype(jnp.float32)

    out = pl.pallas_call(
        _mil_kernel,
        out_shape=jax.ShapeDtypeStruct((B_pad, LANE), jnp.float32),
        grid_spec=pltpu.PrefetchScalarGridSpec(
            num_scalar_prefetch=0,
            grid=(num_blocks,),
            in_specs=[
                pl.BlockSpec((BAGS_PER_BLOCK * N, L), lambda i: (i, 0)),
                pl.BlockSpec((P_ROWS, LANE), lambda i: (0, 0)),  # params: resident
            ],
            out_specs=pl.BlockSpec((BAGS_PER_BLOCK, LANE), lambda i: (i, 0)),
        ),
        compiler_params=pltpu.CompilerParams(
            dimension_semantics=("parallel",),  # bag-blocks are independent (v7x 2 TCs)
        ),
    )(x2, params)
    return out[:B, :C]


def mil_forward(x_bag, params):
    """Single-bag forward matching the PyTorch module exactly: (N, L) -> (K, C)."""
    return mil_forward_batched(x_bag[None], params).reshape(K, C)


# ---- pure-JAX reference ------------------------------------------------------
def _reference_batched(x, vw, vb, ww, wb, cw, cb):
    hp = jax.lax.Precision.HIGHEST
    h = jnp.tanh(jnp.einsum("bnl,ld->bnd", x, vw, precision=hp) + vb)     # (B, N, D)
    scores = jnp.einsum("bnd,dk->bnk", h, ww, precision=hp) + wb          # (B, N, K)
    attn = jax.nn.softmax(scores, axis=1)                                 # softmax over N
    z = jnp.einsum("bnk,bnl->bl", attn, x, precision=hp)                  # (B, L) (K=1)
    return jnp.einsum("bl,lc->bc", z, cw, precision=hp) + cb              # (B, C)


if __name__ == "__main__":
    key = jax.random.PRNGKey(0)
    ks = jax.random.split(key, 7)

    B = 256  # bags per call (batched path; 4 grid steps of 64 bags)
    x  = jax.random.normal(ks[0], (B, N, L), dtype=jnp.float32)
    vw = jax.random.normal(ks[1], (L, D), dtype=jnp.float32) * 0.1   # Linear(L, D).weight.T
    vb = jax.random.normal(ks[2], (D,),  dtype=jnp.float32) * 0.1
    ww = jax.random.normal(ks[3], (D, K), dtype=jnp.float32) * 0.1   # Linear(D, K).weight.T
    wb = jax.random.normal(ks[4], (K,),  dtype=jnp.float32) * 0.1
    cw = jax.random.normal(ks[5], (L, C), dtype=jnp.float32) * 0.1   # Linear(L, C).weight.T
    cb = jax.random.normal(ks[6], (C,),  dtype=jnp.float32) * 0.1

    params = pack_params(vw, vb, ww, wb, cw, cb)

    # batched path
    out = jax.block_until_ready(mil_forward_batched(x, params))
    ref = jax.block_until_ready(_reference_batched(x, vw, vb, ww, wb, cw, cb))
    assert out.shape == (B, C)
    assert jnp.allclose(out, ref, atol=1e-4, rtol=1e-4)

    # single-bag path (exact semantics of the wrapped PyTorch module `f`)
    out1 = jax.block_until_ready(mil_forward(x[0], params))
    ref1 = _reference_batched(x[:1], vw, vb, ww, wb, cw, cb).reshape(K, C)
    assert out1.shape == (K, C)
    assert jnp.allclose(out1, ref1, atol=1e-4, rtol=1e-4)

    print("KERNEL_OK")
</pallas_src>

<mosaic_0001>
module attributes {stable_mosaic.version = 11 : i64} {
  func.func @_mil_kernel(%arg0: i32, %arg1: memref<512x32xf32, #tpu.memory_space<vmem>>, %arg2: memref<96x128xf32, #tpu.memory_space<vmem>>, %arg3: memref<64x128xf32, #tpu.memory_space<vmem>>) attributes {dimension_semantics = [#tpu.dimension_semantics<parallel>], iteration_bounds = array<i64: 4>, scalar_prefetch = 0 : i64, scratch_operands = 0 : i64, tpu.core_type = #tpu.core_type<tc>, window_params = [{transform_indices = @transform_0, window_bounds = array<i64: 512, 32>}, {pipeline_mode = #tpu.pipeline_mode<synchronous>, transform_indices = @transform_1, window_bounds = array<i64: 96, 128>}, {transform_indices = @transform_2, window_bounds = array<i64: 64, 128>}]} {
    %c0 = arith.constant 0 : index
    %c0_0 = arith.constant 0 : index
    %0 = vector.load %arg1[%c0, %c0_0] : memref<512x32xf32, #tpu.memory_space<vmem>>, vector<512x32xf32>
    %c0_1 = arith.constant 0 : index
    %c0_2 = arith.constant 0 : index
    %1 = vector.load %arg2[%c0_1, %c0_2] : memref<96x128xf32, #tpu.memory_space<vmem>>, vector<32x16xf32>
    %c32 = arith.constant 32 : index
    %c0_3 = arith.constant 0 : index
    %2 = vector.load %arg2[%c32, %c0_3] : memref<96x128xf32, #tpu.memory_space<vmem>>, vector<32x128xf32>
    %c64 = arith.constant 64 : index
    %c0_4 = arith.constant 0 : index
    %3 = vector.load %arg2[%c64, %c0_4] : memref<96x128xf32, #tpu.memory_space<vmem>>, vector<1x16xf32>
    %c72 = arith.constant 72 : index
    %c0_5 = arith.constant 0 : index
    %4 = vector.load %arg2[%c72, %c0_5] : memref<96x128xf32, #tpu.memory_space<vmem>>, vector<1x16xf32>
    %c80 = arith.constant 80 : index
    %c0_6 = arith.constant 0 : index
    %5 = vector.load %arg2[%c80, %c0_6] : memref<96x128xf32, #tpu.memory_space<vmem>>, vector<1x1xf32>
    %c88 = arith.constant 88 : index
    %c0_7 = arith.constant 0 : index
    %6 = vector.load %arg2[%c88, %c0_7] : memref<96x128xf32, #tpu.memory_space<vmem>>, vector<1x128xf32>
    %cst = arith.constant dense<0.000000e+00> : vector<512x16xf32>
    %7 = tpu.matmul %0, %1, %cst {dimension_numbers = #tpu.dot_dimension_numbers<[1], [0], [0], [1], [0, 0, 1, 1], [], []>} : vector<512x32xf32>, vector<32x16xf32>, vector<512x16xf32> -> vector<512x16xf32>
    %8 = vector.broadcast %3 : vector<1x16xf32> to vector<512x16xf32>
    %9 = arith.addf %7, %8 : vector<512x16xf32>
    %10 = math.tanh %9 : vector<512x16xf32>
    %11 = vector.broadcast %4 : vector<1x16xf32> to vector<512x16xf32>
    %12 = arith.mulf %10, %11 : vector<512x16xf32>
    %cst_8 = arith.constant dense<0.000000e+00> : vector<512xf32>
    %13 = vector.multi_reduction <add>, %12, %cst_8 [1] : vector<512x16xf32> to vector<512xf32>
    %14 = vector.shape_cast %13 : vector<512xf32> to vector<512x1xf32>
    %15 = vector.broadcast %5 : vector<1x1xf32> to vector<512x1xf32>
    %16 = arith.addf %14, %15 : vector<512x1xf32>
    %17 = vector.shape_cast %16 : vector<512x1xf32> to vector<64x8x1xf32>
    %cst_9 = arith.constant dense<0xFF800000> : vector<64x1xf32>
    %18 = vector.multi_reduction <maximumf>, %17, %cst_9 [1] : vector<64x8x1xf32> to vector<64x1xf32>
    %19 = vector.shape_cast %18 : vector<64x1xf32> to vector<64x1x1xf32>
    %20 = vector.broadcast %19 : vector<64x1x1xf32> to vector<64x8x1xf32>
    %21 = arith.subf %17, %20 : vector<64x8x1xf32>
    %22 = math.exp %21 : vector<64x8x1xf32>
    %cst_10 = arith.constant dense<0.000000e+00> : vector<64x1xf32>
    %23 = vector.multi_reduction <add>, %22, %cst_10 [1] : vector<64x8x1xf32> to vector<64x1xf32>
    %24 = vector.shape_cast %23 : vector<64x1xf32> to vector<64x1x1xf32>
    %25 = tpu.reciprocal %24 : vector<64x1x1xf32> -> vector<64x1x1xf32>
    %26 = vector.broadcast %25 : vector<64x1x1xf32> to vector<64x8x1xf32>
    %27 = arith.mulf %22, %26 : vector<64x8x1xf32>
    %28 = vector.shape_cast %0 : vector<512x32xf32> to vector<64x8x32xf32>
    %29 = vector.broadcast %27 : vector<64x8x1xf32> to vector<64x8x32xf32>
    %30 = arith.mulf %29, %28 : vector<64x8x32xf32>
    %cst_11 = arith.constant dense<0.000000e+00> : vector<64x32xf32>
    %31 = vector.multi_reduction <add>, %30, %cst_11 [1] : vector<64x8x32xf32> to vector<64x32xf32>
    %cst_12 = arith.constant dense<0.000000e+00> : vector<64x128xf32>
    %32 = tpu.matmul %31, %2, %cst_12 {dimension_numbers = #tpu.dot_dimension_numbers<[1], [0], [0], [1], [0, 0, 1, 1], [], []>} : vector<64x32xf32>, vector<32x128xf32>, vector<64x128xf32> -> vector<64x128xf32>
    %33 = vector.broadcast %6 : vector<1x128xf32> to vector<64x128xf32>
    %34 = arith.addf %32, %33 : vector<64x128xf32>
    %c0_13 = arith.constant 0 : index
    %c0_14 = arith.constant 0 : index
    %35 = vector.load %arg3[%c0_13, %c0_14] : memref<64x128xf32, #tpu.memory_space<vmem>>, vector<64x128xf32>
    tpu.vector_store %arg3[%c0_13, %c0_14], %34 {strides = array<i32>} : memref<64x128xf32, #tpu.memory_space<vmem>>, vector<64x128xf32>,
    return
  }
  func.func @transform_0(%arg0: i32) -> (i32, i32) {
    %c0_i32 = arith.constant 0 : i32
    %c0_i32_0 = arith.constant 0 : i32
    return %arg0, %c0_i32 : i32, i32
  }
  func.func @transform_1(%arg0: i32) -> (i32, i32) {
    %c0_i32 = arith.constant 0 : i32
    %c0_i32_0 = arith.constant 0 : i32
    %c0_i32_1 = arith.constant 0 : i32
    return %c0_i32, %c0_i32_0 : i32, i32
  }
  func.func @transform_2(%arg0: i32) -> (i32, i32) {
    %c0_i32 = arith.constant 0 : i32
    %c0_i32_0 = arith.constant 0 : i32
    return %arg0, %c0_i32 : i32, i32
  }
}

</mosaic_0001>

<bundles_post_ra>
// kernel: tpu_custom_call.1
= control target key start
LH: loop header
LB: loop body
LE: loop exit
PB: predicated region body
PF: predicated region fallthrough
CT: control target
= control target key end

     0   :  { %7 = vsyncpa [#allocation3], 0  ;;  %s6486_s0 = inlined_call_operand.vmem [shape: f32[2048,32], index: 0, kind: input, shape index: {}]   ;;  %s6487_s1 = inlined_call_operand.vmem [shape: f32[96,128], index: 1, kind: input, shape index: {}]   ;;  %s6488_s2 = inlined_call_operand.hbm [shape: f32[256,128], index: 2, kind: output, shape index: {}]  }
   0x1   :  { %9 = vsyncpa [#allocation3 + $0x1], 0  ;;  %s4471_s9 = smov 0   ;;  %s4473_s10 = smov 0  }
   0x2   :  { %s4475_s11 = smov 0   ;;  %s4477_s12 = smov 0  }
   0x3 LB: > { %s4492_s13 = sadd.s32 4294967295, %s4450_s12   ;;  %s3581_s14 = sadd.s32 4294967294, %s4450_s12   ;;  %s4450_s12 = sphi %s4477_s12, %s6681_s12   ;;  %s4446_s11 = sphi %s4475_s11, %s6680_s11   ;;  %s4442_s10 = sphi %s4473_s10, %s6679_s10   ;;  %s4438_s9 = sphi %s4471_s9, %s6678_s9  }
   0x4   : > { %s4496_s15 = sadd.s32 1, %s4450_s12   ;;  %s69_s16 = sadd.s32 1, %s4446_s11 }
   0x5   : > { %s66_s17 = ssub.s32 %s4450_s12, %s4496_s15  ;;  %p79_p0 = scmp.ne.s32.totalorder %s4446_s11, %s4442_s10 }
   0x6   : > { %p67_p1 = scmp.eq.s32.totalorder %s66_s17, 0  ;;  %p80_p2 = scmp.eq.s32.totalorder %s4492_s13, 3 }
   0x7   : > { %p85_p3 = scmp.ne.s32.totalorder %s4442_s10, %s4438_s9  ;;  %p86_p4 = scmp.eq.s32.totalorder %s3581_s14, 3 }
   0x8   : > { %s4507_s18 = scalar_select %p67_p1, %s4446_s11, %s69_s16  }
   0x9   : > { %p4509_p5 = por %p80_p2, %p79_p0  ;;  %p4513_p6 = por %p86_p4, %p85_p3 }
   0xa   : > { %p3584_p7 = scmp.ge.s32.totalorder %s4450_s12, 1  ;;  %p116_p8 = scmp.lt.s32.totalorder %s4450_s12, 5 }
   0xc   : > { %p117_p9 = pnand %p3584_p7, %p116_p8 }
   0xe   : > { %120 = sbr.rel (%p117_p9) target bundleno = 1148 (0x47c), region = 28 }
  0x15   : > { %v209_v0 = vld [vmem:[%s6487_s1] sm:$0xff]  ;;  %v210_v1 = vld [vmem:[%s6487_s1 + $0x8] sm:$0xff]  ;;  %v211_v2 = vld [vmem:[%s6487_s1 + $0x10] sm:$0xff]  ;;  %s3586_s27 = sshll.u32 %s4492_s13, 6  ;;  %vm225_vm0 = vcmask 261120   ;;  %vm935_vm1 = vcmask 130048  }
  0x16   : > { %v3874_v3 = vpack.c.bf16 %v210_v1, %v209_v0  ;;  %v212_v4 = vld [vmem:[%s6487_s1 + $0x18] sm:$0xff]  ;;  %p139_p10 = scmp.lt.s32.totalorder %s3586_s27, 255  ;;  %vm1196_vm2 = vcmask 7168   ;;  %vm3313_vm3 = vcmask 1041409   ;;  %vm3315_vm4 = vcmask 1042434   ;;  %s3669_s16 = sshll.u32 %s4492_s13, 10 }
  0x17   : > { %v3878_v5 = vpack.c.bf16 %v212_v4, %v211_v2  ;;  %vm3317_vm5 = vcmask 1043459   ;;  %vm3319_vm6 = vcmask 1044484   ;;  %vm3321_vm7 = vcmask 1045509   ;;  %s6439_s23 = scalar_lea.hbm %s6488_s2, %s3669_s16  ;;  %s4453_s25 = smov [#allocation2]  }
  0x18   : > { %3875 = vmatprep.subr.bf16.mxu0 %v3874_v3  ;;  %3890 = vmatprep.subr.bf16.mxu1 %v3874_v3  ;;  %s6683_s27 = smov (!%p139_p10, %s3586_s27), 255  ;;  %vm3323_vm8 = vcmask 1046534   ;;  %vm3325_vm9 = vcmask 1047559   ;;  %s4392_s26 = sshll.u32 %s4453_s25, 4  ;;  %s4393_s26 = int_to_ptr.vmem [resolvable:$false] %s4392_s26 }
  0x19   : > { %3877 = vmatpush3.bf16.msra.mxu0 %v3874_v3  ;;  %3892 = vmatpush3.bf16.msra.mxu1 %v3874_v3  ;;  %s3587_s30 = sshll.u32 %s6683_s27, 3  ;;  %s4394_s27 = scalar_lea.vmem %s4393_s26, 2048 }
  0x1a   : > { %3879 = vmatprep.subr.bf16.mxu0 %v3878_v5  ;;  %3891 = vmatprep.subr.bf16.mxu1 %v3878_v5  ;;  %s4535_s5 = scalar_lea.vmem %s6486_s0, %s3587_s30 }
  0x1b   : > { %v145_v6 = vld [vmem:[%s4535_s5] sm:$0xff]  ;;  %v146_v8 = vld [vmem:[%s4535_s5 + $0x8] sm:$0xff]  ;;  %v147_v10 = vld [vmem:[%s4535_s5 + $0x10] sm:$0xff] }
  0x1c   : > { %v181_v7 = vld [vmem:[%s4535_s5 + $0x120] sm:$0xff]  ;;  %v182_v9 = vld [vmem:[%s4535_s5 + $0x128] sm:$0xff]  ;;  %3758 = vmatprep.mubr.msk.f32.mxu0 %vm225_vm0, %v145_v6  ;;  %v183_v11 = vld [vmem:[%s4535_s5 + $0x130] sm:$0xff] }
  0x1d   : > { %3881 = vmatpush3.bf16.msra.mxu0 %v3878_v5  ;;  %3893 = vmatpush3.bf16.msra.mxu1 %v3878_v5  ;;  %v148_v12 = vld [vmem:[%s4535_s5 + $0x18] sm:$0xff]  ;;  %v185_v14 = vld [vmem:[%s4535_s5 + $0x140] sm:$0xff]  ;;  %v186_v16 = vld [vmem:[%s4535_s5 + $0x148] sm:$0xff] }
  0x1e   : > { %3812 = vmatprep.mubr.msk.f32.mxu1 %vm225_vm0, %v181_v7  ;;  %v184_v13 = vld [vmem:[%s4535_s5 + $0x138] sm:$0xff]  ;;  %v149_v15 = vld [vmem:[%s4535_s5 + $0x20] sm:$0xff]  ;;  %v150_v17 = vld [vmem:[%s4535_s5 + $0x28] sm:$0xff] }
  0x1f   : > { %v151_v18 = vld [vmem:[%s4535_s5 + $0x30] sm:$0xff]  ;;  %v152_v20 = vld [vmem:[%s4535_s5 + $0x38] sm:$0xff]  ;;  %v153_v22 = vld [vmem:[%s4535_s5 + $0x40] sm:$0xff] }
  0x20   : > { %3759 = vmatmul.mubr.msk.f32.vlgmr.msra.gmra.mrb[0].mxu0 %vm225_vm0, %v146_v8  ;;  %3813 = vmatmul.mubr.msk.f32.vlgmr.msra.gmra.mrb[0].mxu1 %vm225_vm0, %v182_v9  ;;  %v187_v19 = vld [vmem:[%s4535_s5 + $0x150] sm:$0xff]  ;;  %v188_v21 = vld [vmem:[%s4535_s5 + $0x158] sm:$0xff]  ;;  %v189_v23 = vld [vmem:[%s4535_s5 + $0x160] sm:$0xff] }
  0x21   : > { %3761 = vmatprep.mubr.msk.f32.mxu0 %vm225_vm0, %v147_v10  ;;  %3815 = vmatprep.mubr.msk.f32.mxu1 %vm225_vm0, %v183_v11  ;;  %v154_v24 = vld [vmem:[%s4535_s5 + $0x48] sm:$0xff]  ;;  %v155_v26 = vld [vmem:[%s4535_s5 + $0x50] sm:$0xff]  ;;  %v156_v28 = vld [vmem:[%s4535_s5 + $0x58] sm:$0xff] }
  0x22   : > { %v190_v25 = vld [vmem:[%s4535_s5 + $0x168] sm:$0xff]  ;;  %v191_v27 = vld [vmem:[%s4535_s5 + $0x170] sm:$0xff]  ;;  %v192_v29 = vld [vmem:[%s4535_s5 + $0x178] sm:$0xff] }
  0x23   : > { %v157_v30 = vld [vmem:[%s4535_s5 + $0x60] sm:$0xff]  ;;  %v158_v32 = vld [vmem:[%s4535_s5 + $0x68] sm:$0xff]  ;;  %v159_v34 = vld [vmem:[%s4535_s5 + $0x70] sm:$0xff] }
  0x24   : > { %3762 = vmatmul.mubr.msk.f32.gmra.mrb[2].mxu0 %vm225_vm0, %v148_v12  ;;  %3816 = vmatmul.mubr.msk.f32.gmra.mrb[2].mxu1 %vm225_vm0, %v184_v13  ;;  %v193_v31 = vld [vmem:[%s4535_s5 + $0x180] sm:$0xff]  ;;  %v194_v33 = vld [vmem:[%s4535_s5 + $0x188] sm:$0xff]  ;;  %v195_v35 = vld [vmem:[%s4535_s5 + $0x190] sm:$0xff] }
  0x25   : > { %3818 = vmatprep.mubr.msk.f32.mxu1 %vm225_vm0, %v185_v14  ;;  %3764 = vmatprep.mubr.msk.f32.mxu0 %vm225_vm0, %v149_v15  ;;  %v160_v36 = vld [vmem:[%s4535_s5 + $0x78] sm:$0xff]  ;;  %v197_v38 = vld [vmem:[%s4535_s5 + $0x1a0] sm:$0xff]  ;;  %v198_v40 = vld [vmem:[%s4535_s5 + $0x1a8] sm:$0xff] }
  0x26   : > { %v196_v37 = vld [vmem:[%s4535_s5 + $0x198] sm:$0xff]  ;;  %v161_v39 = vld [vmem:[%s4535_s5 + $0x80] sm:$0xff]  ;;  %v162_v41 = vld [vmem:[%s4535_s5 + $0x88] sm:$0xff] }
  0x27   : > { %v199_v42 = vld [vmem:[%s4535_s5 + $0x1b0] sm:$0xff]  ;;  %v200_v44 = vld [vmem:[%s4535_s5 + $0x1b8] sm:$0xff]  ;;  %v201_v46 = vld [vmem:[%s4535_s5 + $0x1c0] sm:$0xff] }
  0x28   : > { %3819 = vmatmul.mubr.msk.f32.gmra.mrb[4].mxu1 %vm225_vm0, %v186_v16  ;;  %3765 = vmatmul.mubr.msk.f32.gmra.mrb[4].mxu0 %vm225_vm0, %v150_v17  ;;  %v163_v43 = vld [vmem:[%s4535_s5 + $0x90] sm:$0xff]  ;;  %v164_v45 = vld [vmem:[%s4535_s5 + $0x98] sm:$0xff]  ;;  %v165_v47 = vld [vmem:[%s4535_s5 + $0xa0] sm:$0xff] }
  0x29   : > { %3767 = vmatprep.mubr.msk.f32.mxu0 %vm225_vm0, %v151_v18  ;;  %3821 = vmatprep.mubr.msk.f32.mxu1 %vm225_vm0, %v187_v19  ;;  %v202_v48 = vld [vmem:[%s4535_s5 + $0x1c8] sm:$0xff]  ;;  %v167_v50 = vld [vmem:[%s4535_s5 + $0xb0] sm:$0xff]  ;;  %v168_v52 = vld [vmem:[%s4535_s5 + $0xb8] sm:$0xff] }
  0x2a   : > { %v166_v49 = vld [vmem:[%s4535_s5 + $0xa8] sm:$0xff]  ;;  %v203_v51 = vld [vmem:[%s4535_s5 + $0x1d0] sm:$0xff]  ;;  %v204_v53 = vld [vmem:[%s4535_s5 + $0x1d8] sm:$0xff] }
  0x2b   : > { %v205_v54 = vld [vmem:[%s4535_s5 + $0x1e0] sm:$0xff]  ;;  %v206_v56 = vld [vmem:[%s4535_s5 + $0x1e8] sm:$0xff]  ;;  %v171_v58 = vld [vmem:[%s4535_s5 + $0xd0] sm:$0xff] }
  0x2c   : > { %3768 = vmatmul.mubr.msk.f32.gmra.mrb[6].mxu0 %vm225_vm0, %v152_v20  ;;  %3822 = vmatmul.mubr.msk.f32.gmra.mrb[6].mxu1 %vm225_vm0, %v188_v21  ;;  %v169_v55 = vld [vmem:[%s4535_s5 + $0xc0] sm:$0xff]  ;;  %v170_v57 = vld [vmem:[%s4535_s5 + $0xc8] sm:$0xff]  ;;  %v207_v59 = vld [vmem:[%s4535_s5 + $0x1f0] sm:$0xff] }
  0x2d   : > { %3770 = vmatprep.mubr.msk.f32.mxu0 %vm225_vm0, %v153_v22  ;;  %3824 = vmatprep.mubr.msk.f32.mxu1 %vm225_vm0, %v189_v23  ;;  %v172_v60 = vld [vmem:[%s4535_s5 + $0xd8] sm:$0xff]  ;;  %v173_v62 = vld [vmem:[%s4535_s5 + $0xe0] sm:$0xff]  ;;  %v174_v63 = vld [vmem:[%s4535_s5 + $0xe8] sm:$0xff] }
  0x2e   : > { %v208_v61 = vld [vmem:[%s4535_s5 + $0x1f8] sm:$0xff]  ;;  %v175_v0 = vld [vmem:[%s4535_s5 + $0xf0] sm:$0xff]  ;;  %v177_v2 = vld [vmem:[%s4535_s5 + $0x100] sm:$0xff] }
  0x2f   : > { %v176_v1 = vld [vmem:[%s4535_s5 + $0xf8] sm:$0xff]  ;;  %v178_v3 = vld [vmem:[%s4535_s5 + $0x108] sm:$0xff]  ;;  %v179_v4 = vld [vmem:[%s4535_s5 + $0x110] sm:$0xff] }
  0x30   : > { %3771 = vmatmul.mubr.msk.f32.gmra.mrb[8].mxu0 %vm225_vm0, %v154_v24  ;;  %3825 = vmatmul.mubr.msk.f32.gmra.mrb[8].mxu1 %vm225_vm0, %v190_v25  ;;  %v180_v5 = vld [vmem:[%s4535_s5 + $0x118] sm:$0xff]  ;;  %v4668_v6 = vld [vmem:[%s6487_s1 + $0x40] ss:$0 sm:$0xff] }
  0x31   : > { %3773 = vmatprep.mubr.msk.f32.mxu0 %vm225_vm0, %v155_v26  ;;  %3827 = vmatprep.mubr.msk.f32.mxu1 %vm225_vm0, %v191_v27 }
  0x34   : > { %3774 = vmatmul.mubr.msk.f32.gmra.mrb[10].mxu0 %vm225_vm0, %v156_v28  ;;  %3828 = vmatmul.mubr.msk.f32.gmra.mrb[10].mxu1 %vm225_vm0, %v192_v29  ;;  %v4682_v28 = vld [vmem:[%s6487_s1 + $0x48] ss:$0 sm:$0xff] }
  0x35   : > { %3776 = vmatprep.mubr.msk.f32.mxu0 %vm225_vm0, %v157_v30  ;;  %3830 = vmatprep.mubr.msk.f32.mxu1 %vm225_vm0, %v193_v31 }
  0x38   : > { %3777 = vmatmul.mubr.msk.f32.gmra.mrb[12].mxu0 %vm225_vm0, %v158_v32  ;;  %3831 = vmatmul.mubr.msk.f32.gmra.mrb[12].mxu1 %vm225_vm0, %v194_v33 }
  0x39   : > { %3779 = vmatprep.mubr.msk.f32.mxu0 %vm225_vm0, %v159_v34  ;;  %3833 = vmatprep.mubr.msk.f32.mxu1 %vm225_vm0, %v195_v35 }
  0x3c   : > { %3780 = vmatmul.mubr.msk.f32.gmra.mrb[14].mxu0 %vm225_vm0, %v160_v36  ;;  %3834 = vmatmul.mubr.msk.f32.gmra.mrb[14].mxu1 %vm225_vm0, %v196_v37 }
  0x3d   : > { %3836 = vmatprep.mubr.msk.f32.mxu1 %vm225_vm0, %v197_v38  ;;  %3782 = vmatprep.mubr.msk.f32.mxu0 %vm225_vm0, %v161_v39 }
  0x40   : > { %3837 = vmatmul.mubr.msk.f32.gmra.mrb[16].mxu1 %vm225_vm0, %v198_v40  ;;  %3783 = vmatmul.mubr.msk.f32.gmra.mrb[16].mxu0 %vm225_vm0, %v162_v41 }
  0x41   : > { %3839 = vmatprep.mubr.msk.f32.mxu1 %vm225_vm0, %v199_v42  ;;  %3785 = vmatprep.mubr.msk.f32.mxu0 %vm225_vm0, %v163_v43 }
  0x44   : > { %3840 = vmatmul.mubr.msk.f32.gmra.mrb[18].mxu1 %vm225_vm0, %v200_v44  ;;  %3786 = vmatmul.mubr.msk.f32.gmra.mrb[18].mxu0 %vm225_vm0, %v164_v45 }
  0x45   : > { %3842 = vmatprep.mubr.msk.f32.mxu1 %vm225_vm0, %v201_v46  ;;  %3788 = vmatprep.mubr.msk.f32.mxu0 %vm225_vm0, %v165_v47 }
  0x48   : > { %3843 = vmatmul.mubr.msk.f32.gmra.mrb[20].mxu1 %vm225_vm0, %v202_v48  ;;  %3789 = vmatmul.mubr.msk.f32.gmra.mrb[20].mxu0 %vm225_vm0, %v166_v49 }
  0x49   : > { %3791 = vmatprep.mubr.msk.f32.mxu0 %vm225_vm0, %v167_v50  ;;  %3845 = vmatprep.mubr.msk.f32.mxu1 %vm225_vm0, %v203_v51 }
  0x4c   : > { %3792 = vmatmul.mubr.msk.f32.gmra.mrb[22].mxu0 %vm225_vm0, %v168_v52  ;;  %3846 = vmatmul.mubr.msk.f32.gmra.mrb[22].mxu1 %vm225_vm0, %v204_v53 }
  0x4d   : > { %3848 = vmatprep.mubr.msk.f32.mxu1 %vm225_vm0, %v205_v54  ;;  %3794 = vmatprep.mubr.msk.f32.mxu0 %vm225_vm0, %v169_v55 }
  0x50   : > { %3849 = vmatmul.mubr.msk.f32.gmra.mrb[24].mxu1 %vm225_vm0, %v206_v56  ;;  %3795 = vmatmul.mubr.msk.f32.gmra.mrb[24].mxu0 %vm225_vm0, %v170_v57 }
  0x51   : > { %3797 = vmatprep.mubr.msk.f32.mxu0 %vm225_vm0, %v171_v58  ;;  %3851 = vmatprep.mubr.msk.f32.mxu1 %vm225_vm0, %v207_v59 }
  0x54   : > { %3798 = vmatmul.mubr.msk.f32.gmra.mrb[26].mxu0 %vm225_vm0, %v172_v60  ;;  %3852 = vmatmul.mubr.msk.f32.gmra.mrb[26].mxu1 %vm225_vm0, %v208_v61 }
  0x55   : > { %3800 = vmatprep.mubr.msk.f32.mxu0 %vm225_vm0, %v173_v62 }
  0x58   : > { %3801 = vmatmul.mubr.msk.f32.gmra.mrb[28].mxu0 %vm225_vm0, %v174_v63 }
  0x59   : > { %3803 = vmatprep.mubr.msk.f32.mxu0 %vm225_vm0, %v175_v0 }
  0x5c   : > { %3804 = vmatmul.mubr.msk.f32.gmra.mrb[30].mxu0 %vm225_vm0, %v176_v1 }
  0x5d   : > { %3806 = vmatprep.mubr.msk.f32.mxu0 %vm225_vm0, %v177_v2 }
  0x60   : > { %3807 = vmatmul.mubr.msk.f32.gmra.mrb[32].mxu0 %vm225_vm0, %v178_v3 }
  0x61   : > { %3809 = vmatprep.mubr.msk.f32.mxu0 %vm225_vm0, %v179_v4 }
  0x64   : > { %3810 = vmatmul.mubr.msk.f32.gmra.mrb[34].mxu0 %vm225_vm0, %v180_v5 }
  0xf3   : > { %v3760_v7 = vpop.f32.mrb[0].mxu0  ;;  %v3814_v8 = vpop.f32.mrb[0].mxu1 }
  0xf4   : > { %v490_v9 = vadd.f32 %v3760_v7, %v4668_v6  ;;  %v670_v10 = vadd.f32 %v3814_v8, %v4668_v6  ;;  %v664_v11 = vpop.f32.mrb[1].mxu1  ;;  %v484_v12 = vpop.f32.mrb[1].mxu0 }
  0xf5   : > { %v665_v13 = vadd.f32 %v4668_v6, %v664_v11  ;;  %v485_v14 = vadd.f32 %v4668_v6, %v484_v12 }
  0xf6   : > { %3938 = vtanh.f32 %v490_v9 }
  0xf7   : > { %3940 = vtanh.f32 %v670_v10  ;;  %v3763_v15 = vpop.f32.mrb[2].mxu0  ;;  %v3817_v16 = vpop.f32.mrb[2].mxu1 }
  0xf8   : > { %3942 = vtanh.f32 %v665_v13  ;;  %v500_v17 = vadd.f32 %v3763_v15, %v4668_v6  ;;  %v494_v18 = vpop.f32.mrb[3].mxu0  ;;  %v680_v19 = vadd.f32 %v3817_v16, %v4668_v6  ;;  %v674_v20 = vpop.f32.mrb[3].mxu1 }
  0xf9   : > { %3944 = vtanh.f32 %v485_v14  ;;  %v495_v21 = vadd.f32 %v4668_v6, %v494_v18  ;;  %v675_v26 = vadd.f32 %v4668_v6, %v674_v20 }
  0xfa   : > { %3946 = vtanh.f32 %v500_v17 }
  0xfb   : > { %v3820_v22 = vpop.f32.mrb[4].mxu1  ;;  %v3766_v23 = vpop.f32.mrb[4].mxu0  ;;  %3948 = vtanh.f32 %v680_v19 }
  0xfc   : > { %v684_v24 = vpop.f32.mrb[5].mxu1  ;;  %v504_v25 = vpop.f32.mrb[5].mxu0  ;;  %3950 = vtanh.f32 %v495_v21  ;;  %v510_v37 = vadd.f32 %v3766_v23, %v4668_v6  ;;  %v690_v52 = vadd.f32 %v3820_v22, %v4668_v6 }
  0xfd   : > { %v685_v27 = vadd.f32 %v4668_v6, %v684_v24  ;;  %v505_v5 = vadd.f32 %v4668_v6, %v504_v25 }
  0xff   : > { %3952 = vtanh.f32 %v685_v27  ;;  %v3769_v29 = vpop.f32.mrb[6].mxu0  ;;  %v3823_v30 = vpop.f32.mrb[6].mxu1 }
 0x100   : > { %v3939_v31 = vpop.eup %3938  ;;  %v520_v32 = vadd.f32 %v3769_v29, %v4668_v6  ;;  %v700_v33 = vadd.f32 %v3823_v30, %v4668_v6  ;;  %v514_v34 = vpop.f32.mrb[7].mxu0  ;;  %3954 = vtanh.f32 %v675_v26 }
 0x101   : > { %v4686_v35 = vpop.f32.mrb[7].mxu1  ;;  %v3941_v36 = vpop.eup %3940  ;;  %v872_v38 = vmul.f32 %v3939_v31, %v4682_v28  ;;  %v515_v15 = vadd.f32 %v4668_v6, %v514_v34 }
 0x102   : > { %v3943_v39 = vpop.eup %3942  ;;  %3956 = vtanh.f32 %v520_v32  ;;  %v908_v40 = vmul.f32 %v3941_v36, %v4682_v28  ;;  %v695_v26 = vadd.f32 %v4668_v6, %v4686_v35 }
 0x103   : > { %v3945_v41 = vpop.eup %3944  ;;  %v939_v42 = vsel %vm935_vm1, %v872_v38, 0.0  ;;  %3958 = vtanh.f32 %v700_v33  ;;  %v3772_v43 = vpop.f32.mrb[8].mxu0  ;;  %v907_v47 = vmul.f32 %v3943_v39, %v4682_v28 }
 0x104   : > { %v3826_v44 = vpop.f32.mrb[8].mxu1  ;;  %v3947_v45 = vpop.eup %3946  ;;  %v1047_v46 = vsel %vm935_vm1, %v908_v40, 0.0  ;;  %940 = vadd.xlane.f32.xlu0 %v939_v42  ;;  %v871_v48 = vmul.f32 %v3945_v41, %v4682_v28  ;;  %v530_v49 = vadd.f32 %v3772_v43, %v4668_v6  ;;  %3960 = vtanh.f32 %v510_v37 }
 0x105   : > { %v704_v50 = vpop.f32.mrb[9].mxu1  ;;  %v4696_v51 = vpop.f32.mrb[9].mxu0  ;;  %1048 = vadd.xlane.f32.xlu1 %v1047_v46  ;;  %v874_v55 = vmul.f32 %v3947_v45, %v4682_v28  ;;  %v1044_v60 = vsel %vm935_vm1, %v907_v47, 0.0  ;;  %v710_v61 = vadd.f32 %v3826_v44, %v4668_v6 }
 0x106   : > { %v3949_v53 = vpop.eup %3948  ;;  %v936_v54 = vsel %vm935_vm1, %v871_v48, 0.0  ;;  %3962 = vtanh.f32 %v530_v49  ;;  %v705_v11 = vadd.f32 %v4668_v6, %v704_v50  ;;  %v525_v39 = vadd.f32 %v4668_v6, %v4696_v51 }
 0x107   : > { %v910_v56 = vmul.f32 %v3949_v53, %v4682_v28  ;;  %v3775_v57 = vpop.f32.mrb[10].mxu0  ;;  %v3829_v58 = vpop.f32.mrb[10].mxu1  ;;  %3964 = vtanh.f32 %v690_v52  ;;  %v945_v2 = vsel %vm935_vm1, %v874_v55, 0.0 }
 0x108   : > { %v3951_v59 = vpop.eup %3950  ;;  %937 = vadd.xlane.f32.xlu0 %v936_v54  ;;  %v4704_v62 = vpop.f32.mrb[11].mxu0  ;;  %3966 = vtanh.f32 %v710_v61  ;;  %v540_v23 = vadd.f32 %v3775_v57, %v4668_v6  ;;  %v720_v37 = vadd.f32 %v3829_v58, %v4668_v6 }
 0x109   : > { %v4706_v63 = vpop.f32.mrb[11].mxu1  ;;  %v3953_v0 = vpop.eup %3952  ;;  %1045 = vadd.xlane.f32.xlu1 %v1044_v60  ;;  %v1053_v1 = vsel %vm935_vm1, %v910_v56, 0.0  ;;  %v873_v10 = vmul.f32 %v3951_v59, %v4682_v28  ;;  %3968 = vtanh.f32 %v505_v5  ;;  %v535_v47 = vadd.f32 %v4668_v6, %v4704_v62 }
 0x10a   : > { %v911_v3 = vmul.f32 %v3953_v0, %v4682_v28  ;;  %v3955_v4 = vpop.eup %3954  ;;  %3970 = vtanh.f32 %v705_v11  ;;  %v715_v52 = vadd.f32 %v4668_v6, %v4706_v63 }
 0x10b   : > { %v4712_v7 = vpop.f32.mrb[12].mxu1  ;;  %v4714_v8 = vpop.f32.mrb[12].mxu0  ;;  %v909_v18 = vmul.f32 %v3955_v4, %v4682_v28  ;;  %v942_v22 = vsel %vm935_vm1, %v873_v10, 0.0  ;;  %3972 = vtanh.f32 %v515_v15 }
 0x10c   : > { %v3957_v9 = vpop.eup %3956  ;;  %1054 = vadd.xlane.f32.xlu0 %v1053_v1  ;;  %v4718_v12 = vpop.f32.mrb[13].mxu1  ;;  %v1056_v16 = vsel %vm935_vm1, %v911_v3, 0.0  ;;  %3974 = vtanh.f32 %v540_v23  ;;  %v550_v60 = vadd.f32 %v4714_v8, %v4668_v6  ;;  %v730_v10 = vadd.f32 %v4712_v7, %v4668_v6 }
 0x10d   : > { %v4720_v13 = vpop.f32.mrb[13].mxu0  ;;  %v3959_v14 = vpop.eup %3958  ;;  %946 = vadd.xlane.f32.xlu1 %v945_v2  ;;  %v878_v17 = vmul.f32 %v3957_v9, %v4682_v28  ;;  %v1050_v31 = vsel %vm935_vm1, %v909_v18, 0.0  ;;  %3976 = vtanh.f32 %v695_v26  ;;  %v725_v0 = vadd.f32 %v4668_v6, %v4718_v12 }
 0x10e   : > { %v3961_v19 = vpop.eup %3960  ;;  %v914_v29 = vmul.f32 %v3959_v14, %v4682_v28  ;;  %3978 = vtanh.f32 %v720_v37  ;;  %v545_v26 = vadd.f32 %v4668_v6, %v4720_v13 }
 0x10f   : > { %v4726_v20 = vpop.f32.mrb[14].mxu0  ;;  %v4728_v21 = vpop.f32.mrb[14].mxu1  ;;  %v957_v27 = vsel %vm935_vm1, %v878_v17, 0.0  ;;  %v876_v32 = vmul.f32 %v3961_v19, %v4682_v28  ;;  %3980 = vtanh.f32 %v525_v39 }
 0x110   : > { %1057 = vadd.xlane.f32.xlu0 %v1056_v16  ;;  %v4732_v24 = vpop.f32.mrb[15].mxu0  ;;  %v4734_v25 = vpop.f32.mrb[15].mxu1  ;;  %v1065_v40 = vsel %vm935_vm1, %v914_v29, 0.0  ;;  %3982 = vtanh.f32 %v535_v47 }
 0x111   : > { %943 = vadd.xlane.f32.xlu1 %v942_v22  ;;  %v3963_v30 = vpop.eup %3962  ;;  %v951_v43 = vsel %vm935_vm1, %v876_v32, 0.0  ;;  %3984 = vtanh.f32 %v715_v52  ;;  %v555_v15 = vadd.f32 %v4668_v6, %v4732_v24 }
 0x112   : > { %v3965_v33 = vpop.eup %3964  ;;  %v880_v41 = vmul.f32 %v3963_v30, %v4682_v28  ;;  %3986 = vtanh.f32 %v550_v60  ;;  %v735_v30 = vadd.f32 %v4668_v6, %v4734_v25 }
 0x113   : > { %v4742_v34 = vpop.f32.mrb[16].mxu1  ;;  %v4744_v36 = vpop.f32.mrb[16].mxu0  ;;  %v912_v44 = vmul.f32 %v3965_v33, %v4682_v28  ;;  %3988 = vtanh.f32 %v725_v0 }
 0x114   : > { %958 = vadd.xlane.f32.xlu0 %v957_v27  ;;  %v4747_v35 = vpop.f32.mrb[17].mxu0  ;;  %v4749_v38 = vpop.f32.mrb[17].mxu1  ;;  %v963_v51 = vsel %vm935_vm1, %v880_v41, 0.0  ;;  %3990 = vtanh.f32 %v730_v10  ;;  %v560_v41 = vadd.f32 %v4726_v20, %v4668_v6 }
 0x115   : > { %1051 = vadd.xlane.f32.xlu1 %v1050_v31  ;;  %v3967_v42 = vpop.eup %3966  ;;  %v1059_v55 = vsel %vm935_vm1, %v912_v44, 0.0  ;;  %3992 = vtanh.f32 %v555_v15  ;;  %v750_v44 = vadd.f32 %v4742_v34, %v4668_v6 }
 0x116   : > { %v3969_v50 = vpop.eup %3968  ;;  %v916_v53 = vmul.f32 %v3967_v42, %v4682_v28  ;;  %3994 = vtanh.f32 %v545_v26 }
 0x117   : > { %v4757_v45 = vpop.f32.mrb[18].mxu0  ;;  %v4759_v46 = vpop.f32.mrb[18].mxu1  ;;  %v875_v59 = vmul.f32 %v3969_v50, %v4682_v28  ;;  %3996 = vtanh.f32 %v735_v30 }
 0x118   : > { %1066 = vadd.xlane.f32.xlu0 %v1065_v40  ;;  %v4763_v48 = vpop.f32.mrb[19].mxu1  ;;  %v4765_v49 = vpop.f32.mrb[19].mxu0  ;;  %v1071_v63 = vsel %vm935_vm1, %v916_v53, 0.0  ;;  %3998 = vtanh.f32 %v560_v41 }
 0x119   : > { %952 = vadd.xlane.f32.xlu1 %v951_v43  ;;  %v3971_v54 = vpop.eup %3970  ;;  %v948_v9 = vsel %vm935_vm1, %v875_v59, 0.0  ;;  %4000 = vtanh.f32 %v750_v44 }
 0x11a   : > { %v3973_v56 = vpop.eup %3972  ;;  %v915_v1 = vmul.f32 %v3971_v54, %v4682_v28  ;;  %v740_v54 = vadd.f32 %v4728_v21, %v4668_v6  ;;  %v570_v21 = vadd.f32 %v4744_v36, %v4668_v6  ;;  %v580_v36 = vadd.f32 %v4757_v45, %v4668_v6 }
 0x11b   : > { %v4772_v57 = vpop.f32.mrb[20].mxu1  ;;  %v4774_v58 = vpop.f32.mrb[20].mxu0  ;;  %v877_v3 = vmul.f32 %v3973_v56, %v4682_v28  ;;  %v565_v56 = vadd.f32 %v4668_v6, %v4747_v35 }
 0x11c   : > { %964 = vadd.xlane.f32.xlu0 %v963_v51  ;;  %v4779_v61 = vpop.f32.mrb[21].mxu1  ;;  %v4781_v62 = vpop.f32.mrb[21].mxu0  ;;  %v1068_v14 = vsel %vm935_vm1, %v915_v1, 0.0  ;;  %4002 = vtanh.f32 %v740_v54 }
 0x11d   : > { %1060 = vadd.xlane.f32.xlu1 %v1059_v55  ;;  %v3975_v2 = vpop.eup %3974  ;;  %v954_v18 = vsel %vm935_vm1, %v877_v3, 0.0  ;;  %4004 = vtanh.f32 %v565_v56  ;;  %v765_v45 = vadd.f32 %v4668_v6, %v4779_v61 }
 0x11e   : > { %v3977_v4 = vpop.eup %3976  ;;  %v882_v16 = vmul.f32 %v3975_v2, %v4682_v28  ;;  %4006 = vtanh.f32 %v570_v21  ;;  %v770_v21 = vadd.f32 %v4772_v57, %v4668_v6  ;;  %v585_v57 = vadd.f32 %v4668_v6, %v4781_v62 }
 0x11f   : > { %v4788_v5 = vpop.f32.mrb[22].mxu0  ;;  %v4790_v8 = vpop.f32.mrb[22].mxu1  ;;  %v913_v19 = vmul.f32 %v3977_v4, %v4682_v28  ;;  %v745_v4 = vadd.f32 %v4668_v6, %v4749_v38 }
 0x120   : > { %1072 = vadd.xlane.f32.xlu0 %v1071_v63  ;;  %v4795_v11 = vpop.f32.mrb[23].mxu1  ;;  %v4797_v12 = vpop.f32.mrb[23].mxu0  ;;  %v969_v29 = vsel %vm935_vm1, %v882_v16, 0.0  ;;  %v600_v61 = vadd.f32 %v4788_v5, %v4668_v6  ;;  %v780_v5 = vadd.f32 %v4790_v8, %v4668_v6 }
 0x121   : > { %949 = vadd.xlane.f32.xlu1 %v948_v9  ;;  %v3979_v17 = vpop.eup %3978  ;;  %v1062_v33 = vsel %vm935_vm1, %v913_v19, 0.0  ;;  %4008 = vtanh.f32 %v745_v4  ;;  %v760_v19 = vadd.f32 %v4759_v46, %v4668_v6  ;;  %v595_v62 = vadd.f32 %v4668_v6, %v4797_v12 }
 0x122   : > { %v3981_v7 = vpop.eup %3980  ;;  %v918_v31 = vmul.f32 %v3979_v17, %v4682_v28  ;;  %4010 = vtanh.f32 %v580_v36 }
 0x123   : > { %v4805_v22 = vpop.f32.mrb[24].mxu1  ;;  %v4807_v23 = vpop.f32.mrb[24].mxu0  ;;  %v879_v37 = vmul.f32 %v3981_v7, %v4682_v28  ;;  %4012 = vtanh.f32 %v760_v19 }
 0x124   : > { %1069 = vadd.xlane.f32.xlu0 %v1068_v14  ;;  %v4811_v27 = vpop.f32.mrb[25].mxu0  ;;  %v4813_v24 = vpop.f32.mrb[25].mxu1  ;;  %v1077_v43 = vsel %vm935_vm1, %v918_v31, 0.0  ;;  %v790_v8 = vadd.f32 %v4805_v22, %v4668_v6 }
 0x125   : > { %955 = vadd.xlane.f32.xlu1 %v954_v18  ;;  %v3983_v32 = vpop.eup %3982  ;;  %v960_v51 = vsel %vm935_vm1, %v879_v37, 0.0  ;;  %v575_v37 = vadd.f32 %v4668_v6, %v4765_v49  ;;  %4014 = vtanh.f32 %v765_v45  ;;  %v605_v22 = vadd.f32 %v4668_v6, %v4811_v27 }
 0x126   : > { %v3985_v39 = vpop.eup %3984  ;;  %v881_v47 = vmul.f32 %v3983_v32, %v4682_v28  ;;  %v785_v27 = vadd.f32 %v4668_v6, %v4813_v24 }
 0x127   : > { %v4821_v13 = vpop.f32.mrb[26].mxu0  ;;  %v4823_v40 = vpop.f32.mrb[26].mxu1  ;;  %v917_v52 = vmul.f32 %v3985_v39, %v4682_v28  ;;  %4016 = vtanh.f32 %v575_v37  ;;  %v775_v37 = vadd.f32 %v4668_v6, %v4795_v11  ;;  %v610_v11 = vadd.f32 %v4807_v23, %v4668_v6 }
 0x128   : > { %970 = vadd.xlane.f32.xlu0 %v969_v29  ;;  %v4827_v42 = vpop.f32.mrb[27].mxu1  ;;  %v4829_v25 = vpop.f32.mrb[27].mxu0  ;;  %v966_v34 = vsel %vm935_vm1, %v881_v47, 0.0  ;;  %v620_v24 = vadd.f32 %v4821_v13, %v4668_v6  ;;  %v800_v23 = vadd.f32 %v4823_v40, %v4668_v6 }
 0x129   : > { %1063 = vadd.xlane.f32.xlu1 %v1062_v33  ;;  %v3987_v50 = vpop.eup %3986  ;;  %v1074_v63 = vsel %vm935_vm1, %v917_v52, 0.0  ;;  %4018 = vtanh.f32 %v600_v61  ;;  %v795_v13 = vadd.f32 %v4668_v6, %v4827_v42  ;;  %v615_v40 = vadd.f32 %v4668_v6, %v4829_v25 }
 0x12a   : > { %v3989_v20 = vpop.eup %3988  ;;  %v884_v59 = vmul.f32 %v3987_v50, %v4682_v28  ;;  %v755_v50 = vadd.f32 %v4668_v6, %v4763_v48  ;;  %v590_v48 = vadd.f32 %v4774_v58, %v4668_v6 }
 0x12b   : > { %v4837_v53 = vpop.f32.mrb[28].mxu0  ;;  %v3991_v60 = vpop.eup %3990  ;;  %v919_v0 = vmul.f32 %v3989_v20, %v4682_v28 }
 0x12c   : > { %1078 = vadd.xlane.f32.xlu0 %v1077_v43  ;;  %v4841_v55 = vpop.f32.mrb[29].mxu0  ;;  %v3993_v1 = vpop.eup %3992  ;;  %v975_v35 = vsel %vm935_vm1, %v884_v59, 0.0  ;;  %v920_v9 = vmul.f32 %v3991_v60, %v4682_v28  ;;  %4020 = vtanh.f32 %v755_v50  ;;  %v630_v42 = vadd.f32 %v4837_v53, %v4668_v6 }
 0x12d   : > { %961 = vadd.xlane.f32.xlu1 %v960_v51  ;;  %v3995_v10 = vpop.eup %3994  ;;  %v1080_v14 = vsel %vm935_vm1, %v919_v0, 0.0  ;;  %v885_v15 = vmul.f32 %v3993_v1, %v4682_v28  ;;  %4022 = vtanh.f32 %v780_v5  ;;  %v625_v53 = vadd.f32 %v4668_v6, %v4841_v55 }
 0x12e   : > { %v3997_v16 = vpop.eup %3996  ;;  %v1083_v38 = vsel %vm935_vm1, %v920_v9, 0.0  ;;  %v883_v7 = vmul.f32 %v3995_v10, %v4682_v28  ;;  %4024 = vtanh.f32 %v590_v48 }
 0x12f   : > { %v4849_v2 = vpop.f32.mrb[30].mxu0  ;;  %v3999_v26 = vpop.eup %3998  ;;  %v978_v29 = vsel %vm935_vm1, %v885_v15, 0.0  ;;  %v921_v30 = vmul.f32 %v3997_v16, %v4682_v28  ;;  %4026 = vtanh.f32 %v790_v8 }
 0x130   : > { %967 = vadd.xlane.f32.xlu0 %v966_v34  ;;  %v4853_v3 = vpop.f32.mrb[31].mxu0  ;;  %v4001_v31 = vpop.eup %4000  ;;  %v972_v46 = vsel %vm935_vm1, %v883_v7, 0.0  ;;  %v886_v39 = vmul.f32 %v3999_v26, %v4682_v28  ;;  %4028 = vtanh.f32 %v770_v21  ;;  %v640_v55 = vadd.f32 %v4849_v2, %v4668_v6 }
 0x131   : > { %1075 = vadd.xlane.f32.xlu1 %v1074_v63  ;;  %v4003_v41 = vpop.eup %4002  ;;  %v1086_v43 = vsel %vm935_vm1, %v921_v30, 0.0  ;;  %v924_v44 = vmul.f32 %v4001_v31, %v4682_v28  ;;  %4030 = vtanh.f32 %v605_v22  ;;  %v635_v25 = vadd.f32 %v4668_v6, %v4853_v3 }
 0x132   : > { %v4005_v47 = vpop.eup %4004  ;;  %v981_v49 = vsel %vm935_vm1, %v886_v39, 0.0  ;;  %v922_v51 = vmul.f32 %v4003_v41, %v4682_v28  ;;  %4032 = vtanh.f32 %v585_v57 }
 0x133   : > { %v4861_v17 = vpop.f32.mrb[32].mxu0  ;;  %v4007_v52 = vpop.eup %4006  ;;  %v1095_v20 = vsel %vm935_vm1, %v924_v44, 0.0  ;;  %v887_v54 = vmul.f32 %v4005_v47, %v4682_v28  ;;  %4034 = vtanh.f32 %v785_v27 }
 0x134   : > { %976 = vadd.xlane.f32.xlu0 %v975_v35  ;;  %v4865_v18 = vpop.f32.mrb[33].mxu0  ;;  %v4009_v34 = vpop.eup %4008  ;;  %v1089_v56 = vsel %vm935_vm1, %v922_v51, 0.0  ;;  %v888_v59 = vmul.f32 %v4007_v52, %v4682_v28  ;;  %4036 = vtanh.f32 %v595_v62  ;;  %v650_v2 = vadd.f32 %v4861_v17, %v4668_v6 }
 0x135   : > { %1081 = vadd.xlane.f32.xlu1 %v1080_v14  ;;  %v4011_v60 = vpop.eup %4010  ;;  %v984_v63 = vsel %vm935_vm1, %v887_v54, 0.0  ;;  %v923_v0 = vmul.f32 %v4009_v34, %v4682_v28  ;;  %4038 = vtanh.f32 %v620_v24  ;;  %v645_v3 = vadd.f32 %v4668_v6, %v4865_v18 }
 0x136   : > { %v4013_v1 = vpop.eup %4012  ;;  %v987_v58 = vsel %vm935_vm1, %v888_v59, 0.0  ;;  %v890_v35 = vmul.f32 %v4011_v60, %v4682_v28  ;;  %4040 = vtanh.f32 %v775_v37 }
 0x137   : > { %v4873_v32 = vpop.f32.mrb[34].mxu0  ;;  %v4015_v4 = vpop.eup %4014  ;;  %v1092_v9 = vsel %vm935_vm1, %v923_v0, 0.0  ;;  %v926_v10 = vmul.f32 %v4013_v1, %v4682_v28  ;;  %4042 = vtanh.f32 %v795_v13 }
 0x138   : > { %1084 = vadd.xlane.f32.xlu0 %v1083_v38  ;;  %v4877_v33 = vpop.f32.mrb[35].mxu0  ;;  %v4017_v14 = vpop.eup %4016  ;;  %v993_v15 = vsel %vm935_vm1, %v890_v35, 0.0  ;;  %v927_v16 = vmul.f32 %v4015_v4, %v4682_v28  ;;  %4044 = vtanh.f32 %v610_v11  ;;  %v660_v17 = vadd.f32 %v4873_v32, %v4668_v6 }
 0x139   : > { %979 = vadd.xlane.f32.xlu1 %v978_v29  ;;  %v4019_v36 = vpop.eup %4018  ;;  %v1101_v38 = vsel %vm935_vm1, %v926_v10, 0.0  ;;  %v889_v19 = vmul.f32 %v4017_v14, %v4682_v28  ;;  %4046 = vtanh.f32 %v630_v42  ;;  %v655_v18 = vadd.f32 %v4668_v6, %v4877_v33 }
 0x13a   : > { %v4021_v7 = vpop.eup %4020  ;;  %v1104_v26 = vsel %vm935_vm1, %v927_v16, 0.0  ;;  %v894_v29 = vmul.f32 %v4019_v36, %v4682_v28  ;;  %4048 = vtanh.f32 %v800_v23 }
 0x13b   : > { %v4023_v30 = vpop.eup %4022  ;;  %v990_v31 = vsel %vm935_vm1, %v889_v19, 0.0  ;;  %v925_v45 = vmul.f32 %v4021_v7, %v4682_v28  ;;  %4050 = vtanh.f32 %v625_v53 }
 0x13c   : > { %973 = vadd.xlane.f32.xlu0 %v972_v46  ;;  %v4025_v46 = vpop.eup %4024  ;;  %v1005_v12 = vsel %vm935_vm1, %v894_v29, 0.0  ;;  %v930_v39 = vmul.f32 %v4023_v30, %v4682_v28  ;;  %4052 = vtanh.f32 %v615_v40 }
 0x13d   : > { %1087 = vadd.xlane.f32.xlu1 %v1086_v43  ;;  %v4027_v41 = vpop.eup %4026  ;;  %v1098_v43 = vsel %vm935_vm1, %v925_v45, 0.0  ;;  %v892_v44 = vmul.f32 %v4025_v46, %v4682_v28  ;;  %4054 = vtanh.f32 %v640_v55 }
 0x13e   : > { %v4029_v47 = vpop.eup %4028  ;;  %v1113_v61 = vsel %vm935_vm1, %v930_v39, 0.0  ;;  %v932_v50 = vmul.f32 %v4027_v41, %v4682_v28  ;;  %4056 = vtanh.f32 %v635_v25 }
 0x13f   : > { %v999_v51 = vsel %vm935_vm1, %v892_v44, 0.0  ;;  %v928_v52 = vmul.f32 %v4029_v47, %v4682_v28  ;;  %4058 = vtanh.f32 %v650_v2 }
 0x140   : > { %982 = vadd.xlane.f32.xlu0 %v981_v49  ;;  %v4031_v49 = vpop.eup %4030  ;;  %v1119_v54 = vsel %vm935_vm1, %v932_v50, 0.0  ;;  %4060 = vtanh.f32 %v645_v3 }
 0x141   : > { %1096 = vadd.xlane.f32.xlu1 %v1095_v20  ;;  %v4033_v20 = vpop.eup %4032  ;;  %v895_v34 = vmul.f32 %v4031_v49, %v4682_v28  ;;  %v1107_v48 = vsel %vm935_vm1, %v928_v52, 0.0  ;;  %4062 = vtanh.f32 %v660_v17 }
 0x142   : > { %v4035_v5 = vpop.eup %4034  ;;  %4064 = vtanh.f32 %v655_v18 }
 0x143   : > { %v4037_v59 = vpop.eup %4036  ;;  %v1008_v60 = vsel %vm935_vm1, %v895_v34, 0.0 }
 0x144   : > { %1090 = vadd.xlane.f32.xlu0 %v1089_v56  ;;  %v891_v56 = vmul.f32 %v4033_v20, %v4682_v28  ;;  %v4039_v0 = vpop.eup %4038  ;;  %v893_v8 = vmul.f32 %v4037_v59, %v4682_v28 }
 0x145   : > { %985 = vadd.xlane.f32.xlu1 %v984_v63  ;;  %v931_v63 = vmul.f32 %v4035_v5, %v4682_v28  ;;  %v4041_v21 = vpop.eup %4040  ;;  %v898_v35 = vmul.f32 %v4039_v0, %v4682_v28 }
 0x146   : > { %v996_v1 = vsel %vm935_vm1, %v891_v56, 0.0  ;;  %v4043_v4 = vpop.eup %4042  ;;  %v929_v10 = vmul.f32 %v4041_v21, %v4682_v28 }
 0x147   : > { %v4045_v14 = vpop.eup %4044  ;;  %v1017_v22 = vsel %vm935_vm1, %v898_v35, 0.0  ;;  %v933_v57 = vmul.f32 %v4043_v4, %v4682_v28 }
 0x148   : > { %988 = vadd.xlane.f32.xlu0 %v987_v58  ;;  %v1116_v58 = vsel %vm935_vm1, %v931_v63, 0.0  ;;  %v1110_v16 = vsel %vm935_vm1, %v929_v10, 0.0  ;;  %v896_v36 = vmul.f32 %v4045_v14, %v4682_v28 }
 0x149   : > { %1093 = vadd.xlane.f32.xlu1 %v1092_v9  ;;  %v1002_v9 = vsel %vm935_vm1, %v893_v8, 0.0  ;;  %v1122_v19 = vsel %vm935_vm1, %v933_v57, 0.0 }
 0x14a   : > { %v1011_v62 = vsel %vm935_vm1, %v896_v36, 0.0 }
 0x14c   : > { %994 = vadd.xlane.f32.xlu0 %v993_v15  ;;  %v4047_v15 = vpop.eup %4046 }
 0x14d   : > { %1102 = vadd.xlane.f32.xlu1 %v1101_v38  ;;  %v4049_v38 = vpop.eup %4048  ;;  %v900_v7 = vmul.f32 %v4047_v15, %v4682_v28 }
 0x14e   : > { %v4051_v27 = vpop.eup %4050 }
 0x14f   : > { %v4053_v29 = vpop.eup %4052  ;;  %v1023_v32 = vsel %vm935_vm1, %v900_v7, 0.0  ;;  %v899_v30 = vmul.f32 %v4051_v27, %v4682_v28 }
 0x150   : > { %1105 = vadd.xlane.f32.xlu0 %v1104_v26  ;;  %v934_v26 = vmul.f32 %v4049_v38, %v4682_v28  ;;  %v897_v6 = vmul.f32 %v4053_v29, %v4682_v28 }
 0x151   : > { %991 = vadd.xlane.f32.xlu1 %v990_v31  ;;  %v4055_v31 = vpop.eup %4054  ;;  %v1020_v46 = vsel %vm935_vm1, %v899_v30, 0.0 }
 0x152   : > { %v1125_v45 = vsel %vm935_vm1, %v934_v26, 0.0  ;;  %v4057_v33 = vpop.eup %4056  ;;  %v902_v24 = vmul.f32 %v4055_v31, %v4682_v28 }
 0x153   : > { %v4059_v37 = vpop.eup %4058  ;;  %v901_v39 = vmul.f32 %v4057_v33, %v4682_v28 }
 0x154   : > { %1006 = vadd.xlane.f32.xlu0 %v1005_v12  ;;  %v1014_v12 = vsel %vm935_vm1, %v897_v6, 0.0  ;;  %v4061_v41 = vpop.eup %4060  ;;  %v1029_v44 = vsel %vm935_vm1, %v902_v24, 0.0  ;;  %v904_v47 = vmul.f32 %v4059_v37, %v4682_v28 }
 0x155   : > { %1099 = vadd.xlane.f32.xlu1 %v1098_v43  ;;  %v4452_v43 = vmov 0   ;;  %v4063_v13 = vpop.eup %4062  ;;  %v1026_v11 = vsel %vm935_vm1, %v901_v39, 0.0 }
 0x156   : > { %3937 = vset.pattern.permute.xlu0 %v4452_v43  ;;  %3936 = vset.pattern.permute.xlu1 %v4452_v43  ;;  %v4065_v50 = vpop.eup %4064  ;;  %v1035_v49 = vsel %vm935_vm1, %v904_v47, 0.0 }
 0x157   : > { %v905_v20 = vmul.f32 %v4065_v50, %v4682_v28 }
 0x158   : > { %1114 = vadd.xlane.f32.xlu0 %v1113_v61  ;;  %v903_v61 = vmul.f32 %v4061_v41, %v4682_v28 }
 0x159   : > { %1000 = vadd.xlane.f32.xlu1 %v999_v51  ;;  %v906_v51 = vmul.f32 %v4063_v13, %v4682_v28  ;;  %v1038_v23 = vsel %vm935_vm1, %v905_v20, 0.0 }
 0x15a   : > { %v1032_v52 = vsel %vm935_vm1, %v903_v61, 0.0 }
 0x15b   : > { %v1041_v42 = vsel %vm935_vm1, %v906_v51, 0.0 }
 0x15c   : > { %1120 = vadd.xlane.f32.xlu0 %v1119_v54  ;;  %v5002_v54 = vld [vmem:[%s6487_s1 + $0x50] ss:$0 sm:$0xff] }
 0x15d   : > { %1108 = vadd.xlane.f32.xlu1 %v1107_v48 }
 0x160   : > { %1009 = vadd.xlane.f32.xlu0 %v1008_v60 }
 0x161   : > { %997 = vadd.xlane.f32.xlu1 %v996_v1 }
 0x164   : > { %1117 = vadd.xlane.f32.xlu0 %v1116_v58 }
 0x165   : > { %1003 = vadd.xlane.f32.xlu1 %v1002_v9 }
 0x168   : > { %1018 = vadd.xlane.f32.xlu0 %v1017_v22 }
 0x169   : > { %1111 = vadd.xlane.f32.xlu1 %v1110_v16 }
 0x16c   : > { %1123 = vadd.xlane.f32.xlu0 %v1122_v19 }
 0x16d   : > { %1012 = vadd.xlane.f32.xlu1 %v1011_v62 }
 0x170   : > { %1024 = vadd.xlane.f32.xlu0 %v1023_v32 }
 0x171   : > { %1126 = vadd.xlane.f32.xlu1 %v1125_v45 }
 0x174   : > { %1021 = vadd.xlane.f32.xlu0 %v1020_v46 }
 0x175   : > { %1015 = vadd.xlane.f32.xlu1 %v1014_v12 }
 0x178   : > { %1030 = vadd.xlane.f32.xlu0 %v1029_v44 }
 0x179   : > { %1027 = vadd.xlane.f32.xlu1 %v1026_v11 }
 0x17c   : > { %1036 = vadd.xlane.f32.xlu0 %v1035_v49 }
 0x17d   : > { %1033 = vadd.xlane.f32.xlu1 %v1032_v52 }
 0x180   : > { %1042 = vadd.xlane.f32.xlu0 %v1041_v42 }
 0x181   : > { %1039 = vadd.xlane.f32.xlu1 %v1038_v23 }
 0x191   : > { %v941_v34 = vpop.xlane.xlu0 %940 }
 0x192   : > { %v1049_v5 = vpop.xlane.xlu1 %1048  ;;  %v5005_v48 = vadd.f32 %v5002_v54, %v941_v34 }
 0x193   : > { %v5008_v28 = vadd.f32 %v5002_v54, %v1049_v5 }
 0x194   : > { %v1204_v56 = vsel %vm1196_vm2, %v5005_v48, -inf }
 0x195   : > { %v1456_v59 = vsel %vm1196_vm2, %v5008_v28, -inf  ;;  %v1205_v53 = vrot.slane %v1204_v56, 4  ;;  %v938_v40 = vpop.xlane.xlu0 %937 }
 0x196   : > { %v1457_v60 = vrot.slane %v1456_v59, 4  ;;  %v1046_v63 = vpop.xlane.xlu1 %1045  ;;  %v5015_v0 = vadd.f32 %v5002_v54, %v938_v40 }
 0x197   : > { %v1206_v1 = vmax.f32 %v1204_v56, %v1205_v53  ;;  %v5018_v8 = vadd.f32 %v5002_v54, %v1046_v63 }
 0x198   : > { %v1458_v21 = vmax.f32 %v1456_v59, %v1457_v60  ;;  %v1197_v55 = vsel %vm1196_vm2, %v5015_v0, -inf }
 0x199   : > { %v1207_v58 = vrot.slane %v1206_v1, 2  ;;  %v1449_v25 = vsel %vm1196_vm2, %v5018_v8, -inf  ;;  %v1198_v35 = vrot.slane %v1197_v55, 4  ;;  %v1055_v4 = vpop.xlane.xlu0 %1054 }
 0x19a   : > { %v1459_v9 = vrot.slane %v1458_v21, 2  ;;  %v1450_v10 = vrot.slane %v1449_v25, 4  ;;  %v947_v14 = vpop.xlane.xlu1 %946  ;;  %v5025_v2 = vadd.f32 %v5002_v54, %v1055_v4 }
 0x19b   : > { %v1208_v22 = vmax.f32 %v1206_v1, %v1207_v58  ;;  %v5028_v3 = vadd.f32 %v5002_v54, %v947_v14  ;;  %v1199_v57 = vmax.f32 %v1197_v55, %v1198_v35 }
 0x19c   : > { %v1470_v15 = vsel %vm1196_vm2, %v5025_v2, -inf  ;;  %v1460_v16 = vmax.f32 %v1458_v21, %v1459_v9  ;;  %v1451_v36 = vmax.f32 %v1449_v25, %v1450_v10 }
 0x19d   : > { %v1218_v38 = vsel %vm1196_vm2, %v5028_v3, -inf  ;;  %v1471_v17 = vrot.slane %v1470_v15, 4  ;;  %v1058_v19 = vpop.xlane.xlu0 %1057  ;;  %v1209_v62 = vrot.slane %v1208_v22, 1  ;;  %v1200_v32 = vrot.slane %v1199_v57, 2 }
 0x19e   : > { %v1219_v18 = vrot.slane %v1218_v38, 4  ;;  %v944_v7 = vpop.xlane.xlu1 %943  ;;  %v5035_v27 = vadd.f32 %v5002_v54, %v1058_v19  ;;  %v1461_v31 = vrot.slane %v1460_v16, 1  ;;  %v1452_v45 = vrot.slane %v1451_v36, 2 }
 0x19f   : > { %v1472_v26 = vmax.f32 %v1470_v15, %v1471_v17  ;;  %v5038_v29 = vadd.f32 %v5002_v54, %v944_v7  ;;  %v1210_v37 = vmax.f32 %v1208_v22, %v1209_v62  ;;  %v1201_v39 = vmax.f32 %v1199_v57, %v1200_v32 }
 0x1a0   : > { %v1477_v30 = vsel %vm1196_vm2, %v5035_v27, -inf  ;;  %v1220_v6 = vmax.f32 %v1218_v38, %v1219_v18  ;;  %v1462_v43 = vmax.f32 %v1460_v16, %v1461_v31  ;;  %v1453_v44 = vmax.f32 %v1451_v36, %v1452_v45 }
 0x1a1   : > { %v1211_v33 = vsel %vm1196_vm2, %v5038_v29, -inf  ;;  %v1473_v46 = vrot.slane %v1472_v26, 2  ;;  %v1478_v12 = vrot.slane %v1477_v30, 4  ;;  %v959_v13 = vpop.xlane.xlu0 %958  ;;  %v1646_v50 = vsub.f32 %v5005_v48, %v1210_v37 }
 0x1a2   : > { %v1212_v24 = vrot.slane %v1211_v33, 4  ;;  %v1052_v41 = vpop.xlane.xlu1 %1051  ;;  %v1221_v47 = vrot.slane %v1220_v6, 2  ;;  %v1202_v52 = vrot.slane %v1201_v39, 1  ;;  %v5049_v20 = vadd.f32 %v5002_v54, %v959_v13 }
 0x1a3   : > { %v1474_v11 = vmax.f32 %v1472_v26, %v1473_v46  ;;  %v1479_v49 = vmax.f32 %v1477_v30, %v1478_v12  ;;  %v5046_v51 = vadd.f32 %v5002_v54, %v1052_v41  ;;  %v1682_v42 = vsub.f32 %v5008_v28, %v1462_v43 }
 0x1a4   : > { %v1213_v61 = vmax.f32 %v1211_v33, %v1212_v24  ;;  %v1454_v23 = vrot.slane %v1453_v44, 1  ;;  %v1222_v34 = vmax.f32 %v1220_v6, %v1221_v47  ;;  %v1711_v59 = vmul.f32 1.442695, %v1646_v50 }
 0x1a5   : > { %v1475_v5 = vrot.slane %v1474_v11, 1  ;;  %v1480_v53 = vrot.slane %v1479_v49, 2  ;;  %v1463_v40 = vsel %vm1196_vm2, %v5046_v51, -inf  ;;  %v1203_v60 = vmax.f32 %v1201_v39, %v1202_v52  ;;  %v1067_v35 = vpop.xlane.xlu0 %1066 }
 0x1a6   : > { %v1214_v56 = vrot.slane %v1213_v61, 2  ;;  %v953_v48 = vpop.xlane.xlu1 %952  ;;  %v1246_v63 = vsel %vm1196_vm2, %v5049_v20, -inf  ;;  %v1783_v1 = vmul.f32 1.442695, %v1682_v42  ;;  %v1455_v21 = vmax.f32 %v1453_v44, %v1454_v23 }
 0x1a7   : > { %v1223_v55 = vrot.slane %v1222_v34, 1  ;;  %v1476_v58 = vmax.f32 %v1474_v11, %v1475_v5  ;;  %v1464_v28 = vrot.slane %v1463_v40, 4  ;;  %4066 = vpow2.f32 %v1711_v59 }
 0x1a8   : > { %v1215_v25 = vmax.f32 %v1213_v61, %v1214_v56  ;;  %v1481_v4 = vmax.f32 %v1479_v49, %v1480_v53  ;;  %v1247_v9 = vrot.slane %v1246_v63, 4  ;;  %v1645_v10 = vsub.f32 %v5015_v0, %v1203_v60 }
 0x1a9   : > { %v5058_v14 = vadd.f32 %v5002_v54, %v953_v48  ;;  %4068 = vpow2.f32 %v1783_v1  ;;  %v1681_v22 = vsub.f32 %v5018_v8, %v1455_v21  ;;  %v1224_v57 = vmax.f32 %v1222_v34, %v1223_v55  ;;  %v965_v37 = vpop.xlane.xlu0 %964 }
 0x1aa   : > { %v5062_v15 = vadd.f32 %v5002_v54, %v1067_v35  ;;  %v1061_v16 = vpop.xlane.xlu1 %1060  ;;  %v1684_v36 = vsub.f32 %v5025_v2, %v1476_v58  ;;  %v1216_v38 = vrot.slane %v1215_v25, 1  ;;  %v1465_v17 = vmax.f32 %v1463_v40, %v1464_v28 }
 0x1ab   : > { %v1482_v19 = vrot.slane %v1481_v4, 1  ;;  %v1248_v18 = vmax.f32 %v1246_v63, %v1247_v9  ;;  %v1709_v7 = vmul.f32 1.442695, %v1645_v10  ;;  %v1232_v0 = vsel %vm1196_vm2, %v5058_v14, -inf }
 0x1ac   : > { %v5068_v62 = vadd.f32 %v5002_v54, %v1061_v16  ;;  %v1781_v26 = vmul.f32 1.442695, %v1681_v22  ;;  %v1648_v8 = vsub.f32 %v5028_v3, %v1224_v57  ;;  %v1498_v32 = vsel %vm1196_vm2, %v5062_v15, -inf }
 0x1ad   : > { %v1787_v30 = vmul.f32 1.442695, %v1684_v36  ;;  %v1217_v31 = vmax.f32 %v1215_v25, %v1216_v38  ;;  %v1466_v2 = vrot.slane %v1465_v17, 2  ;;  %v1483_v45 = vmax.f32 %v1481_v4, %v1482_v19  ;;  %v1073_v5 = vpop.xlane.xlu0 %1072 }
 0x1ae   : > { %v1249_v6 = vrot.slane %v1248_v18, 2  ;;  %v1233_v33 = vrot.slane %v1232_v0, 4  ;;  %4070 = vpow2.f32 %v1709_v7  ;;  %v1499_v46 = vrot.slane %v1498_v32, 4  ;;  %v950_v3 = vpop.xlane.xlu1 %949 }
 0x1af   : > { %v1484_v24 = vsel %vm1196_vm2, %v5068_v62, -inf  ;;  %4072 = vpow2.f32 %v1781_v26  ;;  %v1715_v39 = vmul.f32 1.442695, %v1648_v8  ;;  %v1647_v41 = vsub.f32 %v5038_v29, %v1217_v31 }
 0x1b0   : > { %4074 = vpow2.f32 %v1787_v30  ;;  %v1467_v43 = vmax.f32 %v1465_v17, %v1466_v2  ;;  %v1685_v47 = vsub.f32 %v5035_v27, %v1483_v45  ;;  %v1250_v13 = vmax.f32 %v1248_v18, %v1249_v6 }
 0x1b1   : > { %v5075_v12 = vpop.eup %4066  ;;  %v1234_v11 = vmax.f32 %v1232_v0, %v1233_v33  ;;  %v1485_v61 = vrot.slane %v1484_v24, 4  ;;  %v1500_v49 = vmax.f32 %v1498_v32, %v1499_v46  ;;  %v5084_v52 = vadd.f32 %v5002_v54, %v965_v37  ;;  %v1070_v31 = vpop.xlane.xlu0 %1069 }
 0x1b2   : > { %v1844_v50 = vsel %vm1196_vm2, %v5075_v12, 0.0  ;;  %v5087_v42 = vadd.f32 %v5002_v54, %v950_v3  ;;  %4076 = vpow2.f32 %v1715_v39  ;;  %v1713_v23 = vmul.f32 1.442695, %v1647_v41  ;;  %v956_v48 = vpop.xlane.xlu1 %955 }
 0x1b3   : > { %v5078_v44 = vpop.eup %4068  ;;  %v1468_v34 = vrot.slane %v1467_v43, 1  ;;  %v1486_v27 = vmax.f32 %v1484_v24, %v1485_v61  ;;  %v1845_v56 = vrot.slane %v1844_v50, 4  ;;  %v1251_v59 = vrot.slane %v1250_v13, 1 }
 0x1b4   : > { %v2096_v29 = vsel %vm1196_vm2, %v5078_v44, 0.0  ;;  %v1235_v53 = vrot.slane %v1234_v11, 2  ;;  %v1260_v40 = vsel %vm1196_vm2, %v5084_v52, -inf  ;;  %v1789_v60 = vmul.f32 1.442695, %v1685_v47 }
 0x1b5   : > { %v1501_v63 = vrot.slane %v1500_v49, 2  ;;  %v1261_v1 = vrot.slane %v1260_v40, 4  ;;  %v1225_v21 = vsel %vm1196_vm2, %v5087_v42, -inf  ;;  %v2097_v55 = vrot.slane %v2096_v29, 4 }
 0x1b6   : > { %v1487_v58 = vrot.slane %v1486_v27, 2  ;;  %v1226_v25 = vrot.slane %v1225_v21, 4  ;;  %v5096_v28 = vadd.f32 %v5002_v54, %v1073_v5  ;;  %4078 = vpow2.f32 %v1713_v23 }
 0x1b7   : > { %v1469_v4 = vmax.f32 %v1467_v43, %v1468_v34  ;;  %v1262_v9 = vmax.f32 %v1260_v40, %v1261_v1  ;;  %v5101_v10 = vadd.f32 %v5002_v54, %v956_v48  ;;  %v1252_v57 = vmax.f32 %v1250_v13, %v1251_v59  ;;  %v1064_v59 = vpop.xlane.xlu1 %1063 }
 0x1b8   : > { %v5098_v35 = vpop.eup %4070  ;;  %v1236_v16 = vmax.f32 %v1234_v11, %v1235_v53  ;;  %v1227_v36 = vmax.f32 %v1225_v21, %v1226_v25  ;;  %v1512_v38 = vsel %vm1196_vm2, %v5096_v28, -inf  ;;  %v1502_v19 = vmax.f32 %v1500_v49, %v1501_v63 }
 0x1b9   : > { %v5103_v22 = vpop.eup %4072  ;;  %v1263_v18 = vrot.slane %v1262_v9, 2  ;;  %v1513_v7 = vrot.slane %v1512_v38, 4  ;;  %v1239_v0 = vsel %vm1196_vm2, %v5101_v10, -inf  ;;  %v5111_v26 = vadd.f32 %v1845_v56, %v1844_v50 }
 0x1ba   : > { %v5107_v17 = vpop.eup %4074  ;;  %v1837_v8 = vsel %vm1196_vm2, %v5098_v35, 0.0  ;;  %v1488_v32 = vmax.f32 %v1486_v27, %v1487_v58  ;;  %v1240_v30 = vrot.slane %v1239_v0, 4  ;;  %v5115_v2 = vadd.f32 %v2097_v55, %v2096_v29 }
 0x1bb   : > { %v5119_v45 = vsel %vm1196_vm2, %v5103_v22, 0.0  ;;  %v1228_v6 = vrot.slane %v1227_v36, 2  ;;  %v1514_v33 = vmax.f32 %v1512_v38, %v1513_v7  ;;  %v1683_v24 = vsub.f32 %v5046_v51, %v1469_v4 }
 0x1bc   : > { %v5121_v46 = vpop.eup %4076  ;;  %v1237_v37 = vrot.slane %v1236_v16, 1  ;;  %v1264_v39 = vmax.f32 %v1262_v9, %v1263_v18  ;;  %v1241_v3 = vmax.f32 %v1239_v0, %v1240_v30  ;;  %v1838_v41 = vrot.slane %v1837_v8, 4 }
 0x1bd   : > { %4080 = vpow2.f32 %v1789_v60  ;;  %v1652_v43 = vsub.f32 %v5049_v20, %v1252_v57  ;;  %v1503_v47 = vrot.slane %v1502_v19, 1  ;;  %v1489_v13 = vrot.slane %v1488_v32, 1  ;;  %v971_v20 = vpop.xlane.xlu0 %970 }
 0x1be   : > { %v1515_v11 = vrot.slane %v1514_v33, 2  ;;  %v1242_v61 = vrot.slane %v1241_v3, 2  ;;  %v5126_v50 = vadd.f32 %v5002_v54, %v1070_v31  ;;  %v2090_v51 = vrot.slane %v5119_v45, 4 }
 0x1bf   : > { %v1229_v23 = vmax.f32 %v1227_v36, %v1228_v6  ;;  %v1785_v34 = vmul.f32 1.442695, %v1683_v24  ;;  %v1238_v27 = vmax.f32 %v1236_v16, %v1237_v37  ;;  %v1265_v5 = vrot.slane %v1264_v39, 1  ;;  %v962_v6 = vpop.xlane.xlu1 %961 }
 0x1c0   : > { %v1516_v56 = vmax.f32 %v1514_v33, %v1515_v11  ;;  %v5131_v53 = vpop.eup %4078  ;;  %v5133_v40 = vadd.f32 %v1838_v41, %v1837_v8  ;;  %v5137_v48 = vsel %vm1196_vm2, %v5107_v17, 0.0  ;;  %v1504_v60 = vmax.f32 %v1502_v19, %v1503_v47 }
 0x1c1   : > { %v1505_v63 = vsel %vm1196_vm2, %v5126_v50, -inf  ;;  %v5143_v1 = vsel %vm1196_vm2, %v5121_v46, 0.0  ;;  %v1723_v21 = vmul.f32 1.442695, %v1652_v43  ;;  %v1490_v55 = vmax.f32 %v1488_v32, %v1489_v13  ;;  %v1079_v33 = vpop.xlane.xlu0 %1078 }
 0x1c2   : > { %v1243_v58 = vmax.f32 %v1241_v3, %v1242_v61  ;;  %v1230_v25 = vrot.slane %v1229_v23, 1  ;;  %v1506_v4 = vrot.slane %v1505_v63, 4  ;;  %v5146_v9 = vadd.f32 %v5002_v54, %v1064_v59 }
 0x1c3   : > { %v5149_v57 = vadd.f32 %v5002_v54, %v971_v20  ;;  %4082 = vpow2.f32 %v1785_v34  ;;  %v1650_v16 = vsub.f32 %v5058_v14, %v1238_v27  ;;  %v1266_v36 = vmax.f32 %v1264_v39, %v1265_v5 }
 0x1c4   : > { %v1517_v38 = vrot.slane %v1516_v56, 1  ;;  %v1688_v19 = vsub.f32 %v5062_v15, %v1504_v60  ;;  %v1507_v18 = vmax.f32 %v1505_v63, %v1506_v4  ;;  %v1491_v7 = vsel %vm1196_vm2, %v5146_v9, -inf }
 0x1c5   : > { %v1274_v0 = vsel %vm1196_vm2, %v5149_v57, -inf  ;;  %v1686_v8 = vsub.f32 %v5068_v62, %v1490_v55  ;;  %v1244_v32 = vrot.slane %v1243_v58, 1  ;;  %v1492_v30 = vrot.slane %v1491_v7, 4 }
 0x1c6   : > { %v1275_v31 = vrot.slane %v1274_v0, 4  ;;  %v2111_v14 = vrot.slane %v5137_v48, 4  ;;  %4084 = vpow2.f32 %v1723_v21  ;;  %v1231_v15 = vmax.f32 %v1229_v23, %v1230_v25  ;;  %v1076_v25 = vpop.xlane.xlu1 %1075 }
 0x1c7   : > { %v5158_v24 = vpop.eup %4080  ;;  %v1508_v37 = vrot.slane %v1507_v18, 2  ;;  %v1654_v39 = vsub.f32 %v5084_v52, %v1266_v36  ;;  %v1518_v3 = vmax.f32 %v1516_v56, %v1517_v38  ;;  %v1493_v41 = vmax.f32 %v1491_v7, %v1492_v30 }
 0x1c8   : > { %6546 = vst [vmem:[#allocation5_spill] sm:$0xff] %v5158_v24  ;;  %v1276_v43 = vmax.f32 %v1274_v0, %v1275_v31  ;;  %v1719_v47 = vmul.f32 1.442695, %v1650_v16  ;;  %v1795_v13 = vmul.f32 1.442695, %v1688_v19  ;;  %v5163_v62 = vadd.f32 %v5002_v54, %v962_v6 }
 0x1c9   : > { %v5166_v11 = vadd.f32 %v5002_v54, %v1079_v33  ;;  %v1791_v61 = vmul.f32 1.442695, %v1686_v8  ;;  %v1245_v34 = vmax.f32 %v1243_v58, %v1244_v32  ;;  %v1509_v27 = vmax.f32 %v1507_v18, %v1508_v37  ;;  %v968_v32 = vpop.xlane.xlu0 %967 }
 0x1ca   : > { %v1494_v5 = vrot.slane %v1493_v41, 2  ;;  %v1649_v23 = vsub.f32 %v5087_v42, %v1231_v15  ;;  %v1277_v59 = vrot.slane %v1276_v43, 2  ;;  %v1253_v52 = vsel %vm1196_vm2, %v5163_v62, -inf }
 0x1cb   : > { %v1526_v56 = vsel %vm1196_vm2, %v5166_v11, -inf  ;;  %v1859_v20 = vrot.slane %v5143_v1, 4  ;;  %v1851_v60 = vsel %vm1196_vm2, %v5131_v53, 0.0  ;;  %v1727_v63 = vmul.f32 1.442695, %v1654_v39 }
 0x1cc   : > { %v1690_v21 = vsub.f32 %v5096_v28, %v1518_v3  ;;  %v2117_v55 = vsel %vm1196_vm2, %v5158_v24, 0.0  ;;  %4086 = vpow2.f32 %v1719_v47  ;;  %v1254_v42 = vrot.slane %v1253_v52, 4 }
 0x1cd   : > { %v1527_v58 = vrot.slane %v1526_v56, 4  ;;  %v5179_v4 = vpop.eup %4082  ;;  %4088 = vpow2.f32 %v1795_v13  ;;  %v1651_v16 = vsub.f32 %v5101_v10, %v1245_v34  ;;  %v1510_v36 = vrot.slane %v1509_v27, 1 }
 0x1ce   : > { %v1495_v38 = vmax.f32 %v1493_v41, %v1494_v5  ;;  %4090 = vpow2.f32 %v1791_v61  ;;  %v1717_v19 = vmul.f32 1.442695, %v1649_v23  ;;  %v1278_v18 = vmax.f32 %v1276_v43, %v1277_v59  ;;  %v1082_v23 = vpop.xlane.xlu1 %1081  ;;  %v977_v59 = vpop.xlane.xlu0 %976 }
 0x1cf   : > { %v1255_v7 = vmax.f32 %v1253_v52, %v1254_v42  ;;  %4092 = vpow2.f32 %v1727_v63  ;;  %v1799_v28 = vmul.f32 1.442695, %v1690_v21  ;;  %v1528_v0 = vmax.f32 %v1526_v56, %v1527_v58 }
 0x1d0   : > { %v5183_v8 = vadd.f32 %v5002_v54, %v1076_v25  ;;  %v5185_v30 = vpop.eup %4084  ;;  %v5190_v31 = vadd.f32 %v2090_v51, %v5119_v45  ;;  %v1852_v10 = vrot.slane %v1851_v60, 4  ;;  %v2118_v6 = vrot.slane %v2117_v55, 4 }
 0x1d1   : > { %6547 = vst [vmem:[#allocation6_spill] sm:$0xff] %v5185_v30  ;;  %v1256_v33 = vrot.slane %v1255_v7, 2  ;;  %v1721_v37 = vmul.f32 1.442695, %v1651_v16  ;;  %v1511_v39 = vmax.f32 %v1509_v27, %v1510_v36  ;;  %v1496_v3 = vrot.slane %v1495_v38, 1 }
 0x1d2   : > { %v5194_v41 = vadd.f32 %v2111_v14, %v5137_v48  ;;  %4094 = vpow2.f32 %v1717_v19  ;;  %v1279_v43 = vrot.slane %v1278_v18, 1  ;;  %v5197_v13 = vadd.f32 %v1859_v20, %v5143_v1 }
 0x1d3   : > { %v1257_v47 = vmax.f32 %v1255_v7, %v1256_v33  ;;  %4096 = vpow2.f32 %v1799_v28  ;;  %v1529_v45 = vrot.slane %v1528_v0, 2  ;;  %v1519_v51 = vsel %vm1196_vm2, %v5183_v8, -inf  ;;  %v980_v7 = vpop.xlane.xlu1 %979 }
 0x1d4   : > { %v5201_v61 = vadd.f32 %v1852_v10, %v1851_v60  ;;  %v5203_v34 = vadd.f32 %v2118_v6, %v2117_v55  ;;  %v2103_v27 = vsel %vm1196_vm2, %v5179_v4, 0.0  ;;  %v5208_v48 = vadd.f32 %v5002_v54, %v968_v32 }
 0x1d5   : > { %4098 = vpow2.f32 %v1721_v37  ;;  %v1689_v14 = vsub.f32 %v5126_v50, %v1511_v39  ;;  %v1497_v1 = vmax.f32 %v1495_v38, %v1496_v3  ;;  %v1258_v5 = vrot.slane %v1257_v47, 1 }
 0x1d6   : > { %v5211_v52 = vpop.eup %4086  ;;  %v1280_v60 = vmax.f32 %v1278_v18, %v1279_v43  ;;  %v1520_v63 = vrot.slane %v1519_v51, 4  ;;  %v2104_v42 = vrot.slane %v2103_v27, 4  ;;  %v1886_v50 = vsel %vm1196_vm2, %v5185_v30, 0.0 }
 0x1d7   : > { %v5215_v21 = vpop.eup %4088  ;;  %v1530_v58 = vmax.f32 %v1528_v0, %v1529_v45  ;;  %v1267_v36 = vsel %vm1196_vm2, %v5208_v48, -inf  ;;  %v5226_v38 = vadd.f32 %v5002_v54, %v1082_v23  ;;  %v5229_v19 = vadd.f32 %v5002_v54, %v977_v59 }
 0x1d8   : > { %6548 = vst [vmem:[#allocation7_spill] sm:$0xff] %v5215_v21  ;;  %v5220_v25 = vpop.eup %4090  ;;  %v1797_v28 = vmul.f32 1.442695, %v1689_v14  ;;  %v1687_v0 = vsub.f32 %v5146_v9, %v1497_v1  ;;  %v1259_v32 = vmax.f32 %v1257_v47, %v1258_v5  ;;  %v1887_v10 = vrot.slane %v1886_v50, 4 }
 0x1d9   : > { %v5231_v18 = vpop.eup %4092  ;;  %v1656_v6 = vsub.f32 %v5149_v57, %v1280_v60  ;;  %v1521_v33 = vmax.f32 %v1519_v51, %v1520_v63  ;;  %v1533_v37 = vsel %vm1196_vm2, %v5226_v38, -inf  ;;  %v5238_v39 = vadd.f32 %v2104_v42, %v2103_v27 }
 0x1da   : > { %6549 = vst [vmem:[#allocation8_spill] sm:$0xff] %v5231_v18  ;;  %v1872_v3 = vsel %vm1196_vm2, %v5211_v52, 0.0  ;;  %v1531_v43 = vrot.slane %v1530_v58, 1  ;;  %v1268_v45 = vrot.slane %v1267_v36, 4  ;;  %v2138_v9 = vsel %vm1196_vm2, %v5215_v21, 0.0  ;;  %v1085_v21 = vpop.xlane.xlu0 %1084 }
 0x1db   : > { %v2124_v47 = vsel %vm1196_vm2, %v5220_v25, 0.0  ;;  %v1900_v57 = vsel %vm1196_vm2, %v5231_v18, 0.0  ;;  %v1288_v51 = vsel %vm1196_vm2, %v5229_v19, -inf  ;;  %4100 = vpow2.f32 %v1797_v28 }
 0x1dc   : > { %v5242_v23 = vpop.eup %4094  ;;  %v1793_v14 = vmul.f32 1.442695, %v1687_v0  ;;  %v1653_v1 = vsub.f32 %v5163_v62, %v1259_v32  ;;  %v1534_v5 = vrot.slane %v1533_v37, 4  ;;  %v5255_v59 = vadd.f32 %v1887_v10, %v1886_v50 }
 0x1dd   : > { %v5252_v27 = vpop.eup %4096  ;;  %v1873_v60 = vrot.slane %v1872_v3, 4  ;;  %v1731_v63 = vmul.f32 1.442695, %v1656_v6  ;;  %v1522_v42 = vrot.slane %v1521_v33, 2  ;;  %v1865_v20 = vsel %vm1196_vm2, %v5242_v23, 0.0 }
 0x1de   : > { %6550 = vst [vmem:[#allocation9_spill] sm:$0xff] %v5252_v27  ;;  %6551 = vst [vmem:[#allocation10_spill] sm:$0xff] %v5255_v59  ;;  %v1532_v56 = vmax.f32 %v1530_v58, %v1531_v43  ;;  %v1269_v55 = vmax.f32 %v1267_v36, %v1268_v45  ;;  %v1289_v15 = vrot.slane %v1288_v51, 4  ;;  %v2139_v49 = vrot.slane %v2138_v9, 4 }
 0x1df   : > { %v5257_v16 = vpop.eup %4098  ;;  %v2125_v28 = vrot.slane %v2124_v47, 4  ;;  %v1901_v0 = vrot.slane %v1900_v57, 4  ;;  %v2152_v62 = vsel %vm1196_vm2, %v5252_v27, 0.0  ;;  %4102 = vpow2.f32 %v1793_v14 }
 0x1e0   : > { %6552 = vst [vmem:[#allocation11_spill] sm:$0xff] %v5257_v16  ;;  %v1725_v50 = vmul.f32 1.442695, %v1653_v1  ;;  %v1535_v32 = vmax.f32 %v1533_v37, %v1534_v5  ;;  %v5264_v10 = vadd.f32 %v5002_v54, %v980_v7  ;;  %v1866_v6 = vrot.slane %v1865_v20, 4 }
 0x1e1   : > { %v1879_v29 = vsel %vm1196_vm2, %v5257_v16, 0.0  ;;  %4104 = vpow2.f32 %v1731_v63  ;;  %v1523_v58 = vmax.f32 %v1521_v33, %v1522_v42  ;;  %v5268_v36 = vadd.f32 %v1873_v60, %v1872_v3  ;;  %v974_v3 = vpop.xlane.xlu0 %973 }
 0x1e2   : > { %v1692_v43 = vsub.f32 %v5166_v11, %v1532_v56  ;;  %v1270_v45 = vrot.slane %v1269_v55, 2  ;;  %v1290_v18 = vmax.f32 %v1288_v51, %v1289_v15  ;;  %v5272_v1 = vadd.f32 %v2139_v49, %v2138_v9 }
 0x1e3   : > { %v5274_v37 = vadd.f32 %v2125_v28, %v2124_v47  ;;  %v2153_v7 = vrot.slane %v2152_v62, 4  ;;  %v1880_v5 = vrot.slane %v1879_v29, 4  ;;  %4106 = vpow2.f32 %v1725_v50 }
 0x1e4   : > { %6553 = vst [vmem:[#allocation12_spill] sm:$0xff] %v5272_v1  ;;  %v1536_v27 = vrot.slane %v1535_v32, 2  ;;  %v1295_v33 = vsel %vm1196_vm2, %v5264_v10, -inf  ;;  %v5279_v60 = vadd.f32 %v1901_v0, %v1900_v57  ;;  %v5281_v11 = vadd.f32 %v1866_v6, %v1865_v20  ;;  %v1088_v57 = vpop.xlane.xlu1 %1087 }
 0x1e5   : > { %v1524_v15 = vrot.slane %v1523_v58, 1  ;;  %v5283_v56 = vpop.eup %4100  ;;  %v1803_v9 = vmul.f32 1.442695, %v1692_v43  ;;  %v1271_v47 = vmax.f32 %v1269_v55, %v1270_v45  ;;  %v1291_v51 = vrot.slane %v1290_v18, 2 }
 0x1e6   : > { %6554 = vst [vmem:[#allocation13_spill] sm:$0xff] %v5279_v60  ;;  %6555 = vst [vmem:[#allocation14_spill] sm:$0xff] %v5283_v56  ;;  %v1296_v28 = vrot.slane %v1295_v33, 4  ;;  %v5289_v50 = vadd.f32 %v5002_v54, %v1085_v21  ;;  %v5291_v0 = vadd.f32 %v2153_v7, %v2152_v62  ;;  %v5293_v20 = vadd.f32 %v1880_v5, %v1879_v29  ;;  %v983_v60 = vpop.xlane.xlu0 %982 }
 0x1e7   : > { %v1537_v6 = vmax.f32 %v1535_v32, %v1536_v27  ;;  %v6557_v43 = vrot.slane %v5111_v26, 2  ;;  %v2145_v42 = vsel %vm1196_vm2, %v5283_v56, 0.0  ;;  %v1525_v21 = vmax.f32 %v1523_v58, %v1524_v15 }
 0x1e8   : > { %6556 = vst [vmem:[#allocation15_spill] sm:$0xff] %v5291_v0  ;;  %4108 = vpow2.f32 %v1803_v9  ;;  %v1272_v62 = vrot.slane %v1271_v47, 1  ;;  %v1292_v29 = vmax.f32 %v1290_v18, %v1291_v51  ;;  %v5305_v27 = vadd.f32 %v5002_v54, %v1088_v57 }
 0x1e9   : > { %v1848_v55 = vadd.f32 %v6557_v43, %v5111_v26  ;;  %v5302_v49 = vpop.eup %4102  ;;  %v1297_v7 = vmax.f32 %v1295_v33, %v1296_v28  ;;  %v1540_v26 = vsel %vm1196_vm2, %v5289_v50, -inf  ;;  %v5312_v5 = vadd.f32 %v5002_v54, %v974_v3 }
 0x1ea   : > { %6558 = vst [vmem:[#allocation16_spill] sm:$0xff] %v5302_v49  ;;  %v2146_v9 = vrot.slane %v2145_v42, 4  ;;  %v1538_v45 = vrot.slane %v1537_v6, 1  ;;  %v2131_v18 = vsel %vm1196_vm2, %v5302_v49, 0.0  ;;  %v1691_v51 = vsub.f32 %v5183_v8, %v1525_v21 }
 0x1eb   : > { %v5307_v32 = vpop.eup %4104  ;;  %v1849_v43 = vrot.slane %v1848_v55, 1  ;;  %v6560_v33 = vrot.slane %v5115_v2, 2  ;;  %v1273_v58 = vmax.f32 %v1271_v47, %v1272_v62  ;;  %v1541_v14 = vrot.slane %v1540_v26, 4 }
 0x1ec   : > { %6559 = vst [vmem:[#allocation17_spill] sm:$0xff] %v5307_v32  ;;  %v1914_v3 = vsel %vm1196_vm2, %v5307_v32, 0.0  ;;  %v1547_v15 = vsel %vm1196_vm2, %v5305_v27, -inf  ;;  %v1293_v56 = vrot.slane %v1292_v29, 1  ;;  %v1298_v0 = vrot.slane %v1297_v7, 2 }
 0x1ed   : > { %v1850_v57 = vadd.f32 %v1849_v43, %v1848_v55  ;;  %v2100_v28 = vadd.f32 %v6560_v33, %v5115_v2  ;;  %v5322_v63 = vpop.eup %4106  ;;  %v1281_v8 = vsel %vm1196_vm2, %v5312_v5, -inf  ;;  %v5330_v55 = vadd.f32 %v2146_v9, %v2145_v42  ;;  %v1097_v33 = vpop.xlane.xlu1 %1096 }
 0x1ee   : > { %6561 = vst [vmem:[#allocation18_spill] sm:$0xff] %v5322_v63  ;;  %v2132_v21 = vrot.slane %v2131_v18, 4  ;;  %v1539_v2 = vmax.f32 %v1537_v6, %v1538_v45  ;;  %v1915_v30 = vrot.slane %v1914_v3, 4  ;;  %v1893_v47 = vsel %vm1196_vm2, %v5322_v63, 0.0 }
 0x1ef   : > { %4110 = vrcp.f32 %v1850_v57  ;;  %v2101_v43 = vrot.slane %v2100_v28, 1  ;;  %v1801_v62 = vmul.f32 1.442695, %v1691_v51  ;;  %v1548_v32 = vrot.slane %v1547_v15, 4 }
 0x1f0   : > { %v1655_v49 = vsub.f32 %v5208_v48, %v1273_v58  ;;  %v1542_v1 = vmax.f32 %v1540_v26, %v1541_v14  ;;  %v1282_v24 = vrot.slane %v1281_v8, 4  ;;  %v1294_v59 = vmax.f32 %v1292_v29, %v1293_v56 }
 0x1f1   : > { %v2102_v16 = vadd.f32 %v2101_v43, %v2100_v28  ;;  %v1299_v57 = vmax.f32 %v1297_v7, %v1298_v0  ;;  %v5336_v42 = vadd.f32 %v5002_v54, %v1097_v33  ;;  %v5339_v6 = vadd.f32 %v5002_v54, %v983_v60  ;;  %v986_v26 = vpop.xlane.xlu1 %985  ;;  %v1091_v33 = vpop.xlane.xlu0 %1090 }
 0x1f2   : > { %v5341_v45 = vpop.eup %4108  ;;  %v1894_v63 = vrot.slane %v1893_v47, 4  ;;  %v1693_v51 = vsub.f32 %v5226_v38, %v1539_v2  ;;  %v5345_v48 = vadd.f32 %v2132_v21, %v2131_v18  ;;  %v5347_v14 = vadd.f32 %v1915_v30, %v1914_v3 }
 0x1f3   : > { %6562 = vst [vmem:[#allocation19_spill] sm:$0xff] %v5341_v45  ;;  %4112 = vrcp.f32 %v2102_v16  ;;  %v1549_v56 = vmax.f32 %v1547_v15, %v1548_v32  ;;  %v1302_v0 = vsel %vm1196_vm2, %v5339_v6, -inf  ;;  %v1543_v29 = vrot.slane %v1542_v1, 2 }
 0x1f4   : > { %4114 = vpow2.f32 %v1801_v62  ;;  %v1283_v60 = vmax.f32 %v1281_v8, %v1282_v24  ;;  %v1303_v7 = vrot.slane %v1302_v0, 4  ;;  %v1729_v58 = vmul.f32 1.442695, %v1655_v49 }
 0x1f5   : > { %v1658_v28 = vsub.f32 %v5229_v19, %v1294_v59  ;;  %v1300_v43 = vrot.slane %v1299_v57, 1  ;;  %v1568_v16 = vsel %vm1196_vm2, %v5336_v42, -inf  ;;  %v5354_v38 = vadd.f32 %v1894_v63, %v1893_v47 }
 0x1f6   : > { %v2166_v30 = vsel %vm1196_vm2, %v5341_v45, 0.0  ;;  %v1805_v32 = vmul.f32 1.442695, %v1693_v51  ;;  %v1304_v15 = vmax.f32 %v1302_v0, %v1303_v7  ;;  %v1550_v24 = vrot.slane %v1549_v56, 2 }
 0x1f7   : > { %v6563_v49 = vrot.slane %v5133_v40, 2  ;;  %v5363_v19 = vadd.f32 %v5002_v54, %v986_v26  ;;  %v1544_v59 = vmax.f32 %v1542_v1, %v1543_v29  ;;  %v1284_v21 = vrot.slane %v1283_v60, 2 }
 0x1f8   : > { %v1569_v2 = vrot.slane %v1568_v16, 4  ;;  %v2167_v62 = vrot.slane %v2166_v30, 4  ;;  %4116 = vpow2.f32 %v1729_v58  ;;  %v1735_v51 = vmul.f32 1.442695, %v1658_v28 }
 0x1f9   : > { %v4111_v18 = vpop.eup %4110  ;;  %v1841_v8 = vadd.f32 %v6563_v49, %v5133_v40  ;;  %4118 = vpow2.f32 %v1805_v32  ;;  %v1301_v7 = vmax.f32 %v1299_v57, %v1300_v43  ;;  %v1305_v40 = vrot.slane %v1304_v15, 2 }
 0x1fa   : > { %v2350_v63 = vmul.f32 %v4111_v18, %v5075_v12  ;;  %v1551_v49 = vmax.f32 %v1549_v56, %v1550_v24  ;;  %v1309_v1 = vsel %vm1196_vm2, %v5363_v19, -inf  ;;  %v5371_v12 = vadd.f32 %v5002_v54, %v1091_v33 }
 0x1fb   : > { %v1842_v26 = vrot.slane %v1841_v8, 1  ;;  %v1545_v18 = vrot.slane %v1544_v59, 1  ;;  %v1285_v47 = vmax.f32 %v1283_v60, %v1284_v21  ;;  %v1570_v9 = vmax.f32 %v1568_v16, %v1569_v2  ;;  %v1094_v60 = vpop.xlane.xlu1 %1093 }
 0x1fc   : > { %2420 = vperm.xlu1 %3936, %v2350_v63   ;;  %v1310_v58 = vrot.slane %v1309_v1, 4  ;;  %v1554_v57 = vsel %vm1196_vm2, %v5371_v12, -inf  ;;  %v6564_v56 = vrot.slane %v5197_v13, 2  ;;  %v5381_v24 = vadd.f32 %v2167_v62, %v2166_v30 }
 0x1fd   : > { %v4113_v29 = vpop.eup %4112  ;;  %v1843_v0 = vadd.f32 %v1842_v26, %v1841_v8  ;;  %4120 = vpow2.f32 %v1735_v51  ;;  %v1306_v63 = vmax.f32 %v1304_v15, %v1305_v40  ;;  %v1552_v16 = vrot.slane %v1551_v49, 1 }
 0x1fe   : > { %v2386_v28 = vmul.f32 %v4113_v29, %v5078_v44  ;;  %v1862_v43 = vadd.f32 %v6564_v56, %v5197_v13  ;;  %v5379_v32 = vpop.eup %4114  ;;  %6565 = vst [vmem:[#allocation20_spill] sm:$0xff] %v5381_v24  ;;  %v1311_v33 = vmax.f32 %v1309_v1, %v1310_v58  ;;  %v1555_v44 = vrot.slane %v1554_v57, 4  ;;  %v989_v58 = vpop.xlane.xlu0 %988 }
 0x1ff   : > { %4122 = vrcp.f32 %v1843_v0  ;;  %v1659_v21 = vsub.f32 %v5264_v10, %v1301_v7  ;;  %v1546_v2 = vmax.f32 %v1544_v59, %v1545_v18  ;;  %v1286_v26 = vrot.slane %v1285_v47, 1 }
 0x200   : > { %2600 = vperm.xlu0 %3937, %v2386_v28   ;;  %v1863_v8 = vrot.slane %v1862_v43, 1  ;;  %v1571_v29 = vrot.slane %v1570_v9, 2  ;;  %v1556_v3 = vmax.f32 %v1554_v57, %v1555_v44  ;;  %v6566_v30 = vrot.slane %v5190_v31, 2 }
 0x201   : > { %v5388_v15 = vadd.f32 %v5002_v54, %v1094_v60  ;;  %v2159_v0 = vsel %vm1196_vm2, %v5379_v32, 0.0  ;;  %v1307_v40 = vrot.slane %v1306_v63, 1  ;;  %v1312_v1 = vrot.slane %v1311_v33, 2 }
 0x202   : > { %v1864_v13 = vadd.f32 %v1863_v8, %v1862_v43  ;;  %v2093_v62 = vadd.f32 %v6566_v30, %v5190_v31  ;;  %v5393_v10 = vpop.eup %4116  ;;  %v1553_v59 = vmax.f32 %v1551_v49, %v1552_v16  ;;  %v1557_v7 = vrot.slane %v1556_v3, 2  ;;  %v5403_v49 = vld [vmem:[%s6487_s1 + $0x50] ss:$0 sm:$0xff] }
 0x203   : > { %6567 = vst [vmem:[#allocation21_spill] sm:$0xff] %v5393_v10  ;;  %v5395_v28 = vpop.eup %4118  ;;  %v1737_v31 = vmul.f32 1.442695, %v1659_v21  ;;  %v1287_v57 = vmax.f32 %v1285_v47, %v1286_v26  ;;  %v1572_v54 = vmax.f32 %v1570_v9, %v1571_v29  ;;  %v1561_v56 = vsel %vm1196_vm2, %v5388_v15, -inf }
 0x204   : > { %4124 = vrcp.f32 %v1864_v13  ;;  %v2094_v18 = vrot.slane %v2093_v62, 1  ;;  %v2160_v43 = vrot.slane %v2159_v0, 4  ;;  %v1694_v60 = vsub.f32 %v5289_v50, %v1546_v2 }
 0x205   : > { %v1558_v44 = vmax.f32 %v1556_v3, %v1557_v7  ;;  %v1308_v30 = vmax.f32 %v1306_v63, %v1307_v40  ;;  %v1313_v51 = vmax.f32 %v1311_v33, %v1312_v1  ;;  %v5406_v16 = vadd.f32 %v5403_v49, %v989_v58  ;;  %v1103_v1 = vpop.xlane.xlu1 %1102  ;;  %v995_v58 = vpop.xlane.xlu0 %994 }
 0x206   : > { %v2095_v8 = vadd.f32 %v2094_v18, %v2093_v62  ;;  %v6568_v9 = vrot.slane %v5194_v41, 2  ;;  %v5413_v21 = vsel %vm1196_vm2, %v5393_v10, 0.0  ;;  %v1695_v50 = vsub.f32 %v5305_v27, %v1553_v59 }
 0x207   : > { %v1562_v3 = vrot.slane %v1561_v56, 4  ;;  %v5416_v63 = vpop.eup %4120  ;;  %v1657_v33 = vsub.f32 %v5312_v5, %v1287_v57  ;;  %v1573_v2 = vrot.slane %v1572_v54, 1  ;;  %v1316_v26 = vsel %vm1196_vm2, %v5406_v16, -inf }
 0x208   : > { %v2114_v47 = vadd.f32 %v6568_v9, %v5194_v41  ;;  %4126 = vrcp.f32 %v2095_v8  ;;  %6569 = vst [vmem:[#allocation22_spill] sm:$0xff] %v5416_v63  ;;  %v1807_v41 = vmul.f32 1.442695, %v1694_v60  ;;  %v1559_v62 = vrot.slane %v1558_v44, 1 }
 0x209   : > { %v4123_v13 = vpop.eup %4122  ;;  %4128 = vpow2.f32 %v1737_v31  ;;  %v1317_v40 = vrot.slane %v1316_v26, 4  ;;  %v1660_v7 = vsub.f32 %v5339_v6, %v1308_v30  ;;  %v1314_v59 = vrot.slane %v1313_v51, 1 }
 0x20a   : > { %v2115_v29 = vrot.slane %v2114_v47, 1  ;;  %v2349_v27 = vmul.f32 %v4123_v13, %v5098_v35  ;;  %v5423_v8 = vadd.f32 %v2160_v43, %v2159_v0  ;;  %v1908_v5 = vrot.slane %v5413_v21, 4 }
 0x20b   : > { %v1809_v57 = vmul.f32 1.442695, %v1695_v50  ;;  %v1563_v9 = vmax.f32 %v1561_v56, %v1562_v3  ;;  %v1733_v10 = vmul.f32 1.442695, %v1657_v33  ;;  %v1574_v45 = vmax.f32 %v1572_v54, %v1573_v2 }
 0x20c   : > { %v2116_v18 = vadd.f32 %v2115_v29, %v2114_v47  ;;  %2415 = vperm.xlu0 %3937, %v2349_v27   ;;  %v1318_v31 = vmax.f32 %v1316_v26, %v1317_v40  ;;  %v5427_v60 = vadd.f32 %v5403_v49, %v1103_v1  ;;  %4130 = vpow2.f32 %v1807_v41  ;;  %v992_v29 = vpop.xlane.xlu1 %991 }
 0x20d   : > { %v1560_v6 = vmax.f32 %v1558_v44, %v1559_v62  ;;  %v5430_v35 = vadd.f32 %v5403_v49, %v995_v58  ;;  %v6570_v0 = vrot.slane %v5238_v39, 2  ;;  %v1739_v30 = vmul.f32 1.442695, %v1660_v7 }
 0x20e   : > { %v4125_v24 = vpop.eup %4124  ;;  %v1315_v47 = vmax.f32 %v1313_v51, %v1314_v59  ;;  %4132 = vrcp.f32 %v2116_v18  ;;  %v5439_v50 = vsel %vm1196_vm2, %v5395_v28, 0.0  ;;  %v1564_v44 = vrot.slane %v1563_v9, 2 }
 0x20f   : > { %v2107_v43 = vadd.f32 %v6570_v0, %v5238_v39  ;;  %v2352_v56 = vmul.f32 %v4125_v24, %v5121_v46  ;;  %4134 = vpow2.f32 %v1809_v57  ;;  %v1698_v3 = vsub.f32 %v5336_v42, %v1574_v45 }
 0x210   : > { %4136 = vpow2.f32 %v1733_v10  ;;  %v1319_v33 = vrot.slane %v1318_v31, 2  ;;  %v1582_v39 = vsel %vm1196_vm2, %v5427_v60, -inf  ;;  %v1696_v46 = vsub.f32 %v5371_v12, %v1560_v6 }
 0x211   : > { %2430 = vperm.xlu1 %3936, %v2352_v56   ;;  %v1583_v24 = vrot.slane %v1582_v39, 4  ;;  %v1330_v2 = vsel %vm1196_vm2, %v5430_v35, -inf  ;;  %v2108_v26 = vrot.slane %v2107_v43, 1  ;;  %v1928_v13 = vsel %vm1196_vm2, %v5416_v63, 0.0 }
 0x212   : > { %v4127_v51 = vpop.eup %4126  ;;  %4138 = vpow2.f32 %v1739_v30  ;;  %v1661_v42 = vsub.f32 %v5363_v19, %v1315_v47  ;;  %v1565_v41 = vmax.f32 %v1563_v9, %v1564_v44  ;;  %v1331_v40 = vrot.slane %v1330_v2, 4 }
 0x213   : > { %v2385_v45 = vmul.f32 %v4127_v51, %v5103_v22  ;;  %v5451_v10 = vpop.eup %4128  ;;  %v1584_v62 = vmax.f32 %v1582_v39, %v1583_v24  ;;  %v2109_v12 = vadd.f32 %v2108_v26, %v2107_v43  ;;  %v1815_v1 = vmul.f32 1.442695, %v1698_v3  ;;  %v1100_v24 = vpop.xlane.xlu1 %1099 }
 0x214   : > { %v1320_v7 = vmax.f32 %v1318_v31, %v1319_v33  ;;  %v6571_v27 = vrot.slane %v5201_v61, 2  ;;  %v5457_v18 = vadd.f32 %v5403_v49, %v992_v29  ;;  %v1811_v58 = vmul.f32 1.442695, %v1696_v46 }
 0x215   : > { %2595 = vperm.xlu0 %3937, %v2385_v45   ;;  %v1585_v19 = vrot.slane %v1584_v62, 2  ;;  %v1332_v57 = vmax.f32 %v1330_v2, %v1331_v40  ;;  %4140 = vrcp.f32 %v2109_v12  ;;  %v5460_v22 = vadd.f32 %v1908_v5, %v5413_v21  ;;  %v1106_v5 = vpop.xlane.xlu0 %1105 }
 0x216   : > { %v1855_v59 = vadd.f32 %v6571_v27, %v5201_v61  ;;  %v2174_v9 = vrot.slane %v5439_v50, 4  ;;  %v1935_v6 = vsel %vm1196_vm2, %v5451_v10, 0.0  ;;  %v5465_v0 = vpop.eup %4130  ;;  %v1929_v43 = vrot.slane %v1928_v13, 4 }
 0x217   : > { %6572 = vst [vmem:[#allocation23_spill] sm:$0xff] %v5465_v0  ;;  %v1741_v61 = vmul.f32 1.442695, %v1661_v42  ;;  %v1566_v30 = vrot.slane %v1565_v41, 1  ;;  %v1333_v47 = vrot.slane %v1332_v57, 2  ;;  %4142 = vpow2.f32 %v1815_v1 }
 0x218   : > { %v1856_v31 = vrot.slane %v1855_v59, 1  ;;  %v4133_v56 = vpop.eup %4132  ;;  %v1321_v44 = vrot.slane %v1320_v7, 1  ;;  %v1323_v21 = vsel %vm1196_vm2, %v5457_v18, -inf  ;;  %v1936_v39 = vrot.slane %v1935_v6, 4 }
 0x219   : > { %v5469_v33 = vpop.eup %4134  ;;  %4144 = vpow2.f32 %v1811_v58  ;;  %v2388_v51 = vmul.f32 %v4133_v56, %v5107_v17  ;;  %v1586_v46 = vmax.f32 %v1584_v62, %v1585_v19  ;;  %v2180_v29 = vsel %vm1196_vm2, %v5465_v0, 0.0 }
 0x21a   : > { %v1857_v3 = vadd.f32 %v1856_v31, %v1855_v59  ;;  %v5472_v2 = vpop.eup %4136  ;;  %v1334_v42 = vmax.f32 %v1332_v57, %v1333_v47  ;;  %v1567_v45 = vmax.f32 %v1565_v41, %v1566_v30  ;;  %v1324_v40 = vrot.slane %v1323_v21, 4 }
 0x21b   : > { %6573 = vst [vmem:[#allocation24_spill] sm:$0xff] %v5472_v2  ;;  %2610 = vperm.xlu1 %3936, %v2388_v51   ;;  %v5478_v12 = vadd.f32 %v5403_v49, %v1106_v5  ;;  %v5483_v17 = vadd.f32 %v2174_v9, %v5439_v50  ;;  %v1322_v62 = vmax.f32 %v1320_v7, %v1321_v44  ;;  %v6575_v27 = vrot.slane %v5268_v36, 2  ;;  %v1007_v5 = vpop.xlane.xlu0 %1006 }
 0x21c   : > { %4146 = vrcp.f32 %v1857_v3  ;;  %v5480_v1 = vpop.eup %4138  ;;  %v5489_v58 = vadd.f32 %v5403_v49, %v1100_v24  ;;  %v5491_v19 = vadd.f32 %v1929_v43, %v1928_v13  ;;  %v5493_v41 = vadd.f32 %v1936_v39, %v1935_v6 }
 0x21d   : > { %4148 = vpow2.f32 %v1741_v61  ;;  %6574 = vst [vmem:[#allocation25_spill] sm:$0xff] %v5480_v1  ;;  %v1876_v59 = vadd.f32 %v6575_v27, %v5268_v36  ;;  %v1587_v57 = vrot.slane %v1586_v46, 1  ;;  %v1589_v31 = vsel %vm1196_vm2, %v5478_v12, -inf }
 0x21e   : > { %v2181_v61 = vrot.slane %v2180_v29, 4  ;;  %v1921_v50 = vsel %vm1196_vm2, %v5472_v2, 0.0  ;;  %v1335_v7 = vrot.slane %v1334_v42, 1  ;;  %v1942_v36 = vsel %vm1196_vm2, %v5480_v1, 0.0 }
 0x21f   : > { %v1877_v9 = vrot.slane %v1876_v59, 1  ;;  %v4141_v30 = vpop.eup %4140  ;;  %v1697_v47 = vsub.f32 %v5388_v15, %v1567_v45  ;;  %v1325_v13 = vmax.f32 %v1323_v21, %v1324_v40  ;;  %v1575_v6 = vsel %vm1196_vm2, %v5489_v58, -inf }
 0x220   : > { %v1662_v43 = vsub.f32 %v5406_v16, %v1322_v62  ;;  %v2387_v56 = vmul.f32 %v4141_v30, %v5179_v4  ;;  %v1590_v44 = vrot.slane %v1589_v31, 4  ;;  %v2187_v51 = vsel %vm1196_vm2, %v5469_v33, 0.0  ;;  %v1115_v30 = vpop.xlane.xlu0 %1114 }
 0x221   : > { %v1878_v3 = vadd.f32 %v1877_v9, %v1876_v59  ;;  %v1922_v24 = vrot.slane %v1921_v50, 4  ;;  %v1588_v27 = vmax.f32 %v1586_v46, %v1587_v57  ;;  %v5509_v26 = vpop.eup %4142  ;;  %v1943_v15 = vrot.slane %v1942_v36, 4 }
 0x222   : > { %v1336_v21 = vmax.f32 %v1334_v42, %v1335_v7  ;;  %2605 = vperm.xlu0 %3937, %v2387_v56   ;;  %v1576_v45 = vrot.slane %v1575_v6, 4  ;;  %v1813_v40 = vmul.f32 1.442695, %v1697_v47  ;;  %v1326_v62 = vrot.slane %v1325_v13, 2 }
 0x223   : > { %4150 = vrcp.f32 %v1878_v3  ;;  %v5511_v16 = vpop.eup %4144  ;;  %v5515_v59 = vadd.f32 %v5403_v49, %v1007_v5  ;;  %v5518_v46 = vadd.f32 %v2181_v61, %v2180_v29  ;;  %v1743_v57 = vmul.f32 1.442695, %v1662_v43 }
 0x224   : > { %6576 = vst [vmem:[#allocation26_spill] sm:$0xff] %v5511_v16  ;;  %v1591_v39 = vmax.f32 %v1589_v31, %v1590_v44  ;;  %v2188_v7 = vrot.slane %v2187_v51, 4  ;;  %v1923_v56 = vadd.f32 %v1922_v24, %v1921_v50  ;;  %v1700_v3 = vsub.f32 %v5427_v60, %v1588_v27 }
 0x225   : > { %v1944_v47 = vadd.f32 %v1943_v15, %v1942_v36  ;;  %v2194_v5 = vsel %vm1196_vm2, %v5511_v16, 0.0  ;;  %v1664_v54 = vsub.f32 %v5430_v35, %v1336_v21  ;;  %v1577_v1 = vmax.f32 %v1575_v6, %v1576_v45  ;;  %v1001_v36 = vpop.xlane.xlu1 %1000 }
 0x226   : > { %v4147_v9 = vpop.eup %4146  ;;  %4152 = vpow2.f32 %v1813_v40  ;;  %v1327_v29 = vmax.f32 %v1325_v13, %v1326_v62  ;;  %v1358_v31 = vsel %vm1196_vm2, %v5515_v59, -inf  ;;  %v6577_v61 = vrot.slane %v5274_v37, 2 }
 0x227   : > { %v5520_v42 = vpop.eup %4148  ;;  %v2351_v4 = vmul.f32 %v4147_v9, %v5131_v53  ;;  %v2208_v53 = vsel %vm1196_vm2, %v5509_v26, 0.0  ;;  %4154 = vpow2.f32 %v1743_v57  ;;  %v1592_v35 = vrot.slane %v1591_v39, 2 }
 0x228   : > { %v2128_v60 = vadd.f32 %v6577_v61, %v5274_v37  ;;  %v1949_v50 = vsel %vm1196_vm2, %v5520_v42, 0.0  ;;  %v2195_v6 = vrot.slane %v2194_v5, 4  ;;  %v1819_v43 = vmul.f32 1.442695, %v1700_v3 }
 0x229   : > { %2425 = vperm.xlu1 %3936, %v2351_v4   ;;  %v5537_v13 = vadd.f32 %v5403_v49, %v1115_v30  ;;  %v1924_v24 = vrot.slane %v1923_v56, 2  ;;  %v1747_v27 = vmul.f32 1.442695, %v1664_v54  ;;  %v1578_v15 = vrot.slane %v1577_v1, 2 }
 0x22a   : > { %v2129_v44 = vrot.slane %v2128_v60, 1  ;;  %v1359_v21 = vrot.slane %v1358_v31, 4  ;;  %v2209_v37 = vrot.slane %v2208_v53, 4  ;;  %v1945_v45 = vrot.slane %v1944_v47, 2 }
 0x22b   : > { %v1328_v4 = vrot.slane %v1327_v29, 1  ;;  %v5539_v9 = vadd.f32 %v2188_v7, %v2187_v51  ;;  %v1950_v57 = vrot.slane %v1949_v50, 4  ;;  %v1593_v61 = vmax.f32 %v1591_v39, %v1592_v35 }
 0x22c   : > { %v2130_v40 = vadd.f32 %v2129_v44, %v2128_v60  ;;  %v5542_v16 = vadd.f32 %v5403_v49, %v1001_v36  ;;  %v2196_v3 = vadd.f32 %v2195_v6, %v2194_v5  ;;  %4156 = vpow2.f32 %v1819_v43  ;;  %v1109_v44 = vpop.xlane.xlu1 %1108 }
 0x22d   : > { %v4151_v62 = vpop.eup %4150  ;;  %v1610_v54 = vsel %vm1196_vm2, %v5537_v13, -inf  ;;  %v5547_v2 = vadd.f32 %v1924_v24, %v1923_v56  ;;  %4158 = vpow2.f32 %v1747_v27  ;;  %v1579_v0 = vmax.f32 %v1577_v1, %v1578_v15 }
 0x22e   : > { %v2354_v30 = vmul.f32 %v4151_v62, %v5211_v52  ;;  %v1360_v60 = vmax.f32 %v1358_v31, %v1359_v21  ;;  %v5549_v51 = vadd.f32 %v2209_v37, %v2208_v53  ;;  %v5551_v7 = vadd.f32 %v1945_v45, %v1944_v47 }
 0x22f   : > { %6578 = vst [vmem:[#allocation27_spill] sm:$0xff] %v5547_v2  ;;  %v1329_v39 = vmax.f32 %v1327_v29, %v1328_v4  ;;  %4160 = vrcp.f32 %v2130_v40  ;;  %v1594_v5 = vrot.slane %v1593_v61, 1  ;;  %v1344_v52 = vsel %vm1196_vm2, %v5542_v16, -inf }
 0x230   : > { %6579 = vst [vmem:[#allocation28_spill] sm:$0xff] %v5551_v7  ;;  %2440 = vperm.xlu0 %3937, %v2354_v30   ;;  %v1611_v35 = vrot.slane %v1610_v54, 4  ;;  %v6580_v56 = vrot.slane %v5281_v11, 2  ;;  %v5558_v6 = vpop.eup %4152  ;;  %v5561_v31 = vadd.f32 %v1950_v57, %v1949_v50  ;;  %v2197_v47 = vrot.slane %v2196_v3, 2  ;;  %v1121_v57 = vpop.xlane.xlu0 %1120 }
 0x231   : > { %v5564_v29 = vadd.f32 %v5403_v49, %v1109_v44  ;;  %v5566_v53 = vpop.eup %4154  ;;  %v1580_v24 = vrot.slane %v1579_v0, 1  ;;  %v1361_v27 = vrot.slane %v1360_v60, 2  ;;  %v1345_v37 = vrot.slane %v1344_v52, 4 }
 0x232   : > { %v1869_v36 = vadd.f32 %v6580_v56, %v5281_v11  ;;  %6581 = vst [vmem:[#allocation29_spill] sm:$0xff] %v5566_v53  ;;  %v1663_v4 = vsub.f32 %v5457_v18, %v1329_v39  ;;  %v1595_v40 = vmax.f32 %v1593_v61, %v1594_v5  ;;  %v1612_v62 = vmax.f32 %v1610_v54, %v1611_v35 }
 0x233   : > { %v1596_v50 = vsel %vm1196_vm2, %v5564_v29, -inf  ;;  %v5576_v44 = vadd.f32 %v2197_v47, %v2196_v3  ;;  %v5580_v21 = vsel %vm1196_vm2, %v5558_v6, 0.0  ;;  %v1956_v11 = vsel %vm1196_vm2, %v5566_v53, 0.0 }
 0x234   : > { %v1870_v15 = vrot.slane %v1869_v36, 1  ;;  %v1597_v1 = vrot.slane %v1596_v50, 4  ;;  %v1581_v43 = vmax.f32 %v1579_v0, %v1580_v24  ;;  %v1362_v45 = vmax.f32 %v1360_v60, %v1361_v27 }
 0x235   : > { %v1346_v18 = vmax.f32 %v1344_v52, %v1345_v37  ;;  %v5587_v54 = vadd.f32 %v5403_v49, %v1121_v57  ;;  %v1745_v39 = vmul.f32 1.442695, %v1663_v4  ;;  %v1701_v5 = vsub.f32 %v5478_v12, %v1595_v40 }
 0x236   : > { %v1871_v56 = vadd.f32 %v1870_v15, %v1869_v36  ;;  %v5584_v63 = vpop.eup %4156  ;;  %v1598_v61 = vmax.f32 %v1596_v50, %v1597_v1  ;;  %v1613_v35 = vrot.slane %v1612_v62, 2  ;;  %v6584_v36 = vrot.slane %v5293_v20, 2  ;;  %v998_v15 = vpop.xlane.xlu1 %997 }
 0x237   : > { %6582 = vst [vmem:[#allocation30_spill] sm:$0xff] %v5584_v63  ;;  %v5589_v3 = vpop.eup %4158  ;;  %v2202_v60 = vrot.slane %v5580_v21, 4  ;;  %v1957_v24 = vrot.slane %v1956_v11, 4  ;;  %v6585_v1 = vrot.slane %v5203_v34, 2  ;;  %v2222_v37 = vsel %vm1196_vm2, %v5584_v63, 0.0 }
 0x238   : > { %4162 = vrcp.f32 %v1871_v56  ;;  %6583 = vst [vmem:[#allocation31_spill] sm:$0xff] %v5589_v3  ;;  %v1883_v47 = vadd.f32 %v6584_v36, %v5293_v20  ;;  %v1599_v52 = vrot.slane %v1598_v61, 2  ;;  %v1699_v12 = vsub.f32 %v5489_v58, %v1581_v43 }
 0x239   : > { %v4161_v0 = vpop.eup %4160  ;;  %v2121_v27 = vadd.f32 %v6585_v1, %v5203_v34  ;;  %v1363_v50 = vrot.slane %v1362_v45, 1  ;;  %v1347_v40 = vrot.slane %v1346_v18, 2  ;;  %v1624_v20 = vsel %vm1196_vm2, %v5587_v54, -inf }
 0x23a   : > { %v2390_v4 = vmul.f32 %v4161_v0, %v5220_v25  ;;  %v1884_v57 = vrot.slane %v1883_v47, 1  ;;  %4164 = vpow2.f32 %v1745_v39  ;;  %v1821_v36 = vmul.f32 1.442695, %v1701_v5  ;;  %v1010_v25 = vpop.xlane.xlu0 %1009 }
 0x23b   : > { %v2122_v56 = vrot.slane %v2121_v27, 1  ;;  %v1614_v30 = vmax.f32 %v1612_v62, %v1613_v35  ;;  %v5606_v34 = vadd.f32 %v5403_v49, %v998_v15  ;;  %v2223_v1 = vrot.slane %v2222_v37, 4 }
 0x23c   : > { %2620 = vperm.xlu0 %3937, %v2390_v4   ;;  %v1970_v58 = vsel %vm1196_vm2, %v5589_v3, 0.0  ;;  %v1600_v43 = vmax.f32 %v1598_v61, %v1599_v52  ;;  %v1885_v63 = vadd.f32 %v1884_v57, %v1883_v47  ;;  %v1364_v0 = vmax.f32 %v1362_v45, %v1363_v50 }
 0x23d   : > { %v1625_v53 = vrot.slane %v1624_v20, 4  ;;  %v2123_v7 = vadd.f32 %v2122_v56, %v2121_v27  ;;  %v1337_v2 = vsel %vm1196_vm2, %v5606_v34, -inf  ;;  %v1958_v39 = vadd.f32 %v1957_v24, %v1956_v11 }
 0x23e   : > { %v1817_v5 = vmul.f32 1.442695, %v1699_v12  ;;  %v1348_v4 = vmax.f32 %v1346_v18, %v1347_v40  ;;  %4166 = vrcp.f32 %v1885_v63  ;;  %v1615_v62 = vrot.slane %v1614_v30, 1 }
 0x23f   : > { %4168 = vrcp.f32 %v2123_v7  ;;  %v1338_v35 = vrot.slane %v1337_v2, 4  ;;  %v5613_v15 = vadd.f32 %v5403_v49, %v1010_v25  ;;  %v2224_v61 = vadd.f32 %v2223_v1, %v2222_v37 }
 0x240   : > { %v1971_v47 = vrot.slane %v1970_v58, 4  ;;  %4170 = vpow2.f32 %v1821_v36  ;;  %v1601_v45 = vrot.slane %v1600_v43, 1  ;;  %v1668_v52 = vsub.f32 %v5515_v59, %v1364_v0 }
 0x241   : > { %v1626_v50 = vmax.f32 %v1624_v20, %v1625_v53  ;;  %v1339_v11 = vmax.f32 %v1337_v2, %v1338_v35  ;;  %v1959_v24 = vrot.slane %v1958_v39, 2  ;;  %4172 = vpow2.f32 %v1817_v5 }
 0x242   : > { %v4163_v3 = vpop.eup %4162  ;;  %v1349_v63 = vrot.slane %v1348_v4, 1  ;;  %v1365_v7 = vsel %vm1196_vm2, %v5613_v15, -inf  ;;  %v1616_v18 = vmax.f32 %v1614_v30, %v1615_v62  ;;  %v6586_v37 = vrot.slane %v5345_v48, 2  ;;  %v6587_v62 = vld [vmem:[#allocation10_spill] sm:$0xff] }
 0x243   : > { %v2353_v27 = vmul.f32 %v4163_v3, %v5242_v23  ;;  %v1340_v12 = vrot.slane %v1339_v11, 2  ;;  %v1366_v40 = vrot.slane %v1365_v7, 4  ;;  %v5623_v59 = vadd.f32 %v2202_v60, %v5580_v21  ;;  %v1004_v3 = vpop.xlane.xlu1 %1003 }
 0x244   : > { %v2135_v57 = vadd.f32 %v6586_v37, %v5345_v48  ;;  %v2225_v23 = vrot.slane %v2224_v61, 2  ;;  %v5625_v53 = vadd.f32 %v1971_v47, %v1970_v58  ;;  %v1602_v2 = vmax.f32 %v1600_v43, %v1601_v45  ;;  %v5627_v20 = vpop.eup %4164 }
 0x245   : > { %2435 = vperm.xlu1 %3936, %v2353_v27   ;;  %v1755_v56 = vmul.f32 1.442695, %v1668_v52  ;;  %v1627_v36 = vrot.slane %v1626_v50, 2  ;;  %v1341_v30 = vmax.f32 %v1339_v11, %v1340_v12  ;;  %v1367_v1 = vmax.f32 %v1365_v7, %v1366_v40  ;;  %v6592_v40 = vld [vmem:[#allocation5_spill] sm:$0xff] }
 0x246   : > { %v5629_v25 = vadd.f32 %v1959_v24, %v1958_v39  ;;  %v1350_v0 = vmax.f32 %v1348_v4, %v1349_v63  ;;  %v2136_v5 = vrot.slane %v2135_v57, 1  ;;  %v6588_v48 = vrot.slane %v6587_v62, 2  ;;  %v6590_v63 = vld [vmem:[#allocation11_spill] sm:$0xff] }
 0x247   : > { %v1704_v60 = vsub.f32 %v5537_v13, %v1616_v18  ;;  %v1342_v58 = vrot.slane %v1341_v30, 1  ;;  %v1368_v35 = vrot.slane %v1367_v1, 2  ;;  %v5636_v43 = vadd.f32 %v5403_v49, %v1004_v3  ;;  %v1118_v13 = vpop.xlane.xlu0 %1117  ;;  %v1112_v3 = vpop.xlane.xlu1 %1111 }
 0x248   : > { %v1890_v21 = vadd.f32 %v6588_v48, %v6587_v62  ;;  %v4167_v47 = vpop.eup %4166  ;;  %v5638_v45 = vadd.f32 %v2225_v23, %v2224_v61  ;;  %v1702_v52 = vsub.f32 %v5564_v29, %v1602_v2  ;;  %v2137_v39 = vadd.f32 %v2136_v5, %v2135_v57 }
 0x249   : > { %v4169_v4 = vpop.eup %4168  ;;  %v1973_v11 = vrot.slane %v5625_v53, 2  ;;  %4174 = vpow2.f32 %v1755_v56  ;;  %v1628_v24 = vmax.f32 %v1626_v50, %v1627_v36  ;;  %v2355_v7 = vmul.f32 %v4167_v47, %v6590_v63 }
 0x24a   : > { %6589 = vst [vmem:[#allocation10_spill] sm:$0xff] %v5638_v45  ;;  %v1891_v27 = vrot.slane %v1890_v21, 1  ;;  %v5643_v18 = vpop.eup %4170  ;;  %v1666_v12 = vsub.f32 %v5542_v16, %v1350_v0  ;;  %v2389_v37 = vmul.f32 %v4169_v4, %v6592_v40  ;;  %v1343_v61 = vmax.f32 %v1341_v30, %v1342_v58  ;;  %v6594_v30 = vld [vmem:[#allocation12_spill] sm:$0xff] }
 0x24b   : > { %6591 = vst [vmem:[#allocation11_spill] sm:$0xff] %v5643_v18  ;;  %v1369_v23 = vmax.f32 %v1367_v1, %v1368_v35  ;;  %v1827_v29 = vmul.f32 1.442695, %v1704_v60  ;;  %2445 = vperm.xlu0 %3937, %v2355_v7   ;;  %4176 = vrcp.f32 %v2137_v39  ;;  %v1351_v2 = vsel %vm1196_vm2, %v5636_v43, -inf  ;;  %v5649_v50 = vpop.eup %4172 }
 0x24c   : > { %v1892_v57 = vadd.f32 %v1891_v27, %v1890_v21  ;;  %6593 = vst [vmem:[#allocation5_spill] sm:$0xff] %v5649_v50  ;;  %v1823_v56 = vmul.f32 1.442695, %v1702_v52  ;;  %2615 = vperm.xlu1 %3936, %v2389_v37   ;;  %v1352_v5 = vrot.slane %v1351_v2, 4  ;;  %v5652_v16 = vadd.f32 %v5403_v49, %v1118_v13  ;;  %v1019_v13 = vpop.xlane.xlu0 %1018 }
 0x24d   : > { %v1370_v36 = vrot.slane %v1369_v23, 1  ;;  %v1629_v0 = vrot.slane %v1628_v24, 1  ;;  %v6595_v1 = vrot.slane %v6594_v30, 2  ;;  %v5658_v48 = vadd.f32 %v5403_v49, %v1112_v3 }
 0x24e   : > { %4178 = vrcp.f32 %v1892_v57  ;;  %v1665_v21 = vsub.f32 %v5606_v34, %v1343_v61  ;;  %v1353_v58 = vmax.f32 %v1351_v2, %v1352_v5  ;;  %v1617_v35 = vsel %vm1196_vm2, %v5652_v16, -inf }
 0x24f   : > { %v2142_v62 = vadd.f32 %v6595_v1, %v6594_v30  ;;  %v1371_v60 = vmax.f32 %v1369_v23, %v1370_v36  ;;  %v1963_v47 = vsel %vm1196_vm2, %v5627_v20, 0.0  ;;  %v1751_v52 = vmul.f32 1.442695, %v1666_v12 }
 0x250   : > { %v1618_v39 = vrot.slane %v1617_v35, 4  ;;  %v2229_v4 = vsel %vm1196_vm2, %v5643_v18, 0.0  ;;  %v2215_v63 = vsel %vm1196_vm2, %v5649_v50, 0.0  ;;  %v1354_v34 = vrot.slane %v1353_v58, 2 }
 0x251   : > { %v2143_v27 = vrot.slane %v2142_v62, 1  ;;  %v1669_v7 = vsub.f32 %v5613_v15, %v1371_v60  ;;  %4180 = vpow2.f32 %v1827_v29  ;;  %v1603_v61 = vsel %vm1196_vm2, %v5658_v48, -inf }
 0x252   : > { %v1619_v40 = vmax.f32 %v1617_v35, %v1618_v39  ;;  %4182 = vpow2.f32 %v1823_v56  ;;  %v1630_v12 = vmax.f32 %v1628_v24, %v1629_v0  ;;  %v1749_v23 = vmul.f32 1.442695, %v1665_v21 }
 0x253   : > { %v2144_v37 = vadd.f32 %v2143_v27, %v2142_v62  ;;  %v1355_v3 = vmax.f32 %v1353_v58, %v1354_v34  ;;  %v5672_v57 = vpop.eup %4174  ;;  %v5675_v36 = vadd.f32 %v5403_v49, %v1019_v13  ;;  %v6597_v15 = vrot.slane %v5423_v8, 2  ;;  %v6598_v58 = vld [vmem:[#allocation16_spill] sm:$0xff] }
 0x254   : > { %6596 = vst [vmem:[#allocation12_spill] sm:$0xff] %v5672_v57  ;;  %v1620_v2 = vrot.slane %v1619_v40, 2  ;;  %v1964_v5 = vrot.slane %v1963_v47, 4  ;;  %v2230_v30 = vrot.slane %v2229_v4, 4  ;;  %v1757_v1 = vmul.f32 1.442695, %v1669_v7 }
 0x255   : > { %4184 = vrcp.f32 %v2144_v37  ;;  %v2163_v29 = vadd.f32 %v6597_v15, %v5423_v8  ;;  %v1604_v62 = vrot.slane %v1603_v61, 4  ;;  %v4177_v60 = vpop.eup %4176  ;;  %v2216_v56 = vrot.slane %v2215_v63, 4 }
 0x256   : > { %4186 = vpow2.f32 %v1751_v52  ;;  %v1386_v24 = vsel %vm1196_vm2, %v5675_v36, -inf  ;;  %v5683_v21 = vadd.f32 %v1973_v11, %v5625_v53  ;;  %v2391_v35 = vmul.f32 %v4177_v60, %v6598_v58  ;;  %v6599_v52 = vld [vmem:[#allocation6_spill] sm:$0xff] }
 0x257   : > { %v2164_v0 = vrot.slane %v2163_v29, 1  ;;  %4188 = vpow2.f32 %v1749_v23  ;;  %v1621_v39 = vmax.f32 %v1619_v40, %v1620_v2  ;;  %v1998_v8 = vsel %vm1196_vm2, %v5672_v57, 0.0 }
 0x258   : > { %v4179_v27 = vpop.eup %4178  ;;  %v1706_v7 = vsub.f32 %v5587_v54, %v1630_v12  ;;  %v1356_v34 = vrot.slane %v1355_v3, 1  ;;  %4190 = vpow2.f32 %v1757_v1  ;;  %2625 = vperm.xlu0 %3937, %v2391_v35   ;;  %v1605_v15 = vmax.f32 %v1603_v61, %v1604_v62  ;;  %v6600_v54 = vld [vmem:[#allocation13_spill] sm:$0xff] }
 0x259   : > { %v2165_v13 = vadd.f32 %v2164_v0, %v2163_v29  ;;  %v2356_v37 = vmul.f32 %v4179_v27, %v6599_v52  ;;  %v1387_v50 = vrot.slane %v1386_v24, 4  ;;  %v5690_v53 = vadd.f32 %v1964_v5, %v1963_v47 }
 0x25a   : > { %v2231_v11 = vadd.f32 %v2230_v30, %v2229_v4  ;;  %v2217_v23 = vadd.f32 %v2216_v56, %v2215_v63  ;;  %v1622_v60 = vrot.slane %v1621_v39, 1  ;;  %v6601_v12 = vrot.slane %v6600_v54, 2 }
 0x25b   : > { %4192 = vrcp.f32 %v2165_v13  ;;  %2450 = vperm.xlu1 %3936, %v2356_v37   ;;  %v5697_v1 = vpop.eup %4180  ;;  %v1999_v62 = vrot.slane %v1998_v8, 4  ;;  %v1831_v47 = vmul.f32 1.442695, %v1706_v7  ;;  %v1357_v5 = vmax.f32 %v1355_v3, %v1356_v34  ;;  %v1013_v37 = vpop.xlane.xlu1 %1012  ;;  %v6604_v34 = vld [vmem:[#allocation7_spill] sm:$0xff] }
 0x25c   : > { %v1904_v29 = vadd.f32 %v6601_v12, %v6600_v54  ;;  %6602 = vst [vmem:[#allocation16_spill] sm:$0xff] %v5697_v1  ;;  %v5700_v4 = vpop.eup %4182  ;;  %v1606_v30 = vrot.slane %v1605_v15, 2  ;;  %v1388_v56 = vmax.f32 %v1386_v24, %v1387_v50  ;;  %v2232_v13 = vrot.slane %v2231_v11, 2  ;;  %v1124_v54 = vpop.xlane.xlu0 %1123 }
 0x25d   : > { %6603 = vst [vmem:[#allocation6_spill] sm:$0xff] %v5700_v4  ;;  %v2218_v52 = vrot.slane %v2217_v23, 2  ;;  %v2250_v7 = vsel %vm1196_vm2, %v5697_v1, 0.0  ;;  %v1623_v3 = vmax.f32 %v1621_v39, %v1622_v60  ;;  %v2000_v50 = vadd.f32 %v1999_v62, %v1998_v8 }
 0x25e   : > { %v1905_v0 = vrot.slane %v1904_v29, 1  ;;  %v2236_v24 = vsel %vm1196_vm2, %v5700_v4, 0.0  ;;  %4194 = vpow2.f32 %v1831_v47  ;;  %v1667_v35 = vsub.f32 %v5636_v43, %v1357_v5  ;;  %v6611_v5 = vld [vmem:[#allocation15_spill] sm:$0xff] }
 0x25f   : > { %v4185_v58 = vpop.eup %4184  ;;  %v1607_v27 = vmax.f32 %v1605_v15, %v1606_v30  ;;  %v1389_v2 = vrot.slane %v1388_v56, 2  ;;  %v5716_v39 = vadd.f32 %v5403_v49, %v1013_v37  ;;  %v5718_v60 = vadd.f32 %v2232_v13, %v2231_v11 }
 0x260   : > { %v2392_v12 = vmul.f32 %v4185_v58, %v6604_v34  ;;  %v1906_v61 = vadd.f32 %v1905_v0, %v1904_v29  ;;  %v5708_v63 = vpop.eup %4186  ;;  %v5720_v29 = vadd.f32 %v2218_v52, %v2217_v23  ;;  %v2251_v8 = vrot.slane %v2250_v7, 4 }
 0x261   : > { %6605 = vst [vmem:[#allocation13_spill] sm:$0xff] %v5708_v63  ;;  %v5713_v40 = vpop.eup %4188  ;;  %6607 = vst [vmem:[#allocation32_spill] sm:$0xff] %v5718_v60  ;;  %v6609_v62 = vrot.slane %v5483_v17, 2  ;;  %v1984_v43 = vsel %vm1196_vm2, %v5708_v63, 0.0  ;;  %v2237_v15 = vrot.slane %v2236_v24, 4  ;;  %v6612_v30 = vrot.slane %v6611_v5, 2 }
 0x262   : > { %6606 = vst [vmem:[#allocation7_spill] sm:$0xff] %v5713_v40  ;;  %2630 = vperm.xlu1 %3936, %v2392_v12   ;;  %4196 = vrcp.f32 %v1906_v61  ;;  %6608 = vst [vmem:[#allocation33_spill] sm:$0xff] %v5720_v29  ;;  %v5725_v0 = vpop.eup %4190  ;;  %v1705_v61 = vsub.f32 %v5652_v16, %v1623_v3  ;;  %v2001_v23 = vrot.slane %v2000_v50, 2  ;;  %v1977_v13 = vsel %vm1196_vm2, %v5713_v40, 0.0 }
 0x263   : > { %v2177_v47 = vadd.f32 %v6609_v62, %v5483_v17  ;;  %6610 = vst [vmem:[#allocation34_spill] sm:$0xff] %v5725_v0  ;;  %v2156_v11 = vadd.f32 %v6612_v30, %v6611_v5  ;;  %v1753_v52 = vmul.f32 1.442695, %v1667_v35  ;;  %v1025_v17 = vpop.xlane.xlu0 %1024  ;;  %v1608_v34 = vrot.slane %v1607_v27, 1 }
 0x264   : > { %v1390_v12 = vmax.f32 %v1388_v56, %v1389_v2  ;;  %v1372_v1 = vsel %vm1196_vm2, %v5716_v39, -inf  ;;  %v2252_v16 = vadd.f32 %v2251_v8, %v2250_v7  ;;  %v5739_v3 = vadd.f32 %v5403_v49, %v1124_v54 }
 0x265   : > { %v4193_v58 = vpop.eup %4192  ;;  %v2178_v37 = vrot.slane %v2177_v47, 1  ;;  %v2157_v30 = vrot.slane %v2156_v11, 1  ;;  %v2238_v57 = vadd.f32 %v2237_v15, %v2236_v24  ;;  %v2005_v18 = vsel %vm1196_vm2, %v5725_v0, 0.0 }
 0x266   : > { %v2395_v62 = vmul.f32 %v4193_v58, %v5379_v32  ;;  %v1829_v35 = vmul.f32 1.442695, %v1705_v61  ;;  %v5744_v45 = vadd.f32 %v5403_v49, %v1025_v17  ;;  %v1978_v2 = vrot.slane %v1977_v13, 4 }
 0x267   : > { %v2179_v5 = vadd.f32 %v2178_v37, %v2177_v47  ;;  %4198 = vpow2.f32 %v1753_v52  ;;  %v1373_v32 = vrot.slane %v1372_v1, 4  ;;  %v2158_v56 = vadd.f32 %v2157_v30, %v2156_v11 }
 0x268   : > { %2645 = vperm.xlu0 %3937, %v2395_v62   ;;  %v1985_v58 = vrot.slane %v1984_v43, 4  ;;  %v1609_v7 = vmax.f32 %v1607_v27, %v1608_v34  ;;  %v1391_v8 = vrot.slane %v1390_v12, 1  ;;  %v5746_v54 = vpop.eup %4194  ;;  %v2006_v47 = vrot.slane %v2005_v18, 4  ;;  %v6615_v27 = vld [vmem:[#allocation8_spill] sm:$0xff] }
 0x269   : > { %4200 = vrcp.f32 %v2179_v5  ;;  %6613 = vst [vmem:[#allocation15_spill] sm:$0xff] %v5746_v54  ;;  %v1631_v24 = vsel %vm1196_vm2, %v5739_v3, -inf  ;;  %v1400_v15 = vsel %vm1196_vm2, %v5744_v45, -inf  ;;  %v5752_v37 = vadd.f32 %v2001_v23, %v2000_v50 }
 0x26a   : > { %4202 = vrcp.f32 %v2158_v56  ;;  %v2253_v52 = vrot.slane %v2252_v16, 2  ;;  %v2239_v17 = vrot.slane %v2238_v57, 2  ;;  %v1979_v11 = vadd.f32 %v1978_v2, %v1977_v13  ;;  %v1127_v2 = vpop.xlane.xlu1 %1126 }
 0x26b   : > { %6614 = vst [vmem:[#allocation35_spill] sm:$0xff] %v5752_v37  ;;  %4204 = vpow2.f32 %v1829_v35  ;;  %v1374_v62 = vmax.f32 %v1372_v1, %v1373_v32  ;;  %v1401_v5 = vrot.slane %v1400_v15, 4  ;;  %v2264_v30 = vsel %vm1196_vm2, %v5746_v54, 0.0 }
 0x26c   : > { %v4197_v61 = vpop.eup %4196  ;;  %v1703_v0 = vsub.f32 %v5658_v48, %v1609_v7  ;;  %v1632_v56 = vrot.slane %v1631_v24, 4  ;;  %v6616_v40 = vrot.slane %v5493_v41, 2  ;;  %v5762_v23 = vadd.f32 %v1985_v58, %v1984_v43 }
 0x26d   : > { %v2358_v34 = vmul.f32 %v4197_v61, %v6615_v27  ;;  %v2007_v35 = vadd.f32 %v2006_v47, %v2005_v18  ;;  %v1392_v13 = vmax.f32 %v1390_v12, %v1391_v8  ;;  %v5765_v32 = vadd.f32 %v2253_v52, %v2252_v16 }
 0x26e   : > { %v1939_v4 = vadd.f32 %v6616_v40, %v5493_v41  ;;  %v1402_v61 = vmax.f32 %v1400_v15, %v1401_v5  ;;  %v6618_v48 = vrot.slane %v5354_v38, 2  ;;  %v5770_v27 = vadd.f32 %v2239_v17, %v2238_v57  ;;  %v1016_v43 = vpop.xlane.xlu1 %1015  ;;  %v1022_v57 = vpop.xlane.xlu0 %1021 }
 0x26f   : > { %2460 = vperm.xlu1 %3936, %v2358_v34   ;;  %6617 = vst [vmem:[#allocation8_spill] sm:$0xff] %v5765_v32  ;;  %v2265_v41 = vrot.slane %v2264_v30, 4  ;;  %v1980_v40 = vrot.slane %v1979_v11, 2  ;;  %v1375_v50 = vrot.slane %v1374_v62, 2  ;;  %v1825_v18 = vmul.f32 1.442695, %v1703_v0 }
 0x270   : > { %v1897_v7 = vadd.f32 %v6618_v48, %v5354_v38  ;;  %v1633_v12 = vmax.f32 %v1631_v24, %v1632_v56  ;;  %v1940_v58 = vrot.slane %v1939_v4, 1  ;;  %v2008_v47 = vrot.slane %v2007_v35, 2 }
 0x271   : > { %v5773_v8 = vpop.eup %4198  ;;  %v1672_v15 = vsub.f32 %v5675_v36, %v1392_v13  ;;  %v5778_v52 = vadd.f32 %v5403_v49, %v1127_v2  ;;  %v1403_v17 = vrot.slane %v1402_v61, 2  ;;  %v5782_v24 = vadd.f32 %v2265_v41, %v2264_v30  ;;  %v6621_v13 = vld [vmem:[#allocation9_spill] sm:$0xff] }
 0x272   : > { %6619 = vst [vmem:[#allocation36_spill] sm:$0xff] %v5773_v8  ;;  %v1941_v34 = vadd.f32 %v1940_v58, %v1939_v4  ;;  %v1898_v5 = vrot.slane %v1897_v7, 1  ;;  %v5784_v56 = vadd.f32 %v1980_v40, %v1979_v11  ;;  %v1376_v1 = vmax.f32 %v1374_v62, %v1375_v50 }
 0x273   : > { %v4201_v38 = vpop.eup %4200  ;;  %4206 = vpow2.f32 %v1825_v18  ;;  %v1634_v49 = vrot.slane %v1633_v12, 2  ;;  %v5790_v4 = vadd.f32 %v2008_v47, %v2007_v35  ;;  %v1763_v58 = vmul.f32 1.442695, %v1672_v15 }
 0x274   : > { %v4203_v48 = vpop.eup %4202  ;;  %v2397_v36 = vmul.f32 %v4201_v38, %v5395_v28  ;;  %v1638_v30 = vsel %vm1196_vm2, %v5778_v52, -inf  ;;  %v1899_v41 = vadd.f32 %v1898_v5, %v1897_v7  ;;  %v1991_v11 = vsel %vm1196_vm2, %v5773_v8, 0.0  ;;  %v5799_v28 = vld [vmem:[%s6487_s1 + $0x50] ss:$0 sm:$0xff] }
 0x275   : > { %v5786_v16 = vpop.eup %4204  ;;  %v2394_v2 = vmul.f32 %v4203_v48, %v6621_v13  ;;  %v1404_v62 = vmax.f32 %v1402_v61, %v1403_v17  ;;  %4208 = vrcp.f32 %v1941_v34  ;;  %v5802_v50 = vadd.f32 %v5799_v28, %v1016_v43  ;;  %v1031_v13 = vpop.xlane.xlu0 %1030 }
 0x276   : > { %6620 = vst [vmem:[#allocation37_spill] sm:$0xff] %v5786_v16  ;;  %2655 = vperm.xlu0 %3937, %v2397_v36   ;;  %v2257_v35 = vsel %vm1196_vm2, %v5786_v16, 0.0  ;;  %v1377_v40 = vrot.slane %v1376_v1, 1  ;;  %4210 = vrcp.f32 %v1899_v41  ;;  %v5807_v7 = vadd.f32 %v5799_v28, %v1022_v57  ;;  %v1028_v36 = vpop.xlane.xlu1 %1027 }
 0x277   : > { %2640 = vperm.xlu1 %3936, %v2394_v2   ;;  %v1635_v18 = vmax.f32 %v1633_v12, %v1634_v49  ;;  %v1639_v47 = vrot.slane %v1638_v30, 4  ;;  %v1379_v61 = vsel %vm1196_vm2, %v5802_v50, -inf  ;;  %v6622_v15 = vrot.slane %v5539_v9, 2 }
 0x278   : > { %4212 = vpow2.f32 %v1763_v58  ;;  %v1380_v43 = vrot.slane %v1379_v61, 4  ;;  %v1393_v17 = vsel %vm1196_vm2, %v5807_v7, -inf  ;;  %v6623_v34 = vrot.slane %v5330_v55, 2 }
 0x279   : > { %v2191_v38 = vadd.f32 %v6622_v15, %v5539_v9  ;;  %v1992_v57 = vrot.slane %v1991_v11, 4  ;;  %v1405_v48 = vrot.slane %v1404_v62, 1  ;;  %v1394_v12 = vrot.slane %v1393_v17, 4 }
 0x27a   : > { %v2149_v5 = vadd.f32 %v6623_v34, %v5330_v55  ;;  %v2258_v2 = vrot.slane %v2257_v35, 4  ;;  %v1378_v41 = vmax.f32 %v1376_v1, %v1377_v40  ;;  %v1381_v0 = vmax.f32 %v1379_v61, %v1380_v43 }
 0x27b   : > { %v2192_v49 = vrot.slane %v2191_v38, 1  ;;  %v1636_v9 = vrot.slane %v1635_v18, 1  ;;  %v1640_v58 = vmax.f32 %v1638_v30, %v1639_v47  ;;  %v1395_v15 = vmax.f32 %v1393_v17, %v1394_v12 }
 0x27c   : > { %v2150_v54 = vrot.slane %v2149_v5, 1  ;;  %v1382_v29 = vrot.slane %v1381_v0, 2  ;;  %v5820_v32 = vadd.f32 %v5799_v28, %v1028_v36  ;;  %v5823_v55 = vadd.f32 %v5799_v28, %v1031_v13 }
 0x27d   : > { %v2193_v16 = vadd.f32 %v2192_v49, %v2191_v38  ;;  %v5825_v34 = vpop.eup %4206  ;;  %v1993_v37 = vadd.f32 %v1992_v57, %v1991_v11  ;;  %v1406_v63 = vmax.f32 %v1404_v62, %v1405_v48  ;;  %v1396_v60 = vrot.slane %v1395_v15, 2  ;;  %v6625_v48 = vld [vmem:[#allocation18_spill] sm:$0xff] }
 0x27e   : > { %v2151_v8 = vadd.f32 %v2150_v54, %v2149_v5  ;;  %v1407_v1 = vsel %vm1196_vm2, %v5820_v32, -inf  ;;  %v1414_v30 = vsel %vm1196_vm2, %v5823_v55, -inf  ;;  %v6624_v54 = vrot.slane %v5549_v51, 2 }
 0x27f   : > { %4214 = vrcp.f32 %v2193_v16  ;;  %v4209_v47 = vpop.eup %4208  ;;  %v2259_v61 = vadd.f32 %v2258_v2, %v2257_v35  ;;  %v1670_v38 = vsub.f32 %v5716_v39, %v1378_v41  ;;  %v1383_v43 = vmax.f32 %v1381_v0, %v1382_v29 }
 0x280   : > { %4216 = vrcp.f32 %v2151_v8  ;;  %v2212_v40 = vadd.f32 %v6624_v54, %v5549_v51  ;;  %v1408_v11 = vrot.slane %v1407_v1, 4  ;;  %v4211_v62 = vpop.eup %4210  ;;  %v1637_v17 = vmax.f32 %v1635_v18, %v1636_v9  ;;  %v1034_v51 = vpop.xlane.xlu1 %1033 }
 0x281   : > { %v1641_v16 = vrot.slane %v1640_v58, 2  ;;  %v2363_v8 = vmul.f32 %v4209_v47, %v5451_v10  ;;  %v1397_v5 = vmax.f32 %v1395_v15, %v1396_v60  ;;  %v1674_v57 = vsub.f32 %v5744_v45, %v1406_v63 }
 0x282   : > { %v2357_v12 = vmul.f32 %v4211_v62, %v6625_v48  ;;  %v1409_v49 = vmax.f32 %v1407_v1, %v1408_v11  ;;  %v1415_v36 = vrot.slane %v1414_v30, 4  ;;  %v5838_v13 = vpop.eup %4212  ;;  %v1982_v39 = vrot.slane %v5784_v56, 1 }
 0x283   : > { %v1994_v29 = vrot.slane %v1993_v37, 2  ;;  %2485 = vperm.xlu0 %3937, %v2363_v8   ;;  %v2213_v0 = vrot.slane %v2212_v40, 1  ;;  %v2243_v35 = vsel %vm1196_vm2, %v5825_v34, 0.0  ;;  %v1759_v10 = vmul.f32 1.442695, %v1670_v38 }
 0x284   : > { %2455 = vperm.xlu1 %3936, %v2357_v12   ;;  %v1384_v60 = vrot.slane %v1383_v43, 1  ;;  %v1410_v45 = vrot.slane %v1409_v49, 2  ;;  %v2010_v63 = vrot.slane %v5790_v4, 1  ;;  %v2260_v18 = vrot.slane %v2259_v61, 2 }
 0x285   : > { %v1642_v2 = vmax.f32 %v1640_v58, %v1641_v16  ;;  %v1398_v41 = vrot.slane %v1397_v5, 1  ;;  %v1707_v9 = vsub.f32 %v5739_v3, %v1637_v17  ;;  %v1767_v15 = vmul.f32 1.442695, %v1674_v57  ;;  %v1037_v3 = vpop.xlane.xlu0 %1036 }
 0x286   : > { %v1411_v1 = vmax.f32 %v1409_v49, %v1410_v45  ;;  %v1416_v54 = vmax.f32 %v1414_v30, %v1415_v36  ;;  %v5846_v47 = vadd.f32 %v1994_v29, %v1993_v37  ;;  %v2244_v11 = vrot.slane %v2243_v35, 4  ;;  %v6627_v36 = vld [vmem:[#allocation14_spill] sm:$0xff] }
 0x287   : > { %v2214_v62 = vadd.f32 %v2213_v0, %v2212_v40  ;;  %v6626_v38 = vrot.slane %v5347_v14, 2  ;;  %v2026_v12 = vsel %vm1196_vm2, %v5838_v13, 0.0  ;;  %4218 = vpow2.f32 %v1759_v10 }
 0x288   : > { %v1385_v58 = vmax.f32 %v1383_v43, %v1384_v60  ;;  %v1412_v16 = vrot.slane %v1411_v1, 1  ;;  %v5853_v57 = vadd.f32 %v2260_v18, %v2259_v61  ;;  %v1643_v37 = vrot.slane %v1642_v2, 1 }
 0x289   : > { %v1918_v8 = vadd.f32 %v6626_v38, %v5347_v14  ;;  %v4215_v48 = vpop.eup %4214  ;;  %v1399_v30 = vmax.f32 %v1397_v5, %v1398_v41  ;;  %v1833_v49 = vmul.f32 1.442695, %v1707_v9  ;;  %4220 = vpow2.f32 %v1767_v15 }
 0x28a   : > { %v4217_v17 = vpop.eup %4216  ;;  %v2399_v40 = vmul.f32 %v4215_v48, %v5469_v33  ;;  %v1417_v29 = vrot.slane %v1416_v54, 2  ;;  %v2027_v0 = vrot.slane %v2026_v12, 4  ;;  %v1413_v45 = vmax.f32 %v1411_v1, %v1412_v16  ;;  %v1040_v1 = vpop.xlane.xlu1 %1039 }
 0x28b   : > { %v2393_v14 = vmul.f32 %v4217_v17, %v6627_v36  ;;  %4222 = vrcp.f32 %v2214_v62  ;;  %v1919_v43 = vrot.slane %v1918_v8, 1  ;;  %v5857_v10 = vadd.f32 %v2244_v11, %v2243_v35  ;;  %v1043_v11 = vpop.xlane.xlu0 %1042 }
 0x28c   : > { %2665 = vperm.xlu0 %3937, %v2399_v40   ;;  %v1671_v60 = vsub.f32 %v5802_v50, %v1385_v58  ;;  %v5861_v61 = vadd.f32 %v5799_v28, %v1034_v51  ;;  %v5864_v33 = vadd.f32 %v5799_v28, %v1037_v3  ;;  %v1644_v5 = vmax.f32 %v1642_v2, %v1643_v37 }
 0x28d   : > { %2635 = vperm.xlu1 %3936, %v2393_v14   ;;  %v1673_v18 = vsub.f32 %v5807_v7, %v1399_v30  ;;  %v1920_v41 = vadd.f32 %v1919_v43, %v1918_v8  ;;  %v6628_v9 = vrot.slane %v5561_v31, 2  ;;  %4224 = vpow2.f32 %v1833_v49 }
 0x28e   : > { %v1418_v35 = vmax.f32 %v1416_v54, %v1417_v29  ;;  %v1421_v50 = vsel %vm1196_vm2, %v5861_v61, -inf  ;;  %v1428_v51 = vsel %vm1196_vm2, %v5864_v33, -inf  ;;  %v5874_v62 = vadd.f32 %v2027_v0, %v2026_v12 }
 0x28f   : > { %v1953_v15 = vadd.f32 %v6628_v9, %v5561_v31  ;;  %v1675_v2 = vsub.f32 %v5820_v32, %v1413_v45  ;;  %4226 = vrcp.f32 %v1920_v41  ;;  %v1422_v7 = vrot.slane %v1421_v50, 4  ;;  %v6629_v31 = vld [vmem:[#allocation20_spill] sm:$0xff] }
 0x290   : > { %v1761_v38 = vmul.f32 1.442695, %v1671_v60  ;;  %v1429_v8 = vrot.slane %v1428_v51, 4  ;;  %v6630_v54 = vrot.slane %v6629_v31, 2  ;;  %v1765_v16 = vmul.f32 1.442695, %v1673_v18 }
 0x291   : > { %v1954_v48 = vrot.slane %v1953_v15, 1  ;;  %v1423_v3 = vmax.f32 %v1421_v50, %v1422_v7  ;;  %v5881_v17 = vadd.f32 %v5799_v28, %v1040_v1  ;;  %v5884_v37 = vadd.f32 %v5799_v28, %v1043_v11  ;;  %v5886_v12 = vpop.eup %4218 }
 0x292   : > { %v2170_v58 = vadd.f32 %v6630_v54, %v6629_v31  ;;  %v1419_v32 = vrot.slane %v1418_v35, 1  ;;  %v1430_v30 = vmax.f32 %v1428_v51, %v1429_v8  ;;  %v1769_v36 = vmul.f32 1.442695, %v1675_v2 }
 0x293   : > { %v1955_v40 = vadd.f32 %v1954_v48, %v1953_v15  ;;  %v1424_v14 = vrot.slane %v1423_v3, 2  ;;  %v1435_v29 = vsel %vm1196_vm2, %v5881_v17, -inf  ;;  %v1442_v0 = vsel %vm1196_vm2, %v5884_v37, -inf  ;;  %v5892_v45 = vpop.eup %4220 }
 0x294   : > { %v2171_v49 = vrot.slane %v2170_v58, 1  ;;  %v1431_v43 = vrot.slane %v1430_v30, 2  ;;  %v6631_v60 = vrot.slane %v5623_v59, 2  ;;  %v1708_v9 = vsub.f32 %v5778_v52, %v1644_v5 }
 0x295   : > { %4228 = vrcp.f32 %v1955_v40  ;;  %v4223_v41 = vpop.eup %4222  ;;  %v1425_v15 = vmax.f32 %v1423_v3, %v1424_v14  ;;  %v1436_v50 = vrot.slane %v1435_v29, 4  ;;  %v1420_v51 = vmax.f32 %v1418_v35, %v1419_v32  ;;  %v6632_v32 = vld [vmem:[#allocation17_spill] sm:$0xff] }
 0x296   : > { %v2172_v28 = vadd.f32 %v2171_v49, %v2170_v58  ;;  %v2205_v18 = vadd.f32 %v6631_v60, %v5623_v59  ;;  %4230 = vpow2.f32 %v1761_v38  ;;  %v2402_v1 = vmul.f32 %v4223_v41, %v5509_v26 }
 0x297   : > { %v1432_v11 = vmax.f32 %v1430_v30, %v1431_v43  ;;  %v1426_v2 = vrot.slane %v1425_v15, 1  ;;  %v1437_v7 = vmax.f32 %v1435_v29, %v1436_v50  ;;  %v1443_v8 = vrot.slane %v1442_v0, 4  ;;  %v5899_v48 = vpop.eup %4224 }
 0x298   : > { %4232 = vrcp.f32 %v2172_v28  ;;  %v2012_v59 = vsel %vm1196_vm2, %v5886_v12, 0.0  ;;  %v2040_v52 = vsel %vm1196_vm2, %v5892_v45, 0.0  ;;  %2680 = vperm.xlu0 %3937, %v2402_v1   ;;  %v2206_v5 = vrot.slane %v2205_v18, 1 }
 0x299   : > { %4234 = vpow2.f32 %v1769_v36  ;;  %v4227_v35 = vpop.eup %4226  ;;  %v1427_v38 = vmax.f32 %v1425_v15, %v1426_v2  ;;  %v1433_v26 = vrot.slane %v1432_v11, 1  ;;  %v1438_v31 = vrot.slane %v1437_v7, 2 }
 0x29a   : > { %4236 = vpow2.f32 %v1765_v16  ;;  %v1444_v54 = vmax.f32 %v1442_v0, %v1443_v8  ;;  %v1835_v58 = vmul.f32 1.442695, %v1708_v9  ;;  %v1676_v3 = vsub.f32 %v5823_v55, %v1420_v51 }
 0x29b   : > { %v2360_v30 = vmul.f32 %v4227_v35, %v6632_v32  ;;  %v2207_v40 = vadd.f32 %v2206_v5, %v2205_v18  ;;  %v2013_v49 = vrot.slane %v2012_v59, 4  ;;  %v1677_v36 = vsub.f32 %v5861_v61, %v1427_v38 }
 0x29c   : > { %v1439_v14 = vmax.f32 %v1437_v7, %v1438_v31  ;;  %v1445_v29 = vrot.slane %v1444_v54, 2  ;;  %v1996_v16 = vrot.slane %v5846_v47, 1  ;;  %v2041_v43 = vrot.slane %v2040_v52, 4 }
 0x29d   : > { %2470 = vperm.xlu1 %3936, %v2360_v30   ;;  %4238 = vrcp.f32 %v2207_v40  ;;  %v6633_v28 = vrot.slane %v5460_v22, 2  ;;  %v2262_v60 = vrot.slane %v5853_v57, 1  ;;  %v2246_v55 = vrot.slane %v5857_v10, 2 }
 0x29e   : > { %v1773_v41 = vmul.f32 1.442695, %v1677_v36  ;;  %v1434_v18 = vmax.f32 %v1432_v11, %v1433_v26  ;;  %v2029_v61 = vrot.slane %v5874_v62, 2  ;;  %4240 = vpow2.f32 %v1835_v58 }
 0x29f   : > { %v1911_v0 = vadd.f32 %v6633_v28, %v5460_v22  ;;  %v4229_v9 = vpop.eup %4228  ;;  %v1771_v15 = vmul.f32 1.442695, %v1676_v3  ;;  %v1440_v50 = vrot.slane %v1439_v14, 1  ;;  %v5917_v1 = vadd.f32 %v2013_v49, %v2012_v59  ;;  %v6634_v59 = vld [vmem:[#allocation19_spill] sm:$0xff] }
 0x2a0   : > { %v5915_v51 = vpop.eup %4230  ;;  %4242 = vpow2.f32 %v1773_v41  ;;  %v2365_v2 = vmul.f32 %v4229_v9, %v5520_v42  ;;  %v1446_v22 = vmax.f32 %v1444_v54, %v1445_v29  ;;  %v5922_v8 = vsel %vm1196_vm2, %v5899_v48, 0.0 }
 0x2a1   : > { %v5924_v11 = vadd.f32 %v2041_v43, %v2040_v52  ;;  %v1441_v5 = vmax.f32 %v1439_v14, %v1440_v50  ;;  %v1912_v35 = vrot.slane %v1911_v0, 1  ;;  %v1678_v26 = vsub.f32 %v5864_v33, %v1434_v18 }
 0x2a2   : > { %v4233_v7 = vpop.eup %4232  ;;  %2495 = vperm.xlu0 %3937, %v2365_v2   ;;  %v1447_v58 = vrot.slane %v1446_v22, 1  ;;  %v6635_v42 = vrot.slane %v5491_v19, 2  ;;  %4244 = vpow2.f32 %v1771_v15  ;;  %v6636_v30 = vrot.slane %v5690_v53, 2 }
 0x2a3   : > { %v5926_v38 = vpop.eup %4234  ;;  %v2396_v31 = vmul.f32 %v4233_v7, %v6634_v59  ;;  %v1679_v52 = vsub.f32 %v5881_v17, %v1441_v5  ;;  %v1913_v32 = vadd.f32 %v1912_v35, %v1911_v0  ;;  %v2019_v33 = vsel %vm1196_vm2, %v5915_v51, 0.0  ;;  %v6638_v35 = vld [vmem:[#allocation27_spill] sm:$0xff] }
 0x2a4   : > { %v1932_v54 = vadd.f32 %v6635_v42, %v5491_v19  ;;  %v5933_v3 = vpop.eup %4236  ;;  %v1967_v40 = vadd.f32 %v6636_v30, %v5690_v53  ;;  %v1448_v49 = vmax.f32 %v1446_v22, %v1447_v58  ;;  %v6637_v14 = vrot.slane %v5518_v46, 2 }
 0x2a5   : > { %2650 = vperm.xlu1 %3936, %v2396_v31   ;;  %v2047_v29 = vsel %vm1196_vm2, %v5926_v38, 0.0  ;;  %v1777_v43 = vmul.f32 1.442695, %v1679_v52  ;;  %4246 = vrcp.f32 %v1913_v32  ;;  %v1775_v28 = vmul.f32 1.442695, %v1678_v26 }
 0x2a6   : > { %v1933_v36 = vrot.slane %v1932_v54, 1  ;;  %v2184_v19 = vadd.f32 %v6637_v14, %v5518_v46  ;;  %v1968_v17 = vrot.slane %v1967_v40, 1  ;;  %v1680_v0 = vsub.f32 %v5884_v37, %v1448_v49 }
 0x2a7   : > { %v4239_v18 = vpop.eup %4238  ;;  %v2020_v9 = vrot.slane %v2019_v33, 4  ;;  %v2033_v15 = vsel %vm1196_vm2, %v5933_v3, 0.0  ;;  %4248 = vpow2.f32 %v1777_v43  ;;  %v2048_v5 = vrot.slane %v2047_v29, 4 }
 0x2a8   : > { %v1934_v53 = vadd.f32 %v1933_v36, %v1932_v54  ;;  %v2185_v41 = vrot.slane %v2184_v19, 1  ;;  %v1969_v50 = vadd.f32 %v1968_v17, %v1967_v40  ;;  %v1779_v2 = vmul.f32 1.442695, %v1680_v0  ;;  %v5950_v7 = vpop.eup %4240 }
 0x2a9   : > { %v2401_v46 = vmul.f32 %v4239_v18, %v5558_v6  ;;  %v6639_v37 = vrot.slane %v6638_v35, 1  ;;  %v6640_v59 = vrot.slane %v5762_v23, 2  ;;  %v5961_v42 = vadd.f32 %v2246_v55, %v5857_v10 }
 0x2aa   : > { %4250 = vrcp.f32 %v1934_v53  ;;  %v2186_v22 = vadd.f32 %v2185_v41, %v2184_v19  ;;  %v5958_v58 = vpop.eup %4242  ;;  %v5964_v6 = vadd.f32 %v2029_v61, %v5874_v62  ;;  %v6641_v54 = vrot.slane %v5770_v27, 1  ;;  %v6642_v19 = vld [vmem:[#allocation28_spill] sm:$0xff] }
 0x2ab   : > { %4252 = vrcp.f32 %v1969_v50  ;;  %v1927_v26 = vadd.f32 %v6639_v37, %v6638_v35  ;;  %v1988_v31 = vadd.f32 %v6640_v59, %v5762_v23  ;;  %2675 = vperm.xlu0 %3937, %v2401_v46   ;;  %v2034_v32 = vrot.slane %v2033_v15, 4 }
 0x2ac   : > { %4254 = vpow2.f32 %v1775_v28  ;;  %v2242_v52 = vadd.f32 %v6641_v54, %v5770_v27  ;;  %v2061_v30 = vsel %vm1196_vm2, %v5958_v58, 0.0  ;;  %v2015_v40 = vrot.slane %v5917_v1, 2  ;;  %v5973_v62 = vpop.eup %4244 }
 0x2ad   : > { %4256 = vrcp.f32 %v2186_v22  ;;  %v1989_v23 = vrot.slane %v1988_v31, 1  ;;  %v2272_v10 = vrot.slane %v5922_v8, 4  ;;  %v2021_v55 = vadd.f32 %v2020_v9, %v2019_v33  ;;  %v6644_v9 = vld [vmem:[#allocation21_spill] sm:$0xff] }
 0x2ae   : > { %4258 = vpow2.f32 %v1779_v2  ;;  %v2043_v61 = vrot.slane %v5924_v11, 2  ;;  %v2049_v49 = vadd.f32 %v2048_v5, %v2047_v29  ;;  %v2278_v27 = vsel %vm1196_vm2, %v5950_v7, 0.0 }
 0x2af   : > { %4260 = vrcp.f32 %v1927_v26  ;;  %v1990_v36 = vadd.f32 %v1989_v23, %v1988_v31  ;;  %v2062_v14 = vrot.slane %v2061_v30, 4  ;;  %v6643_v43 = vrot.slane %v6642_v19, 1  ;;  %v4247_v28 = vpop.eup %4246 }
 0x2b0   : > { %4262 = vrcp.f32 %v2242_v52  ;;  %v2248_v33 = vrot.slane %v5961_v42, 1  ;;  %v2035_v0 = vadd.f32 %v2034_v32, %v2033_v15  ;;  %v1983_v29 = vadd.f32 %v1982_v39, %v5784_v56  ;;  %v6646_v32 = vld [vmem:[#allocation22_spill] sm:$0xff] }
 0x2b1   : > { %v1948_v17 = vadd.f32 %v6643_v43, %v6642_v19  ;;  %4264 = vrcp.f32 %v1990_v36  ;;  %v2031_v53 = vrot.slane %v5964_v6, 1  ;;  %v2016_v41 = vadd.f32 %v2015_v40, %v5917_v1  ;;  %v5988_v2 = vpop.eup %4248  ;;  %v6011_v19 = vpop.permute.xlu0 %2600 }
 0x2b2   : > { %v2022_v18 = vrot.slane %v2021_v55, 2  ;;  %v2359_v50 = vmul.f32 %v4247_v28, %v6644_v9  ;;  %v5991_v46 = vadd.f32 %v2272_v10, %v5922_v8  ;;  %v2279_v22 = vrot.slane %v2278_v27, 4 }
 0x2b3   : > { %v5994_v15 = vadd.f32 %v2043_v61, %v5924_v11  ;;  %v2050_v5 = vrot.slane %v2049_v49, 2  ;;  %v2063_v37 = vadd.f32 %v2062_v14, %v2061_v30  ;;  %v2075_v56 = vsel %vm1196_vm2, %v5988_v2, 0.0  ;;  %v2421_v14 = vpop.permute.xlu1 %2420 }
 0x2b4   : > { %v4251_v35 = vpop.eup %4250  ;;  %2465 = vperm.xlu1 %3936, %v2359_v50   ;;  %4266 = vrcp.f32 %v1948_v17  ;;  %v6645_v39 = vrot.slane %v5576_v44, 1  ;;  %v2036_v59 = vrot.slane %v2035_v0, 2  ;;  %v2076_v8 = vrot.slane %v2075_v56, 4  ;;  %v6648_v50 = vld [vmem:[#allocation23_spill] sm:$0xff] }
 0x2b5   : > { %v4253_v26 = vpop.eup %4252  ;;  %4268 = vrcp.f32 %v1983_v29  ;;  %v1997_v11 = vadd.f32 %v1996_v16, %v5846_v47  ;;  %v2017_v54 = vrot.slane %v2016_v41, 1  ;;  %v2023_v52 = vadd.f32 %v2022_v18, %v2021_v55 }
 0x2b6   : > { %v2200_v1 = vadd.f32 %v6645_v39, %v5576_v44  ;;  %v6004_v31 = vpop.eup %4254  ;;  %v2362_v30 = vmul.f32 %v4251_v35, %v6646_v32  ;;  %v2367_v23 = vmul.f32 %v4253_v26, %v5627_v20  ;;  %v2274_v10 = vrot.slane %v5991_v46, 2 }
 0x2b7   : > { %v4257_v40 = vpop.eup %4256  ;;  %v6009_v44 = vadd.f32 %v2279_v22, %v2278_v27  ;;  %v2051_v61 = vadd.f32 %v2050_v5, %v2049_v49  ;;  %v2077_v36 = vadd.f32 %v2076_v8, %v2075_v56  ;;  %v2054_v47 = vsel %vm1196_vm2, %v5973_v62, 0.0  ;;  %v4324_v5 = vld [vmem:[%s4535_s5 + $0x8] sm:$0xff]  ;;  %v6650_v8 = vld [vmem:[#allocation32_spill] sm:$0xff] }
 0x2b8   : > { %v6013_v43 = vpop.eup %4258  ;;  %v2064_v16 = vrot.slane %v2063_v37, 2  ;;  %2480 = vperm.xlu1 %3936, %v2362_v30   ;;  %2505 = vperm.xlu0 %3937, %v2367_v23   ;;  %4270 = vrcp.f32 %v2200_v1  ;;  %v6647_v20 = vrot.slane %v5629_v25, 1  ;;  %v2045_v49 = vrot.slane %v5994_v15, 1 }
 0x2b9   : > { %v4261_v27 = vpop.eup %4260  ;;  %v6021_v17 = vadd.f32 %v2036_v59, %v2035_v0  ;;  %4272 = vrcp.f32 %v1997_v11  ;;  %v2249_v28 = vadd.f32 %v2248_v33, %v5961_v42  ;;  %v2024_v18 = vrot.slane %v2023_v52, 1  ;;  %v6652_v42 = vld [vmem:[#allocation13_spill] sm:$0xff] }
 0x2ba   : > { %v1962_v55 = vadd.f32 %v6647_v20, %v5629_v25  ;;  %v4263_v29 = vpop.eup %4262  ;;  %v2078_v9 = vrot.slane %v2077_v36, 2  ;;  %v2398_v22 = vmul.f32 %v4257_v40, %v6648_v50  ;;  %v2734_v35 = vmul.f32 %v4324_v5, %v2421_v14  ;;  %v6653_v40 = vld [vmem:[#allocation35_spill] sm:$0xff]  ;;  %v2416_v20 = vpop.permute.xlu0 %2415 }
 0x2bb   : > { %v4265_v56 = vpop.eup %4264  ;;  %v2052_v39 = vrot.slane %v2051_v61, 1  ;;  %v2055_v1 = vrot.slane %v2054_v47, 4  ;;  %v6649_v25 = vrot.slane %v5683_v21, 1  ;;  %v6651_v0 = vrot.slane %v6650_v8, 1 }
 0x2bc   : > { %v2065_v11 = vadd.f32 %v2064_v16, %v2063_v37  ;;  %2660 = vperm.xlu1 %3936, %v2398_v22   ;;  %v2370_v33 = vmul.f32 %v4265_v56, %v6652_v42  ;;  %4274 = vrcp.f32 %v1962_v55  ;;  %v2804_v32 = vsel %vm225_vm0, %v2734_v35, 0.0  ;;  %v6655_v16 = vld [vmem:[#allocation24_spill] sm:$0xff]  ;;  %v6656_v55 = vld [vmem:[#allocation6_spill] sm:$0xff] }
 0x2bd   : > { %v1976_v26 = vadd.f32 %v6649_v25, %v5683_v21  ;;  %v2235_v59 = vadd.f32 %v6651_v0, %v6650_v8  ;;  %v2068_v30 = vsel %vm1196_vm2, %v6004_v31, 0.0  ;;  %4276 = vrcp.f32 %v2249_v28  ;;  %v6657_v28 = vld [vmem:[#allocation8_spill] sm:$0xff] }
 0x2be   : > { %v2018_v23 = vadd.f32 %v2017_v54, %v2016_v41  ;;  %v6654_v14 = vrot.slane %v6653_v40, 1  ;;  %v4267_v50 = vpop.eup %4266  ;;  %v2079_v5 = vadd.f32 %v2078_v9, %v2077_v36  ;;  %v2082_v37 = vsel %vm1196_vm2, %v6013_v43, 0.0  ;;  %2520 = vperm.xlu0 %3937, %v2370_v33   ;;  %v2431_v9 = vpop.permute.xlu1 %2430 }
 0x2bf   : > { %v2361_v22 = vmul.f32 %v4261_v27, %v6655_v16  ;;  %v2406_v35 = vmul.f32 %v4263_v29, %v6656_v55  ;;  %v4269_v56 = vpop.eup %4268  ;;  %v2056_v25 = vadd.f32 %v2055_v1, %v2054_v47  ;;  %4278 = vrcp.f32 %v1976_v26  ;;  %v6659_v26 = vld [vmem:[#allocation25_spill] sm:$0xff]  ;;  %v6661_v55 = vld [vmem:[#allocation26_spill] sm:$0xff] }
 0x2c0   : > { %v2004_v21 = vadd.f32 %v6654_v14, %v6653_v40  ;;  %v6658_v41 = vrot.slane %v6657_v28, 1  ;;  %v2805_v8 = vrot.slane %v2804_v32, 4  ;;  %v2066_v0 = vrot.slane %v2065_v11, 1  ;;  %v6660_v14 = vld [vmem:[#allocation7_spill] sm:$0xff] }
 0x2c1   : > { %v2069_v42 = vrot.slane %v2068_v30, 4  ;;  %2475 = vperm.xlu1 %3936, %v2361_v22   ;;  %4280 = vrcp.f32 %v2235_v59  ;;  %v2025_v36 = vadd.f32 %v2024_v18, %v2023_v52  ;;  %v2083_v40 = vrot.slane %v2082_v37, 4 }
 0x2c2   : > { %v2256_v54 = vadd.f32 %v6658_v41, %v6657_v28  ;;  %4282 = vrcp.f32 %v2018_v23  ;;  %v2011_v27 = vadd.f32 %v2010_v63, %v5790_v4  ;;  %v2053_v29 = vadd.f32 %v2052_v39, %v2051_v61  ;;  %v4271_v47 = vpop.eup %4270  ;;  %2700 = vperm.xlu0 %3937, %v2406_v35   ;;  %v6054_v23 = vpop.permute.xlu0 %2595  ;;  %v4325_v61 = vld [vmem:[%s4535_s5] sm:$0xff] }
 0x2c3   : > { %v2080_v1 = vrot.slane %v2079_v5, 1  ;;  %v2364_v33 = vmul.f32 %v4267_v50, %v6659_v26  ;;  %v2369_v16 = vmul.f32 %v4269_v56, %v6660_v14  ;;  %4284 = vrcp.f32 %v2004_v21  ;;  %v4273_v22 = vpop.eup %4272 }
 0x2c4   : > { %v2057_v59 = vrot.slane %v2056_v25, 2  ;;  %4286 = vrcp.f32 %v2256_v54  ;;  %v2263_v52 = vadd.f32 %v2262_v60, %v5853_v57  ;;  %v2806_v18 = vadd.f32 %v2805_v8, %v2804_v32  ;;  %v6662_v57 = vld [vmem:[#allocation36_spill] sm:$0xff] }
 0x2c5   : > { %v2070_v4 = vadd.f32 %v2069_v42, %v2068_v30  ;;  %2490 = vperm.xlu1 %3936, %v2364_v33   ;;  %4288 = vrcp.f32 %v2025_v36  ;;  %v2067_v63 = vadd.f32 %v2066_v0, %v2065_v11  ;;  %v2733_v39 = vmul.f32 %v4325_v61, %v2416_v20  ;;  %v6063_v11 = vpop.permute.xlu1 %2610 }
 0x2c6   : > { %v2084_v50 = vadd.f32 %v2083_v40, %v2082_v37  ;;  %v2400_v35 = vmul.f32 %v4271_v47, %v6661_v55  ;;  %4290 = vrcp.f32 %v2011_v27  ;;  %v2032_v21 = vadd.f32 %v2031_v53, %v5964_v6  ;;  %v4275_v56 = vpop.eup %4274  ;;  %2515 = vperm.xlu0 %3937, %v2369_v16   ;;  %v6069_v53 = vpop.permute.xlu0 %2605 }
 0x2c7   : > { %v2371_v60 = vmul.f32 %v4273_v22, %v6662_v57  ;;  %4292 = vrcp.f32 %v2053_v29  ;;  %v2081_v32 = vadd.f32 %v2080_v1, %v2079_v5  ;;  %v2797_v30 = vsel %vm225_vm0, %v2733_v39, 0.0  ;;  %v4277_v20 = vpop.eup %4276  ;;  %v4326_v5 = vld [vmem:[%s4535_s5 + $0x18] sm:$0xff]  ;;  %v6663_v29 = vld [vmem:[#allocation29_spill] sm:$0xff] }
 0x2c8   : > { %v2281_v37 = vrot.slane %v6009_v44, 2  ;;  %4294 = vrcp.f32 %v2263_v52  ;;  %v2046_v28 = vadd.f32 %v2045_v49, %v5994_v15  ;;  %v2807_v6 = vrot.slane %v2806_v18, 2  ;;  %v6664_v49 = vld [vmem:[#allocation33_spill] sm:$0xff] }
 0x2c9   : > { %v2058_v41 = vadd.f32 %v2057_v59, %v2056_v25  ;;  %v2071_v54 = vrot.slane %v2070_v4, 2  ;;  %2670 = vperm.xlu1 %3936, %v2400_v35   ;;  %4296 = vrcp.f32 %v2067_v63  ;;  %v2736_v8 = vmul.f32 %v4326_v5, %v2431_v9  ;;  %v4279_v0 = vpop.eup %4278  ;;  %v2426_v61 = vpop.permute.xlu1 %2425 }
 0x2ca   : > { %v2038_v42 = vrot.slane %v6021_v17, 1  ;;  %v2085_v36 = vrot.slane %v2084_v50, 2  ;;  %4298 = vrcp.f32 %v2032_v21  ;;  %v2798_v40 = vrot.slane %v2797_v30, 4  ;;  %2525 = vperm.xlu0 %3937, %v2371_v60   ;;  %v2441_v35 = vpop.permute.xlu0 %2440  ;;  %v6667_v21 = vld [vmem:[#allocation31_spill] sm:$0xff]  ;;  %v6668_v60 = vld [vmem:[#allocation10_spill] sm:$0xff] }
 0x2cb   : > { %v4281_v27 = vpop.eup %4280  ;;  %v2366_v47 = vmul.f32 %v4275_v56, %v6663_v29  ;;  %v2407_v15 = vmul.f32 %v4277_v20, %v5825_v34  ;;  %4300 = vrcp.f32 %v2081_v32  ;;  %v6665_v25 = vrot.slane %v6664_v49, 1 }
 0x2cc   : > { %v4283_v26 = vpop.eup %4282  ;;  %v6666_v9 = vrot.slane %v5782_v24, 2  ;;  %v2282_v14 = vadd.f32 %v2281_v37, %v6009_v44  ;;  %4302 = vrcp.f32 %v2046_v28  ;;  %v2808_v16 = vadd.f32 %v2807_v6, %v2806_v18 }
 0x2cd   : > { %v2221_v1 = vadd.f32 %v6665_v25, %v6664_v49  ;;  %v4285_v22 = vpop.eup %4284  ;;  %v6087_v34 = vadd.f32 %v2274_v10, %v5991_v46  ;;  %v2059_v59 = vrot.slane %v2058_v41, 1  ;;  %v2072_v52 = vadd.f32 %v2071_v54, %v2070_v4  ;;  %2500 = vperm.xlu1 %3936, %v2366_v47   ;;  %v2436_v54 = vpop.permute.xlu1 %2435  ;;  %v6671_v47 = vld [vmem:[#allocation12_spill] sm:$0xff] }
 0x2ce   : > { %v6081_v33 = vadd.f32 %v6666_v9, %v5782_v24  ;;  %v2818_v63 = vsel %vm225_vm0, %v2736_v8, 0.0  ;;  %v4287_v39 = vpop.eup %4286  ;;  %v6090_v55 = vadd.f32 %v2085_v36, %v2084_v50  ;;  %v2799_v24 = vadd.f32 %v2798_v40, %v2797_v30  ;;  %2705 = vperm.xlu0 %3937, %v2407_v15   ;;  %v6670_v8 = vld [vmem:[#allocation11_spill] sm:$0xff]  ;;  %v6672_v49 = vld [vmem:[#allocation16_spill] sm:$0xff] }
 0x2cf   : > { %v4289_v44 = vpop.eup %4288  ;;  %v2368_v18 = vmul.f32 %v4279_v0, %v6667_v21  ;;  %v2374_v56 = vmul.f32 %v4283_v26, %v5886_v12  ;;  %4304 = vrcp.f32 %v2221_v1  ;;  %v2039_v46 = vadd.f32 %v2038_v42, %v6021_v17  ;;  %v4327_v36 = vld [vmem:[%s4535_s5 + $0x10] sm:$0xff] }
 0x2d0   : > { %v4291_v10 = vpop.eup %4290  ;;  %v2283_v4 = vrot.slane %v2282_v14, 1  ;;  %v2809_v57 = vrot.slane %v2808_v16, 1  ;;  %v6669_v32 = vrot.slane %v6668_v60, 1  ;;  %v2819_v20 = vrot.slane %v2818_v63, 4 }
 0x2d1   : > { %v4293_v30 = vpop.eup %4292  ;;  %v2269_v37 = vrot.slane %v6081_v33, 1  ;;  %v2276_v28 = vrot.slane %v6087_v34, 1  ;;  %v2073_v6 = vrot.slane %v2072_v52, 1  ;;  %2510 = vperm.xlu1 %3936, %v2368_v18   ;;  %v2060_v12 = vadd.f32 %v2059_v59, %v2058_v41 }
 0x2d2   : > { %v2228_v50 = vadd.f32 %v6669_v32, %v6668_v60  ;;  %v4295_v5 = vpop.eup %4294  ;;  %v2087_v17 = vrot.slane %v6090_v55, 1  ;;  %v2405_v0 = vmul.f32 %v4281_v27, %v6670_v8  ;;  %v2800_v42 = vrot.slane %v2799_v24, 2  ;;  %2540 = vperm.xlu0 %3937, %v2374_v56   ;;  %v2621_v27 = vpop.permute.xlu0 %2620  ;;  %v4329_v60 = vld [vmem:[%s4535_s5 + $0x148] sm:$0xff] }
 0x2d3   : > { %v2735_v40 = vmul.f32 %v4327_v36, %v2426_v61  ;;  %v4297_v29 = vpop.eup %4296  ;;  %v2372_v15 = vmul.f32 %v4285_v22, %v6671_v47  ;;  %v2408_v25 = vmul.f32 %v4287_v39, %v6672_v49  ;;  %v2375_v1 = vmul.f32 %v4289_v44, %v5915_v51  ;;  %v6673_v61 = vld [vmem:[#allocation34_spill] sm:$0xff]  ;;  %v2616_v32 = vpop.permute.xlu1 %2615  ;;  %v4331_v36 = vld [vmem:[%s4535_s5 + $0x140] sm:$0xff] }
 0x2d4   : > { %4306 = vrcp.f32 %v2039_v46  ;;  %v4299_v26 = vpop.eup %4298  ;;  %v6106_v41 = vadd.f32 %v2809_v57, %v2808_v16  ;;  %v2820_v9 = vadd.f32 %v2819_v20, %v2818_v63  ;;  %v2284_v59 = vadd.f32 %v2283_v4, %v2282_v14  ;;  %v6674_v16 = vld [vmem:[#allocation37_spill] sm:$0xff] }
 0x2d5   : > { %4308 = vrcp.f32 %v2228_v50  ;;  %v4301_v21 = vpop.eup %4300  ;;  %2695 = vperm.xlu1 %3936, %v2405_v0   ;;  %v6109_v18 = vmul.f32 %v4291_v10, %v6673_v61  ;;  %v2074_v22 = vadd.f32 %v2073_v6, %v2072_v52  ;;  %v2811_v39 = vsel %vm225_vm0, %v2735_v40, 0.0  ;;  %v4328_v10 = vld [vmem:[%s4535_s5 + $0x28] sm:$0xff]  ;;  %v4330_v0 = vld [vmem:[%s4535_s5 + $0x20] sm:$0xff] }
 0x2d6   : > { %4310 = vrcp.f32 %v2060_v12  ;;  %v4303_v51 = vpop.eup %4302  ;;  %v2379_v44 = vmul.f32 %v4293_v30, %v5926_v38  ;;  %v6114_v56 = vmul.f32 %v4295_v5, %v6674_v16  ;;  %v2801_v63 = vadd.f32 %v2800_v42, %v2799_v24  ;;  %2545 = vperm.xlu0 %3937, %v2375_v1   ;;  %v2446_v20 = vpop.permute.xlu0 %2445 }
 0x2d7   : > { %v2812_v14 = vrot.slane %v2811_v39, 4  ;;  %v2381_v46 = vmul.f32 %v4297_v29, %v5958_v58  ;;  %v6118_v4 = vmul.f32 %v4299_v26, %v5838_v13  ;;  %v2738_v57 = vmul.f32 %v4328_v10, %v2441_v35  ;;  %v4332_v29 = vld [vmem:[%s4535_s5 + $0x30] sm:$0xff]  ;;  %v4333_v10 = vld [vmem:[%s4535_s5 + $0x38] sm:$0xff] }
 0x2d8   : > { %v2774_v52 = vmul.f32 %v4329_v60, %v2621_v27  ;;  %v6123_v50 = vmul.f32 %v4301_v21, %v5988_v2  ;;  %v2821_v38 = vrot.slane %v2820_v9, 2  ;;  %4312 = vrcp.f32 %v2284_v59 }
 0x2d9   : > { %v2813_v24 = vadd.f32 %v2812_v14, %v2811_v39  ;;  %v4305_v30 = vpop.eup %4304  ;;  %2530 = vperm.xlu1 %3936, %v2372_v15   ;;  %v6126_v13 = vmul.f32 %v4303_v51, %v5892_v45  ;;  %4314 = vrcp.f32 %v2074_v22  ;;  %v2832_v58 = vsel %vm225_vm0, %v2738_v57, 0.0  ;;  %v6675_v45 = vld [vmem:[#allocation5_spill] sm:$0xff] }
 0x2da   : > { %v3084_v35 = vsel %vm225_vm0, %v2774_v52, 0.0  ;;  %v2802_v2 = vrot.slane %v2801_v63, 1  ;;  %v2088_v6 = vadd.f32 %v2087_v17, %v6090_v55  ;;  %v2833_v5 = vrot.slane %v2832_v58, 4  ;;  %2565 = vperm.xlu0 %3937, %v2379_v44   ;;  %v2451_v21 = vpop.permute.xlu1 %2450  ;;  %v2626_v60 = vpop.permute.xlu0 %2625 }
 0x2db   : > { %v2814_v12 = vrot.slane %v2813_v24, 2  ;;  %v3085_v8 = vrot.slane %v3084_v35, 4  ;;  %v2737_v42 = vmul.f32 %v4330_v0, %v2436_v54  ;;  %v2773_v40 = vmul.f32 %v4331_v36, %v2616_v32 }
 0x2dc   : > { %v2739_v47 = vmul.f32 %v4332_v29, %v2446_v20  ;;  %v2403_v15 = vmul.f32 %v4305_v30, %v6675_v45  ;;  %v2822_v49 = vadd.f32 %v2821_v38, %v2820_v9  ;;  %v2834_v26 = vadd.f32 %v2833_v5, %v2832_v58  ;;  %v6676_v58 = vld [vmem:[#allocation30_spill] sm:$0xff] }
 0x2dd   : > { %v2815_v1 = vadd.f32 %v2814_v12, %v2813_v24  ;;  %2710 = vperm.xlu1 %3936, %v2408_v25   ;;  %v3086_v55 = vadd.f32 %v3085_v8, %v3084_v35  ;;  %v2825_v17 = vsel %vm225_vm0, %v2737_v42, 0.0  ;;  %v3077_v27 = vsel %vm225_vm0, %v2773_v40, 0.0  ;;  %v4334_v12 = vld [vmem:[%s4535_s5 + $0x150] sm:$0xff] }
 0x2de   : > { %v6135_v59 = vpop.eup %4306  ;;  %v2839_v54 = vsel %vm225_vm0, %v2739_v47, 0.0  ;;  %v2803_v22 = vadd.f32 %v2802_v2, %v2801_v63  ;;  %v2835_v51 = vrot.slane %v2834_v26, 2  ;;  %v2826_v44 = vrot.slane %v2825_v17, 4  ;;  %2575 = vperm.xlu0 %3937, %v2381_v46  }
 0x2df   : > { %v4309_v61 = vpop.eup %4308  ;;  %v2816_v39 = vrot.slane %v2815_v1, 1  ;;  %v3087_v16 = vrot.slane %v3086_v55, 2  ;;  %v3078_v14 = vrot.slane %v3077_v27, 4  ;;  %v2840_v25 = vrot.slane %v2839_v54, 4 }
 0x2e0   : > { %v6140_v9 = vpop.eup %4310  ;;  %v2740_v57 = vmul.f32 %v4333_v10, %v2451_v21  ;;  %v2823_v52 = vrot.slane %v2822_v49, 1  ;;  %4316 = vrcp.f32 %v2088_v6  ;;  %v2827_v38 = vadd.f32 %v2826_v44, %v2825_v17 }
 0x2e1   : > { %v2817_v32 = vadd.f32 %v2816_v39, %v2815_v1  ;;  %2535 = vperm.xlu1 %3936, %v6109_v18   ;;  %v3088_v63 = vadd.f32 %v3087_v16, %v3086_v55  ;;  %v3079_v24 = vadd.f32 %v3078_v14, %v3077_v27  ;;  %v2841_v20 = vadd.f32 %v2840_v25, %v2839_v54  ;;  %v2631_v36 = vpop.permute.xlu1 %2630  ;;  %v4335_v54 = vld [vmem:[%s4535_s5 + $0x158] sm:$0xff] }
 0x2e2   : > { %v4313_v30 = vpop.eup %4312  ;;  %v2404_v46 = vmul.f32 %v4309_v61, %v6676_v58  ;;  %v2836_v35 = vadd.f32 %v2835_v51, %v2834_v26  ;;  %v2846_v2 = vsel %vm225_vm0, %v2740_v57, 0.0  ;;  %v2775_v5 = vmul.f32 %v4334_v12, %v2626_v60  ;;  %2585 = vperm.xlu0 %3937, %v6123_v50   ;;  %v216_v12 = vld [vmem:[%s6487_s1 + $0x38] sm:$0xff] }
 0x2e3   : > { %v6147_v8 = vpop.eup %4314  ;;  %v3314_v6 = vsel %vm3313_vm3, %v6106_v41, %v2803_v22  ;;  %v2828_v18 = vrot.slane %v2827_v38, 2  ;;  %v3080_v0 = vrot.slane %v3079_v24, 2  ;;  %v2842_v42 = vrot.slane %v2841_v20, 2 }
 0x2e4   : > { %v2824_v40 = vadd.f32 %v2823_v52, %v2822_v49  ;;  %v3316_v29 = vsel %vm3315_vm4, %v2817_v32, %v3314_v6  ;;  %v2847_v47 = vrot.slane %v2846_v2, 4  ;;  %v3091_v45 = vsel %vm225_vm0, %v2775_v5, 0.0 }
 0x2e5   : > { %2715 = vperm.xlu1 %3936, %v6114_v56   ;;  %v3089_v1 = vrot.slane %v3088_v63, 1  ;;  %v2829_v26 = vadd.f32 %v2828_v18, %v2827_v38  ;;  %v3081_v55 = vadd.f32 %v3080_v0, %v3079_v24  ;;  %v2843_v50 = vadd.f32 %v2842_v42, %v2841_v20 }
 0x2e6   : > { %v2837_v17 = vrot.slane %v2836_v35, 1  ;;  %v2848_v27 = vadd.f32 %v2847_v47, %v2846_v2  ;;  %v3092_v41 = vrot.slane %v3091_v45, 4  ;;  %v2776_v21 = vmul.f32 %v4335_v54, %v2631_v36  ;;  %2685 = vperm.xlu0 %3937, %v2403_v15   ;;  %v4336_v54 = vld [vmem:[%s4535_s5 + $0x168] sm:$0xff] }
 0x2e7   : > { %v2830_v61 = vrot.slane %v2829_v26, 1  ;;  %v3082_v22 = vrot.slane %v3081_v55, 1  ;;  %v2844_v49 = vrot.slane %v2843_v50, 1  ;;  %v3090_v56 = vadd.f32 %v3089_v1, %v3088_v63  ;;  %v214_v63 = vld [vmem:[%s6487_s1 + $0x28] sm:$0xff] }
 0x2e8   : > { %v2849_v39 = vrot.slane %v2848_v27, 2  ;;  %v3093_v51 = vadd.f32 %v3092_v41, %v3091_v45  ;;  %v3098_v44 = vsel %vm225_vm0, %v2776_v21, 0.0  ;;  %v3318_v15 = vsel %vm3317_vm5, %v2824_v40, %v3316_v29 }
 0x2e9   : > { %2550 = vperm.xlu1 %3936, %v6118_v4   ;;  %v2831_v16 = vadd.f32 %v2830_v61, %v2829_v26  ;;  %v3083_v14 = vadd.f32 %v3082_v22, %v3081_v55  ;;  %v3099_v25 = vrot.slane %v3098_v44, 4  ;;  %v2845_v57 = vadd.f32 %v2844_v49, %v2843_v50  ;;  %v213_v4 = vld [vmem:[%s6487_s1 + $0x20] sm:$0xff]  ;;  %v6677_v50 = vld [vmem:[#allocation15_spill] sm:$0xff] }
 0x2ea   : > { %v4317_v10 = vpop.eup %4316  ;;  %v2850_v60 = vadd.f32 %v2849_v39, %v2848_v27  ;;  %v3094_v52 = vrot.slane %v3093_v51, 2  ;;  %2690 = vperm.xlu0 %3937, %v2404_v46   ;;  %v2838_v20 = vadd.f32 %v2837_v17, %v2836_v35  ;;  %v215_v46 = vld [vmem:[%s6487_s1 + $0x30] sm:$0xff]  ;;  %v2412_v5 = vmul.f32 %v4313_v30, %v5950_v7  ;;  %v2646_v27 = vpop.permute.xlu0 %2645 }
 0x2eb   : > { %v3355_v32 = vsel %vm3313_vm3, %v3090_v56, %v3083_v14  ;;  %v3100_v38 = vadd.f32 %v3099_v25, %v3098_v44  ;;  %v3320_v24 = vsel %vm3319_vm6, %v2831_v16, %v3318_v15  ;;  %v2270_v6 = vadd.f32 %v2269_v37, %v6081_v33  ;;  %v4337_v61 = vld [vmem:[%s4535_s5 + $0x170] sm:$0xff]  ;;  %v4338_v16 = vld [vmem:[%s4535_s5 + $0x160] sm:$0xff] }
 0x2ec   : > { %v2851_v58 = vrot.slane %v2850_v60, 1  ;;  %v3095_v2 = vadd.f32 %v3094_v52, %v3093_v51  ;;  %v3322_v42 = vsel %vm3321_vm7, %v2838_v20, %v3320_v24  ;;  %v3882_v36 = vpack.c.bf16 %v214_v63, %v213_v4 }
 0x2ed   : > { %2560 = vperm.xlu1 %3936, %v6126_v13   ;;  %v3101_v35 = vrot.slane %v3100_v38, 2  ;;  %v2377_v40 = vmul.f32 %v6135_v59, %v5933_v3  ;;  %v3324_v13 = vsel %vm3323_vm8, %v2845_v57, %v3322_v42  ;;  %v3886_v47 = vpack.c.bf16 %v216_v12, %v215_v46  ;;  %v4341_v42 = vld [vmem:[%s4535_s5 + $0x138] sm:$0xff] }
 0x2ee   : > { %v2852_v18 = vadd.f32 %v2851_v58, %v2850_v60  ;;  %v3096_v0 = vrot.slane %v3095_v2, 1  ;;  %2730 = vperm.xlu0 %3937, %v2412_v5   ;;  %3883 = vmatprep.subr.bf16.mxu1 %v3882_v36  ;;  %4318 = vrcp.f32 %v2270_v6  ;;  %v2277_v37 = vadd.f32 %v2276_v28, %v6087_v34  ;;  %v2461_v34 = vpop.permute.xlu1 %2460  ;;  %v4340_v6 = vld [vmem:[%s4535_s5 + $0x120] sm:$0xff] }
 0x2ef   : > { %v3102_v29 = vadd.f32 %v3101_v35, %v3100_v38  ;;  %3885 = vmatpush3.bf16.msra.mxu1 %v3882_v36  ;;  %v2380_v59 = vmul.f32 %v6140_v9, %v5973_v62  ;;  %v2382_v26 = vmul.f32 %v6147_v8, %v6004_v31  ;;  %v2384_v28 = vmul.f32 %v4317_v10, %v6013_v43 }
 0x2f0   : > { %v3097_v7 = vadd.f32 %v3096_v0, %v3095_v2  ;;  %v3326_v30 = vsel %vm3325_vm9, %v2852_v18, %v3324_v13  ;;  %3887 = vmatprep.subr.bf16.mxu1 %v3886_v47  ;;  %4320 = vrcp.f32 %v2277_v37  ;;  %v2779_v22 = vmul.f32 %v4337_v61, %v2646_v27  ;;  %v4339_v2 = vld [vmem:[%s4535_s5 + $0x128] sm:$0xff]  ;;  %v4347_v27 = vld [vmem:[%s4535_s5 + $0x178] sm:$0xff] }
 0x2f1   : > { %2555 = vperm.xlu1 %3936, %v2377_v40   ;;  %v3103_v33 = vrot.slane %v3102_v29, 1  ;;  %3862 = vmatprep.mubr.msk.f32.mxu1 %vm225_vm0, %v3326_v30  ;;  %v2770_v46 = vmul.f32 %v4339_v2, %v6011_v19  ;;  %v2769_v35 = vmul.f32 %v4340_v6, %v6054_v23  ;;  %v2772_v36 = vmul.f32 %v4341_v42, %v6063_v11  ;;  %v4343_v30 = vld [vmem:[%s4535_s5 + $0x48] sm:$0xff] }
 0x2f2   : > { %v3356_v3 = vsel %vm3315_vm4, %v3097_v7, %v3355_v32  ;;  %v3119_v43 = vsel %vm225_vm0, %v2779_v22, 0.0  ;;  %v2742_v23 = vmul.f32 %v4343_v30, %v2461_v34 }
 0x2f3   : > { %v3104_v45 = vadd.f32 %v3103_v33, %v3102_v29  ;;  %3889 = vmatpush3.bf16.msra.mxu1 %v3886_v47  ;;  %v3120_v39 = vrot.slane %v3119_v43, 4  ;;  %v3056_v13 = vsel %vm225_vm0, %v2770_v46, 0.0  ;;  %v4342_v47 = vld [vmem:[%s4535_s5 + $0x130] sm:$0xff]  ;;  %v3049_v37 = vsel %vm225_vm0, %v2769_v35, 0.0 }
 0x2f4   : > { %v2771_v7 = vmul.f32 %v4342_v47, %v6069_v53  ;;  %v2860_v53 = vsel %vm225_vm0, %v2742_v23, 0.0 }
 0x2f5   : > { %2570 = vperm.xlu1 %3936, %v2380_v59   ;;  %v3357_v1 = vsel %vm3317_vm5, %v3104_v45, %v3356_v3  ;;  %v3121_v44 = vadd.f32 %v3120_v39, %v3119_v43  ;;  %v2656_v15 = vpop.permute.xlu0 %2655  ;;  %v4344_v3 = vld [vmem:[%s4535_s5 + $0x40] sm:$0xff]  ;;  %v3057_v59 = vrot.slane %v3056_v13, 4  ;;  %v3070_v45 = vsel %vm225_vm0, %v2772_v36, 0.0  ;;  %v4348_v43 = vld [vmem:[%s4535_s5 + $0x190] sm:$0xff] }
 0x2f6   : > { %v2641_v17 = vpop.permute.xlu1 %2640 }
 0x2f7   : > { %v2778_v21 = vmul.f32 %v4336_v54, %v2641_v17  ;;  %v3122_v10 = vrot.slane %v3121_v44, 2  ;;  %v3058_v54 = vadd.f32 %v3057_v59, %v3056_v13 }
 0x2f8   : > { %v4319_v55 = vpop.eup %4318 }
 0x2f9   : > { %2580 = vperm.xlu1 %3936, %v2382_v26   ;;  %v2410_v62 = vmul.f32 %v4319_v55, %v6677_v50  ;;  %v3112_v31 = vsel %vm225_vm0, %v2778_v21, 0.0  ;;  %v3123_v32 = vadd.f32 %v3122_v10, %v3121_v44  ;;  %v3063_v55 = vsel %vm225_vm0, %v2771_v7, 0.0 }
 0x2fa   : > { %v4321_v9 = vpop.eup %4320  ;;  %v3113_v49 = vrot.slane %v3112_v31, 4  ;;  %v3064_v22 = vrot.slane %v3063_v55, 4  ;;  %v3059_v10 = vrot.slane %v3058_v54, 2 }
 0x2fb   : > { %v2411_v41 = vmul.f32 %v4321_v9, %v5899_v48  ;;  %v3124_v63 = vrot.slane %v3123_v32, 1  ;;  %v4346_v9 = vld [vmem:[%s4535_s5 + $0x70] sm:$0xff] }
 0x2fc   : > { %v3114_v51 = vadd.f32 %v3113_v49, %v3112_v31  ;;  %v2861_v31 = vrot.slane %v2860_v53, 4  ;;  %v3060_v35 = vadd.f32 %v3059_v10, %v3058_v54 }
 0x2fd   : > { %2590 = vperm.xlu1 %3936, %v2384_v28   ;;  %v3125_v18 = vadd.f32 %v3124_v63, %v3123_v32  ;;  %v3050_v28 = vrot.slane %v3049_v37, 4  ;;  %v4350_v32 = vld [vmem:[%s4535_s5 + $0x58] sm:$0xff] }
 0x2fe   : > { %v3115_v25 = vrot.slane %v3114_v51, 2 }
 0x2ff   : > { %v3051_v39 = vadd.f32 %v3050_v28, %v3049_v37 }
 0x300   : > { %v3116_v52 = vadd.f32 %v3115_v25, %v3114_v51  ;;  %v4349_v25 = vld [vmem:[%s4535_s5 + $0x1a8] sm:$0xff] }
 0x301   : > { %2720 = vperm.xlu1 %3936, %v2410_v62   ;;  %v3071_v62 = vrot.slane %v3070_v45, 4 }
 0x302   : > { %v3117_v4 = vrot.slane %v3116_v52, 1  ;;  %v2486_v58 = vpop.permute.xlu0 %2485 }
 0x303   : > { %v2456_v8 = vpop.permute.xlu1 %2455  ;;  %v2747_v17 = vmul.f32 %v4346_v9, %v2486_v58 }
 0x304   : > { %v3118_v5 = vadd.f32 %v3117_v4, %v3116_v52  ;;  %v2741_v11 = vmul.f32 %v4344_v3, %v2456_v8  ;;  %v2862_v52 = vadd.f32 %v2861_v31, %v2860_v53 }
 0x305   : > { %2725 = vperm.xlu1 %3936, %v2411_v41  }
 0x306   : > { %v2853_v34 = vsel %vm225_vm0, %v2741_v11, 0.0  ;;  %v3061_v11 = vrot.slane %v3060_v35, 1 }
 0x307   : > { %v2854_v51 = vrot.slane %v2853_v34, 4 }
 0x30b   : > { %v2666_v33 = vpop.permute.xlu0 %2665 }
 0x30c   : > { %v2636_v56 = vpop.permute.xlu1 %2635  ;;  %v2783_v8 = vmul.f32 %v4348_v43, %v2666_v33 }
 0x30d   : > { %v2777_v14 = vmul.f32 %v4338_v16, %v2636_v56  ;;  %v3072_v56 = vadd.f32 %v3071_v62, %v3070_v45 }
 0x30f   : > { %v3105_v48 = vsel %vm225_vm0, %v2777_v14, 0.0  ;;  %v2895_v14 = vsel %vm225_vm0, %v2747_v17, 0.0  ;;  %v3073_v58 = vrot.slane %v3072_v56, 2 }
 0x310   : > { %v3106_v57 = vrot.slane %v3105_v48, 4  ;;  %v2896_v4 = vrot.slane %v2895_v14, 4 }
 0x311   : > { %v3074_v7 = vadd.f32 %v3073_v58, %v3072_v56 }
 0x312   : > { %v3107_v60 = vadd.f32 %v3106_v57, %v3105_v48 }
 0x313   : > { %v3075_v9 = vrot.slane %v3074_v7, 1 }
 0x314   : > { %v3108_v38 = vrot.slane %v3107_v60, 2 }
 0x316   : > { %v3109_v24 = vadd.f32 %v3108_v38, %v3107_v60  ;;  %v3065_v60 = vadd.f32 %v3064_v22, %v3063_v55 }
 0x317   : > { %v2681_v61 = vpop.permute.xlu0 %2680 }
 0x318   : > { %v3110_v20 = vrot.slane %v3109_v24, 1  ;;  %v2786_v48 = vmul.f32 %v4349_v25, %v2681_v61 }
 0x31a   : > { %v3111_v12 = vadd.f32 %v3110_v20, %v3109_v24  ;;  %v2855_v24 = vadd.f32 %v2854_v51, %v2853_v34  ;;  %v3052_v20 = vrot.slane %v3051_v39, 2  ;;  %v3168_v46 = vsel %vm225_vm0, %v2786_v48, 0.0 }
 0x31b   : > { %v6247_v48 = vadd.f32 %v3075_v9, %v3074_v7 }
 0x31c   : > { %v3358_v0 = vsel %vm3319_vm6, %v3111_v12, %v3357_v1  ;;  %v2471_v40 = vpop.permute.xlu1 %2470  ;;  %v4345_v1 = vld [vmem:[%s4535_s5 + $0x180] sm:$0xff]  ;;  %v2856_v36 = vrot.slane %v2855_v24, 2  ;;  %v3053_v47 = vadd.f32 %v3052_v20, %v3051_v39  ;;  %v4355_v20 = vld [vmem:[%s4535_s5 + $0x90] sm:$0xff] }
 0x31d   : > { %v3359_v29 = vsel %vm3321_vm7, %v3118_v5, %v3358_v0  ;;  %v2781_v26 = vmul.f32 %v4345_v1, %v2656_v15  ;;  %v3147_v15 = vsel %vm225_vm0, %v2783_v8, 0.0  ;;  %v2744_v38 = vmul.f32 %v4350_v32, %v2471_v40  ;;  %v4351_v1 = vld [vmem:[%s4535_s5 + $0x50] sm:$0xff] }
 0x31e   : > { %v6212_v19 = vsel %vm3323_vm8, %v3125_v18, %v3359_v29  ;;  %v3148_v12 = vrot.slane %v3147_v15, 4  ;;  %v3066_v18 = vrot.slane %v3065_v60, 2  ;;  %v2863_v0 = vrot.slane %v2862_v52, 2 }
 0x31f   : > { %v3133_v21 = vsel %vm225_vm0, %v2781_v26, 0.0  ;;  %v2874_v42 = vsel %vm225_vm0, %v2744_v38, 0.0  ;;  %v2897_v29 = vadd.f32 %v2896_v4, %v2895_v14  ;;  %v3169_v40 = vrot.slane %v3168_v46, 4  ;;  %v4354_v4 = vld [vmem:[%s4535_s5 + $0x188] sm:$0xff] }
 0x320   : > { %v3134_v16 = vrot.slane %v3133_v21, 4  ;;  %v3149_v23 = vadd.f32 %v3148_v12, %v3147_v15  ;;  %v2875_v33 = vrot.slane %v2874_v42, 4  ;;  %v3067_v59 = vadd.f32 %v3066_v18, %v3065_v60  ;;  %v4356_v18 = vld [vmem:[%s4535_s5 + $0x1a0] sm:$0xff] }
 0x321   : > { %v2496_v6 = vpop.permute.xlu0 %2495  ;;  %v2864_v45 = vadd.f32 %v2863_v0, %v2862_v52  ;;  %v2857_v28 = vadd.f32 %v2856_v36, %v2855_v24  ;;  %v2898_v55 = vrot.slane %v2897_v29, 2  ;;  %v3170_v53 = vadd.f32 %v3169_v40, %v3168_v46 }
 0x322   : > { %v3135_v2 = vadd.f32 %v3134_v16, %v3133_v21  ;;  %v3054_v34 = vrot.slane %v3053_v47, 1  ;;  %v2876_v54 = vadd.f32 %v2875_v33, %v2874_v42  ;;  %v4352_v21 = vld [vmem:[%s4535_s5 + $0x80] sm:$0xff]  ;;  %v3068_v43 = vrot.slane %v3067_v59, 1 }
 0x323   : > { %v2749_v61 = vmul.f32 %v4352_v21, %v2496_v6  ;;  %v2865_v8 = vrot.slane %v2864_v45, 1  ;;  %v2858_v51 = vrot.slane %v2857_v28, 1  ;;  %v6243_v14 = vadd.f32 %v3061_v11, %v3060_v35  ;;  %v4357_v33 = vld [vmem:[%s4535_s5 + $0x60] sm:$0xff] }
 0x324   : > { %v2651_v50 = vpop.permute.xlu1 %2650  ;;  %v3136_v30 = vrot.slane %v3135_v2, 2  ;;  %v6245_v25 = vadd.f32 %v3054_v34, %v3053_v47  ;;  %v2877_v60 = vrot.slane %v2876_v54, 2  ;;  %v6251_v38 = vadd.f32 %v3068_v43, %v3067_v59 }
 0x325   : > { %v2780_v41 = vmul.f32 %v4347_v27, %v2651_v50  ;;  %v2909_v52 = vsel %vm225_vm0, %v2749_v61, 0.0  ;;  %v2859_v46 = vadd.f32 %v2858_v51, %v2857_v28  ;;  %v4360_v51 = vld [vmem:[%s4535_s5 + $0x1c8] sm:$0xff] }
 0x326   : > { %v3137_v17 = vadd.f32 %v3136_v30, %v3135_v2  ;;  %v2866_v2 = vadd.f32 %v2865_v8, %v2864_v45  ;;  %v2910_v35 = vrot.slane %v2909_v52, 4 }
 0x327   : > { %v3126_v49 = vsel %vm225_vm0, %v2780_v41, 0.0  ;;  %v3150_v41 = vrot.slane %v3149_v23, 2 }
 0x328   : > { %v3127_v44 = vrot.slane %v3126_v49, 4  ;;  %v3138_v10 = vrot.slane %v3137_v17, 1  ;;  %v3327_v59 = vsel %vm3313_vm3, %v2866_v2, %v2859_v46 }
 0x32a   : > { %v3128_v57 = vadd.f32 %v3127_v44, %v3126_v49  ;;  %v2676_v50 = vpop.permute.xlu0 %2675  ;;  %v4353_v49 = vld [vmem:[%s4535_s5 + $0x68] sm:$0xff]  ;;  %v2899_v44 = vadd.f32 %v2898_v55, %v2897_v29  ;;  %v3139_v29 = vadd.f32 %v3138_v10, %v3137_v17  ;;  %v2911_v55 = vadd.f32 %v2910_v35, %v2909_v52 }
 0x32b   : > { %v2785_v0 = vmul.f32 %v4356_v18, %v2676_v50 }
 0x32c   : > { %v3129_v63 = vrot.slane %v3128_v57, 2  ;;  %v2900_v12 = vrot.slane %v2899_v44, 1 }
 0x32e   : > { %v3130_v5 = vadd.f32 %v3129_v63, %v3128_v57  ;;  %v3151_v57 = vadd.f32 %v3150_v41, %v3149_v23  ;;  %v6261_v45 = vadd.f32 %v2900_v12, %v2899_v44 }
 0x330   : > { %v3131_v13 = vrot.slane %v3130_v5, 1  ;;  %v3152_v40 = vrot.slane %v3151_v57, 1 }
 0x332   : > { %v3132_v37 = vadd.f32 %v3131_v13, %v3130_v5  ;;  %v2878_v13 = vadd.f32 %v2877_v60, %v2876_v54  ;;  %v6265_v9 = vadd.f32 %v3152_v40, %v3151_v57 }
 0x333   : > { %v2466_v3 = vpop.permute.xlu1 %2465 }
 0x334   : > { %v2743_v26 = vmul.f32 %v4351_v1, %v2466_v3  ;;  %v6238_v62 = vsel %vm3325_vm9, %v3132_v37, %v6212_v19  ;;  %v3171_v19 = vrot.slane %v3170_v53, 2  ;;  %v4358_v3 = vld [vmem:[%s4535_s5 + $0xa8] sm:$0xff]  ;;  %v2879_v17 = vrot.slane %v2878_v13, 1 }
 0x336   : > { %v2867_v27 = vsel %vm225_vm0, %v2743_v26, 0.0  ;;  %v3172_v5 = vadd.f32 %v3171_v19, %v3170_v53  ;;  %v3161_v53 = vsel %vm225_vm0, %v2785_v0, 0.0 }
 0x337   : > { %v2868_v22 = vrot.slane %v2867_v27, 4  ;;  %v2481_v31 = vpop.permute.xlu1 %2480  ;;  %v2506_v16 = vpop.permute.xlu0 %2505 }
 0x338   : > { %v2746_v39 = vmul.f32 %v4353_v49, %v2481_v31  ;;  %v2751_v58 = vmul.f32 %v4355_v20, %v2506_v16  ;;  %v3173_v1 = vrot.slane %v3172_v5, 1  ;;  %v3162_v49 = vrot.slane %v3161_v53, 4 }
 0x339   : > { %v2869_v56 = vadd.f32 %v2868_v22, %v2867_v27  ;;  %v4359_v22 = vld [vmem:[%s4535_s5 + $0x78] sm:$0xff] }
 0x33a   : > { %v2888_v15 = vsel %vm225_vm0, %v2746_v39, 0.0  ;;  %v2923_v23 = vsel %vm225_vm0, %v2751_v58, 0.0  ;;  %v6269_v8 = vadd.f32 %v3173_v1, %v3172_v5  ;;  %v4361_v58 = vld [vmem:[%s4535_s5 + $0x198] sm:$0xff]  ;;  %v3163_v46 = vadd.f32 %v3162_v49, %v3161_v53  ;;  %v4363_v53 = vld [vmem:[%s4535_s5 + $0x88] sm:$0xff] }
 0x33b   : > { %v2661_v32 = vpop.permute.xlu1 %2660  ;;  %v2870_v24 = vrot.slane %v2869_v56, 2  ;;  %v2889_v42 = vrot.slane %v2888_v15, 4  ;;  %v2924_v41 = vrot.slane %v2923_v23, 4 }
 0x33c   : > { %v2782_v63 = vmul.f32 %v4354_v4, %v2661_v32  ;;  %v2880_v4 = vadd.f32 %v2879_v17, %v2878_v13  ;;  %v3164_v1 = vrot.slane %v3163_v46, 2 }
 0x33d   : > { %v2521_v6 = vpop.permute.xlu0 %2520  ;;  %v2871_v30 = vadd.f32 %v2870_v24, %v2869_v56  ;;  %v2890_v50 = vadd.f32 %v2889_v42, %v2888_v15  ;;  %v2912_v56 = vrot.slane %v2911_v55, 2  ;;  %v2925_v52 = vadd.f32 %v2924_v41, %v2923_v23  ;;  %v4364_v41 = vld [vmem:[%s4535_s5 + $0xb0] sm:$0xff] }
 0x33e   : > { %v3140_v36 = vsel %vm225_vm0, %v2782_v63, 0.0  ;;  %v2754_v11 = vmul.f32 %v4358_v3, %v2521_v6 }
 0x33f   : > { %v3141_v47 = vrot.slane %v3140_v36, 4  ;;  %v2872_v21 = vrot.slane %v2871_v30, 1  ;;  %v2891_v16 = vrot.slane %v2890_v50, 2  ;;  %v2926_v13 = vrot.slane %v2925_v52, 2 }
 0x340   : > { %v2476_v7 = vpop.permute.xlu1 %2475  ;;  %v2944_v43 = vsel %vm225_vm0, %v2754_v11, 0.0 }
 0x341   : > { %v2745_v37 = vmul.f32 %v4357_v33, %v2476_v7  ;;  %v3142_v26 = vadd.f32 %v3141_v47, %v3140_v36  ;;  %v2701_v28 = vpop.permute.xlu0 %2700  ;;  %v2945_v32 = vrot.slane %v2944_v43, 4  ;;  %v2873_v63 = vadd.f32 %v2872_v21, %v2871_v30  ;;  %v4362_v36 = vld [vmem:[%s4535_s5 + $0xa0] sm:$0xff] }
 0x342   : > { %v2790_v44 = vmul.f32 %v4360_v51, %v2701_v28  ;;  %v2892_v18 = vadd.f32 %v2891_v16, %v2890_v50  ;;  %v2913_v33 = vadd.f32 %v2912_v56, %v2911_v55  ;;  %v2927_v21 = vadd.f32 %v2926_v13, %v2925_v52 }
 0x343   : > { %v2881_v34 = vsel %vm225_vm0, %v2745_v37, 0.0  ;;  %v3143_v27 = vrot.slane %v3142_v26, 2  ;;  %v2946_v30 = vadd.f32 %v2945_v32, %v2944_v43  ;;  %v3328_v37 = vsel %vm3315_vm4, %v2873_v63, %v3327_v59 }
 0x344   : > { %v2491_v54 = vpop.permute.xlu1 %2490  ;;  %v2882_v61 = vrot.slane %v2881_v34, 4  ;;  %v3196_v6 = vsel %vm225_vm0, %v2790_v44, 0.0  ;;  %v2893_v17 = vrot.slane %v2892_v18, 1  ;;  %v3329_v55 = vsel %vm3317_vm5, %v2880_v4, %v3328_v37 }
 0x345   : > { %v2748_v31 = vmul.f32 %v4359_v22, %v2491_v54  ;;  %v3144_v39 = vadd.f32 %v3143_v27, %v3142_v26  ;;  %v2516_v19 = vpop.permute.xlu0 %2515  ;;  %v3197_v11 = vrot.slane %v3196_v6, 4  ;;  %v6290_v32 = vadd.f32 %v3164_v1, %v3163_v46 }
 0x346   : > { %v2883_v10 = vadd.f32 %v2882_v61, %v2881_v34  ;;  %v2753_v40 = vmul.f32 %v4362_v36, %v2516_v19  ;;  %v2947_v61 = vrot.slane %v2946_v30, 2 }
 0x347   : > { %v2902_v57 = vsel %vm225_vm0, %v2748_v31, 0.0  ;;  %v3145_v60 = vrot.slane %v3144_v39, 1  ;;  %v3198_v43 = vadd.f32 %v3197_v11, %v3196_v6 }
 0x348   : > { %v2903_v15 = vrot.slane %v2902_v57, 4  ;;  %v2671_v24 = vpop.permute.xlu1 %2670  ;;  %v2884_v20 = vrot.slane %v2883_v10, 2  ;;  %v2937_v27 = vsel %vm225_vm0, %v2753_v40, 0.0  ;;  %v4366_v40 = vld [vmem:[%s4535_s5 + $0x1c0] sm:$0xff] }
 0x349   : > { %v2784_v2 = vmul.f32 %v4361_v58, %v2671_v24  ;;  %v3146_v12 = vadd.f32 %v3145_v60, %v3144_v39  ;;  %v2526_v35 = vpop.permute.xlu0 %2525  ;;  %v4365_v39 = vld [vmem:[%s4535_s5 + $0x98] sm:$0xff]  ;;  %v2938_v56 = vrot.slane %v2937_v27, 4  ;;  %v2894_v60 = vadd.f32 %v2893_v17, %v2892_v18 }
 0x34a   : > { %v2904_v5 = vadd.f32 %v2903_v15, %v2902_v57  ;;  %v2885_v0 = vadd.f32 %v2884_v20, %v2883_v10  ;;  %v2755_v54 = vmul.f32 %v4364_v41, %v2526_v35  ;;  %v2914_v57 = vrot.slane %v2913_v33, 1 }
 0x34b   : > { %v3154_v42 = vsel %vm225_vm0, %v2784_v2, 0.0  ;;  %v6278_v47 = vsel %vm3313_vm3, %v3146_v12, %v3139_v29  ;;  %v2928_v24 = vrot.slane %v2927_v21, 1  ;;  %v2948_v2 = vadd.f32 %v2947_v61, %v2946_v30  ;;  %v4370_v61 = vld [vmem:[%s4535_s5 + $0xd0] sm:$0xff] }
 0x34c   : > { %v2905_v7 = vrot.slane %v2904_v5, 2  ;;  %v2501_v23 = vpop.permute.xlu1 %2500  ;;  %v2886_v3 = vrot.slane %v2885_v0, 1  ;;  %v3155_v28 = vrot.slane %v3154_v42, 4  ;;  %v2951_v16 = vsel %vm225_vm0, %v2755_v54, 0.0 }
 0x34d   : > { %v2750_v50 = vmul.f32 %v4363_v53, %v2501_v23  ;;  %v2706_v34 = vpop.permute.xlu0 %2705  ;;  %v2952_v63 = vrot.slane %v2951_v16, 4  ;;  %v3199_v35 = vrot.slane %v3198_v43, 2  ;;  %v6293_v36 = vadd.f32 %v2914_v57, %v2913_v33  ;;  %v4368_v53 = vld [vmem:[%s4535_s5 + $0xb8] sm:$0xff] }
 0x34e   : > { %v2906_v26 = vadd.f32 %v2905_v7, %v2904_v5  ;;  %v2887_v29 = vadd.f32 %v2886_v3, %v2885_v0  ;;  %v3156_v19 = vadd.f32 %v3155_v28, %v3154_v42  ;;  %v2939_v0 = vadd.f32 %v2938_v56, %v2937_v27  ;;  %v4367_v3 = vld [vmem:[%s4535_s5 + $0x1d0] sm:$0xff]  ;;  %v4371_v56 = vld [vmem:[%s4535_s5 + $0x1d8] sm:$0xff] }
 0x34f   : > { %v2916_v59 = vsel %vm225_vm0, %v2750_v50, 0.0  ;;  %v3166_v30 = vrot.slane %v6290_v32, 1  ;;  %v2953_v37 = vadd.f32 %v2952_v63, %v2951_v16  ;;  %v2791_v11 = vmul.f32 %v4367_v3, %v2706_v34 }
 0x350   : > { %v2511_v22 = vpop.permute.xlu1 %2510  ;;  %v2907_v31 = vrot.slane %v2906_v26, 1  ;;  %v2917_v49 = vrot.slane %v2916_v59, 4  ;;  %v3330_v44 = vsel %vm3319_vm6, %v2887_v29, %v3329_v55  ;;  %v3157_v6 = vrot.slane %v3156_v19, 2 }
 0x351   : > { %v2752_v51 = vmul.f32 %v4365_v39, %v2511_v22  ;;  %v2541_v10 = vpop.permute.xlu0 %2540  ;;  %v3331_v5 = vsel %vm3321_vm7, %v2894_v60, %v3330_v44  ;;  %v2949_v28 = vrot.slane %v2948_v2, 1  ;;  %v3200_v29 = vadd.f32 %v3199_v35, %v3198_v43 }
 0x352   : > { %v2918_v52 = vadd.f32 %v2917_v49, %v2916_v59  ;;  %v2908_v58 = vadd.f32 %v2907_v31, %v2906_v26  ;;  %v3332_v7 = vsel %vm3323_vm8, %v6261_v45, %v3331_v5  ;;  %v6300_v26 = vadd.f32 %v2928_v24, %v2927_v21  ;;  %v4369_v45 = vld [vmem:[%s4535_s5 + $0xc8] sm:$0xff] }
 0x353   : > { %v2930_v15 = vsel %vm225_vm0, %v2752_v51, 0.0  ;;  %v3158_v17 = vadd.f32 %v3157_v6, %v3156_v19  ;;  %v2940_v27 = vrot.slane %v2939_v0, 2  ;;  %v2758_v41 = vmul.f32 %v4369_v45, %v2541_v10  ;;  %v4372_v6 = vld [vmem:[%s4535_s5 + $0xc0] sm:$0xff] }
 0x354   : > { %v2931_v4 = vrot.slane %v2930_v15, 4  ;;  %v2696_v20 = vpop.permute.xlu1 %2695  ;;  %v2919_v12 = vrot.slane %v2918_v52, 2  ;;  %v3333_v33 = vsel %vm3325_vm9, %v2908_v58, %v3332_v7  ;;  %v2954_v31 = vrot.slane %v2953_v37, 2 }
 0x355   : > { %v2546_v42 = vpop.permute.xlu0 %2545  ;;  %v2789_v13 = vmul.f32 %v4366_v40, %v2696_v20  ;;  %3863 = vmatmul.mubr.msk.f32.vlgmr.msra.gmra.mrb[28].mxu1 %vm225_vm0, %v3333_v33  ;;  %v3203_v49 = vsel %vm225_vm0, %v2791_v11, 0.0  ;;  %v6310_v51 = vadd.f32 %v2949_v28, %v2948_v2  ;;  %v3363_v44 = vsel %vm3315_vm4, %v6265_v9, %v6278_v47 }
 0x356   : > { %v2932_v18 = vadd.f32 %v2931_v4, %v2930_v15  ;;  %v2920_v46 = vadd.f32 %v2919_v12, %v2918_v52  ;;  %v2759_v59 = vmul.f32 %v4370_v61, %v2546_v42  ;;  %v2972_v19 = vsel %vm225_vm0, %v2758_v41, 0.0  ;;  %v4373_v42 = vld [vmem:[%s4535_s5 + $0xf0] sm:$0xff]  ;;  %v4374_v41 = vld [vmem:[%s4535_s5 + $0x1e0] sm:$0xff] }
 0x357   : > { %v3189_v34 = vsel %vm225_vm0, %v2789_v13, 0.0  ;;  %v3159_v10 = vrot.slane %v3158_v17, 1  ;;  %v3201_v57 = vrot.slane %v3200_v29, 1  ;;  %v2941_v60 = vadd.f32 %v2940_v27, %v2939_v0 }
 0x358   : > { %v2933_v23 = vrot.slane %v2932_v18, 2  ;;  %v2531_v1 = vpop.permute.xlu1 %2530  ;;  %v2921_v55 = vrot.slane %v2920_v46, 1  ;;  %v3190_v52 = vrot.slane %v3189_v34, 4  ;;  %v3204_v4 = vrot.slane %v3203_v49, 4 }
 0x359   : > { %v2756_v50 = vmul.f32 %v4368_v53, %v2531_v1  ;;  %v2566_v54 = vpop.permute.xlu0 %2565  ;;  %v2979_v20 = vsel %vm225_vm0, %v2759_v59, 0.0  ;;  %v2955_v2 = vadd.f32 %v2954_v31, %v2953_v37  ;;  %v2973_v12 = vrot.slane %v2972_v19, 4 }
 0x35a   : > { %v2934_v22 = vadd.f32 %v2933_v23, %v2932_v18  ;;  %v2922_v24 = vadd.f32 %v2921_v55, %v2920_v46  ;;  %v2980_v18 = vrot.slane %v2979_v20, 4  ;;  %v2763_v0 = vmul.f32 %v4373_v42, %v2566_v54 }
 0x35b   : > { %v2958_v21 = vsel %vm225_vm0, %v2756_v50, 0.0  ;;  %v3160_v40 = vadd.f32 %v3159_v10, %v3158_v17  ;;  %v6321_v13 = vadd.f32 %v3201_v57, %v3200_v29  ;;  %v2942_v46 = vrot.slane %v2941_v60, 1 }
 0x35c   : > { %v2959_v39 = vrot.slane %v2958_v21, 4  ;;  %v2711_v43 = vpop.permute.xlu1 %2710  ;;  %v2935_v58 = vrot.slane %v2934_v22, 1  ;;  %v3191_v7 = vadd.f32 %v3190_v52, %v3189_v34  ;;  %v3334_v23 = vsel %vm3313_vm3, %v2922_v24, %v6293_v36  ;;  %v4376_v24 = vld [vmem:[%s4535_s5 + $0xd8] sm:$0xff] }
 0x35d   : > { %v2792_v16 = vmul.f32 %v4371_v56, %v2711_v43  ;;  %v2576_v15 = vpop.permute.xlu0 %2575  ;;  %v3007_v11 = vsel %vm225_vm0, %v2763_v0, 0.0  ;;  %v2974_v33 = vadd.f32 %v2973_v12, %v2972_v19  ;;  %v2956_v29 = vrot.slane %v2955_v2, 1 }
 0x35e   : > { %v2960_v63 = vadd.f32 %v2959_v39, %v2958_v21  ;;  %v2936_v28 = vadd.f32 %v2935_v58, %v2934_v22  ;;  %v3205_v27 = vadd.f32 %v3204_v4, %v3203_v49  ;;  %v2981_v45 = vadd.f32 %v2980_v18, %v2979_v20  ;;  %v4375_v21 = vld [vmem:[%s4535_s5 + $0x100] sm:$0xff] }
 0x35f   : > { %v3210_v9 = vsel %vm225_vm0, %v2792_v16, 0.0  ;;  %v3192_v55 = vrot.slane %v3191_v7, 2  ;;  %v3008_v34 = vrot.slane %v3007_v11, 4  ;;  %v2765_v61 = vmul.f32 %v4375_v21, %v2576_v15 }
 0x360   : > { %v2536_v47 = vpop.permute.xlu1 %2535  ;;  %v2961_v5 = vrot.slane %v2960_v63, 2  ;;  %v3211_v53 = vrot.slane %v3210_v9, 4  ;;  %v6332_v59 = vsel %vm3317_vm5, %v3160_v40, %v3363_v44  ;;  %v2943_v31 = vadd.f32 %v2942_v46, %v2941_v60  ;;  %v4377_v40 = vld [vmem:[%s4535_s5 + $0xe8] sm:$0xff] }
 0x361   : > { %v2757_v35 = vmul.f32 %v4372_v6, %v2536_v47  ;;  %v6327_v1 = vpop.permute.xlu0 %2585  ;;  %v3335_v22 = vsel %vm3315_vm4, %v6300_v26, %v3334_v23  ;;  %v2975_v49 = vrot.slane %v2974_v33, 2  ;;  %v3206_v10 = vrot.slane %v3205_v27, 2 }
 0x362   : > { %v2962_v37 = vadd.f32 %v2961_v5, %v2960_v63  ;;  %v3336_v43 = vsel %vm3317_vm5, %v2936_v28, %v3335_v22  ;;  %v3212_v19 = vadd.f32 %v3211_v53, %v3210_v9  ;;  %v2982_v57 = vrot.slane %v2981_v45, 2  ;;  %v4379_v22 = vld [vmem:[%s4535_s5 + $0xe0] sm:$0xff] }
 0x363   : > { %v2965_v3 = vsel %vm225_vm0, %v2757_v35, 0.0  ;;  %v2957_v44 = vadd.f32 %v2956_v29, %v2955_v2  ;;  %v6339_v60 = vadd.f32 %v3192_v55, %v3191_v7  ;;  %v3009_v63 = vadd.f32 %v3008_v34, %v3007_v11 }
 0x364   : > { %v2966_v50 = vrot.slane %v2965_v3, 4  ;;  %v2716_v17 = vpop.permute.xlu1 %2715  ;;  %v2963_v39 = vrot.slane %v2962_v37, 1  ;;  %v3021_v26 = vsel %vm225_vm0, %v2765_v61, 0.0  ;;  %v3337_v9 = vsel %vm3319_vm6, %v2943_v31, %v3336_v43 }
 0x365   : > { %v2793_v54 = vmul.f32 %v4374_v41, %v2716_v17  ;;  %v2686_v4 = vpop.permute.xlu0 %2685  ;;  %v2976_v47 = vadd.f32 %v2975_v49, %v2974_v33  ;;  %v3213_v5 = vrot.slane %v3212_v19, 2  ;;  %v2983_v42 = vadd.f32 %v2982_v57, %v2981_v45 }
 0x366   : > { %v2967_v36 = vadd.f32 %v2966_v50, %v2965_v3  ;;  %v2964_v20 = vadd.f32 %v2963_v39, %v2962_v37  ;;  %v3022_v0 = vrot.slane %v3021_v26, 4  ;;  %v3338_v2 = vsel %vm3321_vm7, %v6310_v51, %v3337_v9 }
 0x367   : > { %v3217_v52 = vsel %vm225_vm0, %v2793_v54, 0.0  ;;  %v6347_v7 = vadd.f32 %v3206_v10, %v3205_v27  ;;  %v3010_v23 = vrot.slane %v3009_v63, 2  ;;  %v3339_v3 = vsel %vm3323_vm8, %v2957_v44, %v3338_v2 }
 0x368   : > { %v2968_v56 = vrot.slane %v2967_v36, 2  ;;  %v2551_v16 = vpop.permute.xlu1 %2550  ;;  %v3218_v6 = vrot.slane %v3217_v52, 4  ;;  %v3194_v11 = vrot.slane %v6339_v60, 1  ;;  %v3340_v33 = vsel %vm3325_vm9, %v2964_v20, %v3339_v3  ;;  %v4382_v20 = vld [vmem:[%s4535_s5 + $0xf8] sm:$0xff] }
 0x369   : > { %v2760_v15 = vmul.f32 %v4376_v24, %v2551_v16  ;;  %v2691_v50 = vpop.permute.xlu0 %2690  ;;  %v6353_v17 = vadd.f32 %v3213_v5, %v3212_v19  ;;  %3865 = vmatprep.mubr.msk.f32.mxu1 %vm225_vm0, %v3340_v33  ;;  %v2977_v41 = vrot.slane %v2976_v47, 1  ;;  %v2984_v54 = vrot.slane %v2983_v42, 1  ;;  %v4380_v19 = vld [vmem:[%s4535_s5 + $0x1b0] sm:$0xff]  ;;  %v4381_v16 = vld [vmem:[%s4535_s5 + $0x1b8] sm:$0xff] }
 0x36a   : > { %v2969_v58 = vadd.f32 %v2968_v56, %v2967_v36  ;;  %v3219_v51 = vadd.f32 %v3218_v6, %v3217_v52  ;;  %v3023_v55 = vadd.f32 %v3022_v0, %v3021_v26  ;;  %v4378_v36 = vld [vmem:[%s4535_s5 + $0x110] sm:$0xff]  ;;  %v3011_v21 = vadd.f32 %v3010_v23, %v3009_v63  ;;  %v4383_v23 = vld [vmem:[%s4535_s5 + $0x1f8] sm:$0xff] }
 0x36b   : > { %v2986_v12 = vsel %vm225_vm0, %v2760_v15, 0.0  ;;  %v2767_v34 = vmul.f32 %v4378_v36, %v6327_v1  ;;  %v2787_v56 = vmul.f32 %v4380_v19, %v2686_v4  ;;  %v2788_v10 = vmul.f32 %v4381_v16, %v2691_v50 }
 0x36c   : > { %v2987_v35 = vrot.slane %v2986_v12, 4  ;;  %v2561_v18 = vpop.permute.xlu1 %2560  ;;  %v2970_v28 = vrot.slane %v2969_v58, 1  ;;  %v3220_v57 = vrot.slane %v3219_v51, 2  ;;  %v2978_v1 = vadd.f32 %v2977_v41, %v2976_v47 }
 0x36d   : > { %v2762_v46 = vmul.f32 %v4377_v40, %v2561_v18  ;;  %v3035_v49 = vsel %vm225_vm0, %v2767_v34, 0.0  ;;  %v2985_v63 = vadd.f32 %v2984_v54, %v2983_v42  ;;  %v2731_v9 = vpop.permute.xlu0 %2730  ;;  %v3024_v6 = vrot.slane %v3023_v55, 2 }
 0x36e   : > { %v2988_v37 = vadd.f32 %v2987_v35, %v2986_v12  ;;  %v2971_v43 = vadd.f32 %v2970_v28, %v2969_v58  ;;  %v3036_v24 = vrot.slane %v3035_v49, 4  ;;  %v3012_v58 = vrot.slane %v3011_v21, 1 }
 0x36f   : > { %v3000_v53 = vsel %vm225_vm0, %v2762_v46, 0.0  ;;  %v3175_v4 = vsel %vm225_vm0, %v2787_v56, 0.0  ;;  %v3182_v2 = vsel %vm225_vm0, %v2788_v10, 0.0  ;;  %v6368_v47 = vadd.f32 %v3220_v57, %v3219_v51  ;;  %v4385_v10 = vld [vmem:[%s4535_s5 + $0x118] sm:$0xff] }
 0x370   : > { %v2989_v29 = vrot.slane %v2988_v37, 2  ;;  %v3001_v27 = vrot.slane %v3000_v53, 4  ;;  %v2556_v45 = vpop.permute.xlu1 %2555  ;;  %v3341_v35 = vsel %vm3313_vm3, %v2978_v1, %v2971_v43  ;;  %v3037_v40 = vadd.f32 %v3036_v24, %v3035_v49 }
 0x371   : > { %v2761_v39 = vmul.f32 %v4379_v22, %v2556_v45  ;;  %v3176_v28 = vrot.slane %v3175_v4, 4  ;;  %v3025_v45 = vadd.f32 %v3024_v6, %v3023_v55  ;;  %v3183_v41 = vrot.slane %v3182_v2, 4  ;;  %v4386_v6 = vld [vmem:[%s4535_s5 + $0x1e8] sm:$0xff] }
 0x372   : > { %v2990_v61 = vadd.f32 %v2989_v29, %v2988_v37  ;;  %v3002_v31 = vadd.f32 %v3001_v27, %v3000_v53  ;;  %v2796_v37 = vmul.f32 %v4383_v23, %v2731_v9  ;;  %v4384_v53 = vld [vmem:[%s4535_s5 + $0x108] sm:$0xff]  ;;  %v3342_v29 = vsel %vm3315_vm4, %v2985_v63, %v3341_v35 }
 0x373   : > { %v2993_v15 = vsel %vm225_vm0, %v2761_v39, 0.0  ;;  %v3013_v54 = vadd.f32 %v3012_v58, %v3011_v21  ;;  %v3038_v22 = vrot.slane %v3037_v40, 2  ;;  %v3177_v56 = vadd.f32 %v3176_v28, %v3175_v4 }
 0x374   : > { %v3003_v52 = vrot.slane %v3002_v31, 2  ;;  %v2571_v44 = vpop.permute.xlu1 %2570  ;;  %v2994_v26 = vrot.slane %v2993_v15, 4  ;;  %v2991_v5 = vrot.slane %v2990_v61, 1  ;;  %v3238_v43 = vsel %vm225_vm0, %v2796_v37, 0.0 }
 0x375   : > { %v2764_v12 = vmul.f32 %v4382_v20, %v2571_v44  ;;  %v3184_v21 = vadd.f32 %v3183_v41, %v3182_v2  ;;  %v3239_v44 = vrot.slane %v3238_v43, 4  ;;  %v3178_v58 = vrot.slane %v3177_v56, 2  ;;  %v4387_v41 = vld [vmem:[%s4535_s5 + $0x1f0] sm:$0xff]  ;;  %s135_s5 = sand.u32 1, %s4442_s10  }
 0x376   : > { %v2995_v18 = vadd.f32 %v2994_v26, %v2993_v15  ;;  %v3004_v42 = vadd.f32 %v3003_v52, %v3002_v31  ;;  %v2992_v27 = vadd.f32 %v2991_v5, %v2990_v61  ;;  %v3026_v61 = vrot.slane %v3025_v45, 1  ;;  %s3585_s6 = sshll.u32 %s135_s5, 6  ;;  %s6445_s13 = scalar_lea.sflag [#allocation3], %s135_s5 }
 0x377   : > { %v3014_v0 = vsel %vm225_vm0, %v2764_v12, 0.0  ;;  %v3039_v26 = vadd.f32 %v3038_v22, %v3037_v40  ;;  %v3240_v37 = vadd.f32 %v3239_v44, %v3238_v43  ;;  %s137_s14 = scalar_lea.vmem [#allocation2], %s3585_s6 }
 0x378   : > { %v2581_v46 = vpop.permute.xlu1 %2580  ;;  %v2996_v3 = vrot.slane %v2995_v18, 2  ;;  %v3015_v33 = vrot.slane %v3014_v0, 4  ;;  %v3005_v31 = vrot.slane %v3004_v42, 1  ;;  %v3343_v55 = vsel %vm3317_vm5, %v2992_v27, %v3342_v29  ;;  %s3519_s17 = sshll.u32 %s137_s14, 4  ;;  %s6441_s17 = int_to_ptr.vmem [resolvable:$true] %s3519_s17 }
 0x379   : > { %v2766_v50 = vmul.f32 %v4384_v53, %v2581_v46  ;;  %v3040_v29 = vrot.slane %v3039_v26, 1  ;;  %v3179_v27 = vadd.f32 %v3178_v58, %v3177_v56  ;;  %v3241_v43 = vrot.slane %v3240_v37, 2  ;;  %s4388_s24 = scalar_lea.vmem %s6441_s17, 1024  ;;  %p4395_p0 = scmp.lt.s32.totalorder %s6441_s17, %s4393_s26 }
 0x37a   : > { %v2997_v36 = vadd.f32 %v2996_v3, %v2995_v18  ;;  %v3016_v51 = vadd.f32 %v3015_v33, %v3014_v0  ;;  %v3006_v63 = vadd.f32 %v3005_v31, %v3004_v42  ;;  %v3185_v18 = vrot.slane %v3184_v21, 2  ;;  %p4389_p11 = scmp.ne.s32.totalorder %s6441_s17, %s4388_s24  ;;  %p4396_p1 = scmp.lt.s32.totalorder %s4394_s27, %s4388_s24 }
 0x37b   : > { %v3028_v34 = vsel %vm225_vm0, %v2766_v50, 0.0  ;;  %v3027_v3 = vadd.f32 %v3026_v61, %v3025_v45  ;;  %v3195_v45 = vadd.f32 %v3194_v11, %v6339_v60  ;;  %v3041_v61 = vadd.f32 %v3040_v29, %v3039_v26 }
 0x37c   : > { %v3029_v39 = vrot.slane %v3028_v34, 4  ;;  %v2591_v49 = vpop.permute.xlu1 %2590  ;;  %v2998_v19 = vrot.slane %v2997_v36, 1  ;;  %v3017_v16 = vrot.slane %v3016_v51, 2  ;;  %v3167_v11 = vadd.f32 %v3166_v30, %v6290_v32  ;;  %p4390_p12 = pnand %p4389_p11, %p4509_p5  ;;  %p4397_p2 = por %p4396_p1, %p4395_p0 }
 0x37d   : > { %v2768_v57 = vmul.f32 %v4385_v10, %v2591_v49 }
 0x37e   : > { %v3030_v52 = vadd.f32 %v3029_v39, %v3028_v34  ;;  %v2999_v24 = vadd.f32 %v2998_v19, %v2997_v36  ;;  %v3018_v15 = vadd.f32 %v3017_v16, %v3016_v51  ;;  %v3186_v34 = vadd.f32 %v3185_v18, %v3184_v21  ;;  %p4391_p13 = pneg %p4390_p12 }
 0x37f   : > { %v3042_v1 = vsel %vm225_vm0, %v2768_v57, 0.0  ;;  %v3215_v57 = vrot.slane %v6353_v17, 1  ;;  %v3180_v21 = vrot.slane %v3179_v27, 1  ;;  %v3365_v32 = vsel %vm3319_vm6, %v3167_v11, %v6332_v59 }
 0x380   : > { %v3031_v20 = vrot.slane %v3030_v52, 2  ;;  %v3043_v12 = vrot.slane %v3042_v1, 4  ;;  %v2721_v9 = vpop.permute.xlu1 %2720  ;;  %v3019_v5 = vrot.slane %v3018_v15, 1  ;;  %v3344_v35 = vsel %vm3319_vm6, %v2999_v24, %v3343_v55  ;;  %p4398_p3 = pnand %p4397_p2, %p4391_p13 }
 0x381   : > { %v2794_v4 = vmul.f32 %v4386_v6, %v2721_v9  ;;  %v3345_v46 = vsel %vm3321_vm7, %v3006_v63, %v3344_v35  ;;  %v3222_v55 = vrot.slane %v6368_v47, 1  ;;  %v3216_v58 = vadd.f32 %v3215_v57, %v6353_v17 }
 0x382   : > { %v3032_v0 = vadd.f32 %v3031_v20, %v3030_v52  ;;  %v3044_v2 = vadd.f32 %v3043_v12, %v3042_v1  ;;  %v3020_v23 = vadd.f32 %v3019_v5, %v3018_v15  ;;  %v3346_v40 = vsel %vm3323_vm8, %v3013_v54, %v3345_v46 }
 0x383   : > { %v3224_v42 = vsel %vm225_vm0, %v2794_v4, 0.0  ;;  %v3208_v54 = vrot.slane %v6347_v7, 1  ;;  %v3187_v52 = vrot.slane %v3186_v34, 1  ;;  %v3242_v1 = vadd.f32 %v3241_v43, %v3240_v37 }
 0x384   : > { %v3033_v28 = vrot.slane %v3032_v0, 1  ;;  %v3045_v33 = vrot.slane %v3044_v2, 2  ;;  %v3225_v53 = vrot.slane %v3224_v42, 4  ;;  %v2726_v50 = vpop.permute.xlu1 %2725  ;;  %v3347_v51 = vsel %vm3325_vm9, %v3020_v23, %v3346_v40 }
 0x385   : > { %v2795_v36 = vmul.f32 %v4387_v41, %v2726_v50  ;;  %3866 = vmatmul.mubr.msk.f32.gmra.mrb[30].mxu1 %vm225_vm0, %v3347_v51  ;;  %v3209_v44 = vadd.f32 %v3208_v54, %v6347_v7  ;;  %v3369_v20 = vsel %vm3313_vm3, %v6321_v13, %v3195_v45  ;;  %v3181_v5 = vadd.f32 %v3180_v21, %v3179_v27 }
 0x386   : > { %v3034_v31 = vadd.f32 %v3033_v28, %v3032_v0  ;;  %v3046_v22 = vadd.f32 %v3045_v33, %v3044_v2  ;;  %v3226_v39 = vadd.f32 %v3225_v53, %v3224_v42  ;;  %v3223_v30 = vadd.f32 %v3222_v55, %v6368_v47 }
 0x387   : > { %v3231_v49 = vsel %vm225_vm0, %v2795_v36, 0.0  ;;  %v3188_v7 = vadd.f32 %v3187_v52, %v3186_v34  ;;  %v3243_v35 = vrot.slane %v3242_v1, 1  ;;  %v3370_v17 = vsel %vm3315_vm4, %v3209_v44, %v3369_v20 }
 0x388   : > { %v3348_v19 = vsel %vm3313_vm3, %v3034_v31, %v3027_v3  ;;  %v3047_v56 = vrot.slane %v3046_v22, 1  ;;  %v3227_v16 = vrot.slane %v3226_v39, 2  ;;  %v3232_v10 = vrot.slane %v3231_v49, 4 }
 0x389   : > { %v3349_v63 = vsel %vm3315_vm4, %v3041_v61, %v3348_v19  ;;  %v3366_v59 = vsel %vm3321_vm7, %v6269_v8, %v3365_v32  ;;  %v3371_v47 = vsel %vm3317_vm5, %v3216_v58, %v3370_v17  ;;  %v3244_v37 = vadd.f32 %v3243_v35, %v3242_v1 }
 0x38a   : > { %v3048_v24 = vadd.f32 %v3047_v56, %v3046_v22  ;;  %v3228_v15 = vadd.f32 %v3227_v16, %v3226_v39  ;;  %v3233_v60 = vadd.f32 %v3232_v10, %v3231_v49  ;;  %v3372_v23 = vsel %vm3319_vm6, %v3223_v30, %v3371_v47 }
 0x38c   : > { %v3350_v12 = vsel %vm3317_vm5, %v3048_v24, %v3349_v63  ;;  %v3229_v26 = vrot.slane %v3228_v15, 1  ;;  %v3234_v9 = vrot.slane %v3233_v60, 2 }
 0x38d   : > { %v3351_v6 = vsel %vm3319_vm6, %v6245_v25, %v3350_v12 }
 0x38e   : > { %v3235_v4 = vadd.f32 %v3234_v9, %v3233_v60  ;;  %v3352_v13 = vsel %vm3321_vm7, %v6243_v14, %v3351_v6  ;;  %v3230_v18 = vadd.f32 %v3229_v26, %v3228_v15  ;;  %v3367_v14 = vsel %vm3323_vm8, %v3181_v5, %v3366_v59 }
 0x38f   : > { %v3353_v0 = vsel %vm3323_vm8, %v6251_v38, %v3352_v13  ;;  %v3368_v38 = vsel %vm3325_vm9, %v3188_v7, %v3367_v14 }
 0x390   : > { %v3236_v2 = vrot.slane %v3235_v4, 1  ;;  %v3354_v25 = vsel %vm3325_vm9, %v6247_v48, %v3353_v0  ;;  %v3373_v48 = vsel %vm3321_vm7, %v3230_v18, %v3372_v23 }
 0x391   : > { %3868 = vmatprep.mubr.msk.f32.mxu1 %vm225_vm0, %v3354_v25 }
 0x392   : > { %v3237_v46 = vadd.f32 %v3236_v2, %v3235_v4  ;;  %3869 = vmatmul.mubr.msk.f32.gmra.mrb[32].mxu1 %vm225_vm0, %v6238_v62  ;;  %v3655_v62 = vld [vmem:[%s6487_s1 + $0x58] ss:$0 sm:$0xff] }
 0x393   : > { %3871 = vmatprep.mubr.msk.f32.mxu1 %vm225_vm0, %v3368_v38 }
 0x394   : > { %v3374_v8 = vsel %vm3323_vm8, %v3237_v46, %v3373_v48 }
 0x395   : > { %v3375_v42 = vsel %vm3325_vm9, %v3244_v37, %v3374_v8 }
 0x396   : > { %3872 = vmatmul.mubr.msk.f32.gmra.mrb[34].mxu1 %vm225_vm0, %v3375_v42 }
 0x428   : > { %v3864_v40 = vpop.f32.mrb[28].mxu1 }
 0x429   : > { %v3464_v3 = vadd.f32 %v3864_v40, %v3655_v62  ;;  %v3458_v28 = vpop.f32.mrb[29].mxu1 }
 0x42a   : > { %v3459_v33 = vadd.f32 %v3655_v62, %v3458_v28 }
 0x42b   : > { %3498 = vst [vmem:[%s137_s14 + $0x8] sm:$0xff] %v3464_v3 }
 0x42c   : > { %3497 = vst [vmem:[%s137_s14] sm:$0xff] %v3459_v33 }
 0x458   : > { %v3867_v53 = vpop.f32.mrb[30].mxu1 }
 0x459   : > { %v3474_v50 = vadd.f32 %v3867_v53, %v3655_v62  ;;  %v3468_v29 = vpop.f32.mrb[31].mxu1 }
 0x45a   : > { %v3469_v27 = vadd.f32 %v3655_v62, %v3468_v29 }
 0x45b   : > { %3500 = vst [vmem:[%s137_s14 + $0x18] sm:$0xff] %v3474_v50 }
 0x45c   : > { %3499 = vst [vmem:[%s137_s14 + $0x10] sm:$0xff] %v3469_v27 }
 0x465   : > { %v3870_v41 = vpop.f32.mrb[32].mxu1 }
 0x466   : > { %v3484_v36 = vadd.f32 %v3870_v41, %v3655_v62  ;;  %v3478_v51 = vpop.f32.mrb[33].mxu1 }
 0x467   : > { %v3479_v34 = vadd.f32 %v3655_v62, %v3478_v51 }
 0x468   : > { %3502 = vst [vmem:[%s137_s14 + $0x28] sm:$0xff] %v3484_v36 }
 0x469   : > { %3501 = vst [vmem:[%s137_s14 + $0x20] sm:$0xff] %v3479_v34  ;;  %v3873_v31 = vpop.f32.mrb[34].mxu1 }
 0x46a   : > { %v3494_v22 = vadd.f32 %v3873_v31, %v3655_v62  ;;  %v3488_v39 = vpop.f32.mrb[35].mxu1 }
 0x46b   : > { %v3489_v45 = vadd.f32 %v3655_v62, %v3488_v39 }
 0x46c   : > { %3504 = vst [vmem:[%s137_s14 + $0x38] sm:$0xff] %v3494_v22 }
 0x46d   : > { %3503 = vst [vmem:[%s137_s14 + $0x30] sm:$0xff] %v3489_v45 }
 0x46e   : > { %4401 = shalt.err (!%p4398_p3)
}
 0x46f   : > { %s4402_s28 = scalar_lea.hbm %s6439_s23, 1024  ;;  %s4406_s3 = scalar_lea.hbm %s6488_s2, 4096 }
 0x470   : > { %p4403_p4 = scmp.ne.s32.totalorder %s6439_s23, %s4402_s28  ;;  %p4407_p9 = scmp.lt.u32.totalorder %s6439_s23, %s6488_s2 }
 0x471   : > { %p4408_p10 = scmp.lt.u32.totalorder %s4406_s3, %s4402_s28  ;;  %p4410_p12 = scmp.lt.u32.totalorder %s4402_s28, %s6439_s23 }
 0x472   : > { %p4404_p7 = pnand %p4403_p4, %p4509_p5 }
 0x473   : > { %p4409_p11 = por %p4408_p10, %p4407_p9 }
 0x474   : > { %p4405_p8 = pneg %p4404_p7 }
 0x475   : > { %p4411_p13 = por %p4410_p12, %p4409_p11 }
 0x477   : > { %p4412_p0 = pnand %p4411_p13, %p4405_p8 }
 0x479   : > { %4415 = shalt.err (!%p4412_p0)
}
 0x47a   : > { %s4454_s6 = smov 128   ;;  %s4455_s7 = smov 8  }
 0x47b   : > { %3894 = dma.vmem_to_hbm [thread:$0]  (%p4509_p5), %s6441_s17, 1024, %s6439_s23, %s6445_s13, %s4454_s6, %s4454_s6, %s4455_s7  }
 0x47c PF: > { %p3900_p1 = scmp.ge.s32.totalorder %s4450_s12, 2  ;;  %s3534_s8 = sand.u32 1, %s4438_s9  }
 0x47d   : > { %s3535_s14 = scalar_lea.sflag [#allocation3], %s3534_s8 }
 0x47e   : > { %p3897_p2 = pnand %p3900_p1, %p4513_p6 }
 0x480   : > { %4433 = dma.done.wait (!%p3897_p2), %s3535_s14, 1024  }
 0x481   : > { %4435 = vsyncadd (!%p3897_p2), %s3535_s14, 4294966272  ;;  %p12_p3 = scmp.ge.s32.totalorder %s4496_s15, 6   ;;  %s6678_s9 = smov %s4442_s10 }
 0x482   : > { %s6679_s10 = smov %s4446_s11  ;;  %s6680_s11 = smov %s4507_s18 }
 0x483   : > { %s6681_s12 = smov %s4496_s15  ;;  %14 = sbr.rel (!%p12_p3) target bundleno = 3 (0x3), region = 63 }
 0x48a   :  { %3540 = vsyncpa [#allocation3], 1 }
 0x48b   :  { %3542 = vsyncpa [#allocation3 + $0x1], 1 }

</bundles_post_ra>
